<compile_context>
chip_gen: v7x
topology: tpu7x:2x2x1
jax: 0.10.0
libtpu: 0.0.40
codegen_flags: <defaults>
</compile_context>

<pallas_src>
import math
from functools import partial

import jax
import jax.numpy as jnp
from jax.experimental import pallas as pl
from jax.experimental.pallas import tpu as pltpu


# ------------------------------ small helpers --------------------------------

def _pick_tile(dim, pref, split_small=True):
    """Largest convenient tile <= pref that divides dim. Dims already <= pref are split in two
    when cheap so 'parallel' grid axes get >= 2 steps (v7x megacore)."""
    if dim <= pref:
        if split_small and dim >= 16 and dim % 16 == 0:
            return dim // 2
        return dim
    for t in (pref, 1024, 512, 256, 128, 64, 32, 16, 8):
        if t <= pref and dim % t == 0:
            return t
    return dim


def _bytes(shape, dtype):
    return math.prod(shape) * jnp.dtype(dtype).itemsize


def _vmem_limit(block_bytes, extra=0):
    """Explicit scoped-VMEM budget: double-buffered pipeline blocks + in-kernel temporaries
    + compiler scratch margin. Capped at 64 MiB (v7x physical VMEM), floored at 16 MiB."""
    need = 2 * block_bytes + extra + (8 << 20)
    return int(min(max(need, 16 << 20), 64 << 20))


# ------------------------------ Pallas kernels --------------------------------

def _matmul_kernel(x_ref, w_ref, o_ref):
    # bf16 x bf16 on the MXU, f32 accumulation, bf16 store.
    xb = x_ref[...].astype(jnp.bfloat16)
    o_ref[...] = jnp.dot(xb, w_ref[...],
                         preferred_element_type=jnp.float32).astype(o_ref.dtype)


def matmul_rows(x, w):
    """y = x @ w (no bias). Row-tiled parallel grid; bf16 in/out, f32 accumulation."""
    M, K = x.shape
    N = w.shape[1]
    tm = _pick_tile(M, 512)
    blocks = (_bytes((tm, K), jnp.bfloat16) + _bytes((K, N), jnp.bfloat16)
              + _bytes((tm, N), jnp.bfloat16))
    return pl.pallas_call(
        _matmul_kernel,
        out_shape=jax.ShapeDtypeStruct((M, N), jnp.bfloat16),
        grid=(M // tm,),
        in_specs=[pl.BlockSpec((tm, K), lambda i: (i, 0)),
                  pl.BlockSpec((K, N), lambda i: (0, 0))],
        out_specs=pl.BlockSpec((tm, N), lambda i: (i, 0)),
        compiler_params=pltpu.CompilerParams(
            dimension_semantics=("parallel",),
            vmem_limit_bytes=_vmem_limit(blocks, extra=_bytes((tm, N), jnp.float32))),
    )(x, w)


def _attn_kernel(q_ref, kv_ref, bias_ref, o_ref, p_ref=None, *,
                 num_heads, head_dim, scale, k_start, v_start, return_probs):
    # One (batch, q-tile) per grid step; heads are split in-kernel (VMEM-local reshape),
    # output is stored lane-dense as (tq, E).
    E = num_heads * head_dim
    tq = q_ref.shape[1]
    S = kv_ref.shape[1]

    q = q_ref[0, :, 0:E]                             # (tq, E) bf16 (Q cols lead the slab)
    k = kv_ref[0, :, k_start:k_start + E]            # (S, E)  bf16
    v = kv_ref[0, :, v_start:v_start + E]            # (S, E)  bf16

    q3 = q.reshape(tq, num_heads, head_dim)
    k3 = k.reshape(S, num_heads, head_dim)
    v3 = v.reshape(S, num_heads, head_dim)

    s = jnp.einsum("thd,shd->hts", q3, k3,
                   preferred_element_type=jnp.float32) * scale      # (H, tq, S) f32
    s = s + bias_ref[0][None, :, :]                  # additive mask broadcast over heads
    mx = jnp.max(s, axis=-1, keepdims=True)
    e = jnp.exp(s - mx)
    denom = jnp.sum(e, axis=-1, keepdims=True)
    if return_probs:
        p = e / denom                                # exact: probs are user-visible output
    else:
        p = e * pl.reciprocal(denom, approx=True)    # EUP slot, free-ish

    o = jnp.einsum("hts,shd->thd", p.astype(v3.dtype), v3,
                   preferred_element_type=jnp.float32)              # (tq, H, Dh) f32
    o_ref[0] = o.reshape(tq, E).astype(o_ref.dtype)                 # lane-dense store
    if return_probs:
        p_ref[0] = p


def attention(q_arr, kv_arr, bias, *, num_heads, head_dim, scale,
              kv_block_width, kv_col, k_start, v_start, return_probs):
    """q_arr: (B, T, QW) bf16 (QW = E or 3E, Q columns first); kv_arr: (B, S, KVW) bf16
    where the (S, 2E-or-3E) K/V slab for this call starts at column kv_col*kv_block_width;
    bias: (B, T, S) f32 additive mask. Returns (B, T, E) bf16 [, (B, H, T, S) f32 probs]."""
    B, T, QW = q_arr.shape
    S = kv_arr.shape[1]
    H, Dh = num_heads, head_dim
    E = H * Dh
    tq = _pick_tile(T, 256, split_small=False)
    grid = (B, T // tq)

    in_specs = [pl.BlockSpec((1, tq, QW), lambda b, qi: (b, qi, 0)),
                pl.BlockSpec((1, S, kv_block_width), lambda b, qi: (b, 0, kv_col)),
                pl.BlockSpec((1, tq, S), lambda b, qi: (b, qi, 0))]
    kern = partial(_attn_kernel, num_heads=H, head_dim=Dh, scale=scale,
                   k_start=k_start, v_start=v_start, return_probs=return_probs)

    blocks = (_bytes((1, tq, QW), jnp.bfloat16)
              + _bytes((1, S, kv_block_width), jnp.bfloat16)
              + _bytes((1, tq, S), jnp.float32)
              + _bytes((1, tq, E), jnp.bfloat16)
              + (_bytes((1, H, tq, S), jnp.float32) if return_probs else 0))
    extra = 4 * _bytes((H, tq, S), jnp.float32)      # in-kernel scores / exp / probs
    cp = pltpu.CompilerParams(dimension_semantics=("parallel", "parallel"),
                              vmem_limit_bytes=_vmem_limit(blocks, extra))

    if return_probs:
        return pl.pallas_call(
            kern,
            out_shape=(jax.ShapeDtypeStruct((B, T, E), jnp.bfloat16),
                       jax.ShapeDtypeStruct((B, H, T, S), jnp.float32)),
            grid=grid,
            in_specs=in_specs,
            out_specs=(pl.BlockSpec((1, tq, E), lambda b, qi: (b, qi, 0)),
                       pl.BlockSpec((1, H, tq, S), lambda b, qi: (b, 0, qi, 0))),
            compiler_params=cp,
        )(q_arr, kv_arr, bias)
    return pl.pallas_call(
        kern,
        out_shape=jax.ShapeDtypeStruct((B, T, E), jnp.bfloat16),
        grid=grid,
        in_specs=in_specs,
        out_specs=pl.BlockSpec((1, tq, E), lambda b, qi: (b, qi, 0)),
        compiler_params=cp,
    )(q_arr, kv_arr, bias)


def _proj_add_ln_kernel(a_ref, w_ref, b_ref, r_ref, g_ref, be_ref, o_ref, *, eps):
    # fused: attention-output projection + bias + residual add + LayerNorm (f32 math, bf16 store).
    y = jnp.dot(a_ref[...], w_ref[...], preferred_element_type=jnp.float32) + b_ref[...]
    x = y + r_ref[...].astype(jnp.float32)
    mu = jnp.mean(x, axis=-1, keepdims=True)
    var = jnp.mean(jnp.square(x - mu), axis=-1, keepdims=True)
    o_ref[...] = ((x - mu) * jax.lax.rsqrt(var + eps) * g_ref[...]
                  + be_ref[...]).astype(o_ref.dtype)


def proj_add_ln(a, w, b, resid, gamma, beta, eps=1e-5):
    M, E = resid.shape
    tm = _pick_tile(M, 512)
    blocks = (3 * _bytes((tm, E), jnp.bfloat16) + _bytes((E, E), jnp.bfloat16)
              + 3 * _bytes((1, E), jnp.float32))
    return pl.pallas_call(
        partial(_proj_add_ln_kernel, eps=eps),
        out_shape=jax.ShapeDtypeStruct((M, E), jnp.bfloat16),
        grid=(M // tm,),
        in_specs=[pl.BlockSpec((tm, E), lambda i: (i, 0)),
                  pl.BlockSpec((E, E), lambda i: (0, 0)),
                  pl.BlockSpec((1, E), lambda i: (0, 0)),
                  pl.BlockSpec((tm, E), lambda i: (i, 0)),
                  pl.BlockSpec((1, E), lambda i: (0, 0)),
                  pl.BlockSpec((1, E), lambda i: (0, 0))],
        out_specs=pl.BlockSpec((tm, E), lambda i: (i, 0)),
        compiler_params=pltpu.CompilerParams(
            dimension_semantics=("parallel",),
            vmem_limit_bytes=_vmem_limit(blocks, extra=3 * _bytes((tm, E), jnp.float32))),
    )(a, w, b, resid, gamma, beta)


def _ffn_kernel(x_ref, w1_ref, b1_ref, w2_ref, b2_ref, g_ref, be_ref, o_ref, *, eps):
    # fused FFN: w1 + ReLU + w2 + residual + LayerNorm. Hidden (tm, FF) never leaves VMEM.
    xb = x_ref[...].astype(jnp.bfloat16)
    h = jnp.dot(xb, w1_ref[...], preferred_element_type=jnp.float32) + b1_ref[...]
    h = jnp.maximum(h, 0.0)
    y = jnp.dot(h.astype(jnp.bfloat16), w2_ref[...],
                preferred_element_type=jnp.float32) + b2_ref[...]
    x = y + xb.astype(jnp.float32)
    mu = jnp.mean(x, axis=-1, keepdims=True)
    var = jnp.mean(jnp.square(x - mu), axis=-1, keepdims=True)
    o_ref[...] = ((x - mu) * jax.lax.rsqrt(var + eps) * g_ref[...]
                  + be_ref[...]).astype(o_ref.dtype)


def ffn_add_ln(x, w1, b1, w2, b2, gamma, beta, eps=1e-5):
    M, E = x.shape
    FF = w1.shape[1]
    tm = _pick_tile(M, 512)
    blocks = (2 * _bytes((tm, E), jnp.bfloat16)
              + _bytes((E, FF), jnp.bfloat16) + _bytes((FF, E), jnp.bfloat16)
              + _bytes((1, FF), jnp.float32) + 3 * _bytes((1, E), jnp.float32))
    extra = 2 * _bytes((tm, FF), jnp.float32) + 2 * _bytes((tm, E), jnp.float32)
    return pl.pallas_call(
        partial(_ffn_kernel, eps=eps),
        out_shape=jax.ShapeDtypeStruct((M, E), jnp.bfloat16),
        grid=(M // tm,),
        in_specs=[pl.BlockSpec((tm, E), lambda i: (i, 0)),
                  pl.BlockSpec((E, FF), lambda i: (0, 0)),
                  pl.BlockSpec((1, FF), lambda i: (0, 0)),
                  pl.BlockSpec((FF, E), lambda i: (0, 0)),
                  pl.BlockSpec((1, E), lambda i: (0, 0)),
                  pl.BlockSpec((1, E), lambda i: (0, 0)),
                  pl.BlockSpec((1, E), lambda i: (0, 0))],
        out_specs=pl.BlockSpec((tm, E), lambda i: (i, 0)),
        compiler_params=pltpu.CompilerParams(
            dimension_semantics=("parallel",),
            vmem_limit_bytes=_vmem_limit(blocks, extra=extra)),
    )(x, w1, b1, w2, b2, gamma, beta)


def _classifier_kernel(x_ref, w_ref, b_ref, o_ref):
    # tied classifier: logits = x @ emb^T + b; the weight is pre-transposed to (E, V) so the MXU
    # sees a natural layout and the vocab output dimension is lane-dense.
    y = jnp.dot(x_ref[...].astype(jnp.bfloat16), w_ref[...],
                preferred_element_type=jnp.float32)
    o_ref[...] = y + b_ref[...]


def classifier(x, w_t, bias):
    M, E = x.shape
    V = w_t.shape[1]
    tm = _pick_tile(M, 512)
    tv = _pick_tile(V, 1024, split_small=False)      # never split the lane (vocab) dim below 128
    blocks = (_bytes((tm, E), jnp.bfloat16) + _bytes((E, tv), jnp.bfloat16)
              + _bytes((1, tv), jnp.float32) + _bytes((tm, tv), jnp.float32))
    return pl.pallas_call(
        _classifier_kernel,
        out_shape=jax.ShapeDtypeStruct((M, V), jnp.float32),
        grid=(V // tv, M // tm),                     # vocab outer: (E, V) weight streamed once
        in_specs=[pl.BlockSpec((tm, E), lambda j, i: (i, 0)),
                  pl.BlockSpec((E, tv), lambda j, i: (0, j)),
                  pl.BlockSpec((1, tv), lambda j, i: (0, j))],
        out_specs=pl.BlockSpec((tm, tv), lambda j, i: (i, j)),
        compiler_params=pltpu.CompilerParams(
            dimension_semantics=("parallel", "parallel"),
            vmem_limit_bytes=_vmem_limit(blocks, extra=_bytes((tm, tv), jnp.float32))),
    )(x, w_t, bias)


# ------------------------------ Model (glue) ----------------------------------

def sinusoidal_pos_encoding(T, E):
    pos = jnp.arange(T, dtype=jnp.float32)[:, None]
    i = jnp.arange(E, dtype=jnp.float32)[None, :]
    angle = pos / jnp.power(10000.0, 2.0 * jnp.floor(i / 2.0) / E)
    return jnp.where((jnp.arange(E) % 2 == 0)[None, :], jnp.sin(angle), jnp.cos(angle))


def transformer_decoder(params, input_ids, encoder_hidden_states, *,
                        num_heads, src_padding_mask=None, tgt_padding_mask=None,
                        no_peeking_mask=None):
    B, T = input_ids.shape
    S = encoder_hidden_states.shape[1]
    E = params["embedding"].shape[1]
    H = num_heads
    Dh = E // H
    scale = 1.0 / math.sqrt(Dh)
    nblk = len(params["blocks"])

    # TODO(synk): TextEmbedding source not provided — standard token embedding * sqrt(E)
    # + sinusoidal positional encoding assumed (dropout = identity).
    x = params["embedding"][input_ids] * math.sqrt(E) + sinusoidal_pos_encoding(T, E)[None]
    x2 = x.reshape(B * T, E).astype(jnp.bfloat16)          # bf16 activation stream
    enc2 = encoder_hidden_states.reshape(B * S, E).astype(jnp.bfloat16)

    # Small additive attention biases (True in a bool mask => position disallowed).
    self_bias = jnp.zeros((B, T, T), jnp.float32)
    if no_peeking_mask is not None:
        self_bias = self_bias + jnp.where(no_peeking_mask, -1e9, 0.0)[None]
    if tgt_padding_mask is not None:
        self_bias = self_bias + jnp.where(tgt_padding_mask, -1e9, 0.0)[:, None, :]
    cross_bias = jnp.zeros((B, T, S), jnp.float32)
    if src_padding_mask is not None:
        cross_bias = cross_bias + jnp.where(src_padding_mask, -1e9, 0.0)[:, None, :]

    # Hoisted cross K/V projection: encoder states are identical for every block, project once
    # against the concatenated (E, 2E*nblk) weight.
    kv_all = matmul_rows(enc2, params["cross_wkv_all"]).reshape(B, S, 2 * E * nblk)
    kv_host_slice = (2 * E) % 128 != 0 and nblk > 1   # BlockSpec needs a lane-aligned 2E column

    attn = None
    for li, bp in enumerate(params["blocks"]):
        last = (li == nblk - 1)

        # ---- self attention: fused QKV matmul, per-(batch, q-tile) attention, proj+add+LN ----
        qkv = matmul_rows(x2, bp["self_wqkv"]).reshape(B, T, 3 * E)   # (B, T, 3E) bf16
        a = attention(qkv, qkv, self_bias, num_heads=H, head_dim=Dh, scale=scale,
                      kv_block_width=3 * E, kv_col=0, k_start=E, v_start=2 * E,
                      return_probs=False)                              # (B, T, E) bf16
        x2 = proj_add_ln(a.reshape(B * T, E), bp["self_wo"], bp["self_bo"], x2,
                         bp["ln1_g"], bp["ln1_b"])

        # ---- cross attention (hoisted KV; probs only for the last block) ----
        q = matmul_rows(x2, bp["cross_wq"]).reshape(B, T, E)
        if kv_host_slice:
            kv_arr, kv_col = kv_all[:, :, li * 2 * E:(li + 1) * 2 * E], 0
        else:
            kv_arr, kv_col = kv_all, li
        if last:
            c, attn = attention(q, kv_arr, cross_bias, num_heads=H, head_dim=Dh, scale=scale,
                                kv_block_width=2 * E, kv_col=kv_col, k_start=0, v_start=E,
                                return_probs=True)
        else:
            c = attention(q, kv_arr, cross_bias, num_heads=H, head_dim=Dh, scale=scale,
                          kv_block_width=2 * E, kv_col=kv_col, k_start=0, v_start=E,
                          return_probs=False)
        x2 = proj_add_ln(c.reshape(B * T, E), bp["cross_wo"], bp["cross_bo"], x2,
                         bp["ln2_g"], bp["ln2_b"])

        # ---- fused feed-forward + residual + LN ----
        # Reference reuses norm2 for this residual (not norm3) — reproduced exactly.
        x2 = ffn_add_ln(x2, bp["ff_w1"], bp["ff_b1"], bp["ff_w2"], bp["ff_b2"],
                        bp["ln2_g"], bp["ln2_b"])

    # Classifier weight tied to the embedding matrix: logits = x @ emb^T + b
    # (pre-transposed persistent (E, V) bf16 copy -> natural MXU layout, lane-dense vocab output).
    logits = classifier(x2, params["cls_w_t"], params["cls_b"])
    return logits.reshape(B, T, -1), attn


# ------------------------------ Parameters ------------------------------------

def init_params(key, vocab, E, FF, num_blocks, pad_token_id=0):
    kit = iter(jax.random.split(key, 2 + num_blocks * 10))

    def xavier(shape):
        lim = math.sqrt(6.0 / (shape[0] + shape[1]))
        return jax.random.uniform(next(kit), shape, jnp.float32, -lim, lim)

    emb = jax.random.normal(next(kit), (vocab, E), jnp.float32) * 0.02
    if pad_token_id is not None:
        emb = emb.at[pad_token_id].set(0.0)

    blocks, cross_wkv_all = [], []
    for _ in range(num_blocks):
        wq, wk, wv, wo = (xavier((E, E)) for _ in range(4))
        cq, ck, cv, co = (xavier((E, E)) for _ in range(4))
        w1, w2 = xavier((E, FF)), xavier((FF, E))
        blocks.append({
            # qkv_bias=False in the reference -> no projection biases.
            "self_wqkv": jnp.concatenate([wq, wk, wv], axis=1).astype(jnp.bfloat16),
            "self_wo": wo.astype(jnp.bfloat16),
            "self_bo": jnp.zeros((1, E), jnp.float32),
            "cross_wq": cq.astype(jnp.bfloat16),
            "cross_wo": co.astype(jnp.bfloat16),
            "cross_bo": jnp.zeros((1, E), jnp.float32),
            "ff_w1": w1.astype(jnp.bfloat16), "ff_b1": jnp.zeros((1, FF), jnp.float32),
            "ff_w2": w2.astype(jnp.bfloat16), "ff_b2": jnp.zeros((1, E), jnp.float32),
            "ln1_g": jnp.ones((1, E), jnp.float32), "ln1_b": jnp.zeros((1, E), jnp.float32),
            "ln2_g": jnp.ones((1, E), jnp.float32), "ln2_b": jnp.zeros((1, E), jnp.float32),
            # norm3 exists in the module but is never used by the reference forward.
            "ln3_g": jnp.ones((1, E), jnp.float32), "ln3_b": jnp.zeros((1, E), jnp.float32),
        })
        cross_wkv_all.append(jnp.concatenate([ck, cv], axis=1))   # (E, 2E) per block

    return {"embedding": emb,
            # tied classifier: persistent pre-transposed bf16 copy (E, V).
            "cls_w_t": emb.T.astype(jnp.bfloat16),
            "cls_b": jnp.zeros((1, vocab), jnp.float32),
            # hoisted cross K/V projection weight, all blocks concatenated: (E, 2E*nblk).
            "cross_wkv_all": jnp.concatenate(cross_wkv_all, axis=1).astype(jnp.bfloat16),
            "blocks": blocks}


# --------------------------------- Main ----------------------------------------

if __name__ == "__main__":
    B, T, S, E, H, FF, VOCAB, NBLK = 2, 8, 16, 64, 4, 128, 128, 2

    key = jax.random.PRNGKey(0)
    kp, kid, kenc = jax.random.split(key, 3)

    params = init_params(kp, VOCAB, E, FF, NBLK, pad_token_id=0)
    input_ids = jax.random.randint(kid, (B, T), 1, VOCAB)
    encoder_hidden_states = jax.random.normal(kenc, (B, S, E), jnp.float32)
    no_peeking_mask = jnp.triu(jnp.ones((T, T), dtype=bool), k=1)   # True = masked

    fwd = jax.jit(partial(transformer_decoder, num_heads=H))
    logits, attn = fwd(params, input_ids, encoder_hidden_states,
                       src_padding_mask=None, tgt_padding_mask=None,
                       no_peeking_mask=no_peeking_mask)
    jax.block_until_ready((logits, attn))

    assert logits.shape == (B, T, VOCAB), logits.shape
    assert attn.shape == (B, H, T, S), attn.shape
    assert bool(jnp.all(jnp.isfinite(logits)))
    assert bool(jnp.all(jnp.isfinite(attn)))
    print("KERNEL_OK")
</pallas_src>

<mosaic_0001>
module attributes {stable_mosaic.version = 11 : i64} {
  func.func @_attn_kernel(%arg0: i32, %arg1: i32, %arg2: memref<1x8x192xbf16, #tpu.memory_space<vmem>>, %arg3: memref<1x8x192xbf16, #tpu.memory_space<vmem>>, %arg4: memref<1x8x8xf32, #tpu.memory_space<vmem>>, %arg5: memref<1x8x64xbf16, #tpu.memory_space<vmem>>) attributes {dimension_semantics = [#tpu.dimension_semantics<parallel>, #tpu.dimension_semantics<parallel>], iteration_bounds = array<i64: 2, 1>, scalar_prefetch = 0 : i64, scratch_operands = 0 : i64, tpu.core_type = #tpu.core_type<tc>, window_params = [{transform_indices = @transform_0, window_bounds = array<i64: 1, 8, 192>}, {transform_indices = @transform_1, window_bounds = array<i64: 1, 8, 192>}, {transform_indices = @transform_2, window_bounds = array<i64: 1, 8, 8>}, {transform_indices = @transform_3, window_bounds = array<i64: 1, 8, 64>}]} {
    %c0 = arith.constant 0 : index
    %c0_0 = arith.constant 0 : index
    %c0_1 = arith.constant 0 : index
    %0 = vector.load %arg2[%c0, %c0_0, %c0_1] : memref<1x8x192xbf16, #tpu.memory_space<vmem>>, vector<1x8x64xbf16>
    %1 = vector.shape_cast %0 : vector<1x8x64xbf16> to vector<8x64xbf16>
    %c0_2 = arith.constant 0 : index
    %c0_3 = arith.constant 0 : index
    %c64 = arith.constant 64 : index
    %2 = vector.load %arg3[%c0_2, %c0_3, %c64] : memref<1x8x192xbf16, #tpu.memory_space<vmem>>, vector<1x8x64xbf16>
    %3 = vector.shape_cast %2 : vector<1x8x64xbf16> to vector<8x64xbf16>
    %c0_4 = arith.constant 0 : index
    %c0_5 = arith.constant 0 : index
    %c128 = arith.constant 128 : index
    %4 = vector.load %arg3[%c0_4, %c0_5, %c128] : memref<1x8x192xbf16, #tpu.memory_space<vmem>>, vector<1x8x64xbf16>
    %5 = vector.shape_cast %4 : vector<1x8x64xbf16> to vector<8x64xbf16>
    %6 = vector.shape_cast %1 : vector<8x64xbf16> to vector<8x4x16xbf16>
    %7 = vector.shape_cast %3 : vector<8x64xbf16> to vector<8x4x16xbf16>
    %8 = vector.shape_cast %5 : vector<8x64xbf16> to vector<8x4x16xbf16>
    "tpu.trace_start"() <{level = 10 : i32, message = "thd,shd->hts"}> : () -> ()
    %cst = arith.constant dense<0.000000e+00> : vector<4x8x8xf32>
    %9 = tpu.matmul %6, %7, %cst {dimension_numbers = #tpu.dot_dimension_numbers<[2], [2], [0], [0], [0, 1, 0, 0, 1, 0], [1], [1]>} : vector<8x4x16xbf16>, vector<8x4x16xbf16>, vector<4x8x8xf32> -> vector<4x8x8xf32>
    "tpu.trace_stop"() : () -> ()
    %cst_6 = arith.constant 2.500000e-01 : f32
    %10 = vector.broadcast %cst_6 : f32 to vector<4x8x8xf32>
    %11 = arith.mulf %9, %10 : vector<4x8x8xf32>
    %c0_7 = arith.constant 0 : index
    %c0_8 = arith.constant 0 : index
    %c0_9 = arith.constant 0 : index
    %12 = vector.load %arg4[%c0_7, %c0_8, %c0_9] : memref<1x8x8xf32, #tpu.memory_space<vmem>>, vector<1x8x8xf32>
    %13 = vector.shape_cast %12 : vector<1x8x8xf32> to vector<8x8xf32>
    %14 = vector.shape_cast %13 : vector<8x8xf32> to vector<1x8x8xf32>
    %15 = vector.broadcast %14 : vector<1x8x8xf32> to vector<4x8x8xf32>
    %16 = arith.addf %11, %15 : vector<4x8x8xf32>
    %cst_10 = arith.constant dense<0xFF800000> : vector<4x8xf32>
    %17 = vector.multi_reduction <maximumf>, %16, %cst_10 [2] : vector<4x8x8xf32> to vector<4x8xf32>
    %18 = vector.shape_cast %17 : vector<4x8xf32> to vector<4x8x1xf32>
    %19 = vector.broadcast %18 : vector<4x8x1xf32> to vector<4x8x8xf32>
    %20 = arith.subf %16, %19 : vector<4x8x8xf32>
    %21 = math.exp %20 : vector<4x8x8xf32>
    %cst_11 = arith.constant dense<0.000000e+00> : vector<4x8xf32>
    %22 = vector.multi_reduction <add>, %21, %cst_11 [2] : vector<4x8x8xf32> to vector<4x8xf32>
    %23 = vector.shape_cast %22 : vector<4x8xf32> to vector<4x8x1xf32>
    %24 = tpu.reciprocal %23 {approx = true} : vector<4x8x1xf32> -> vector<4x8x1xf32>
    %25 = vector.broadcast %24 : vector<4x8x1xf32> to vector<4x8x8xf32>
    %26 = arith.mulf %21, %25 : vector<4x8x8xf32>
    %27 = arith.truncf %26 : vector<4x8x8xf32> to vector<4x8x8xbf16>
    "tpu.trace_start"() <{level = 10 : i32, message = "hts,shd->thd"}> : () -> ()
    %cst_12 = arith.constant dense<0.000000e+00> : vector<4x16x8xf32>
    %28 = tpu.matmul %8, %27, %cst_12 {dimension_numbers = #tpu.dot_dimension_numbers<[0], [2], [2], [1], [0, 1, 0, 2, 1, 1], [1], [0]>} : vector<8x4x16xbf16>, vector<4x8x8xbf16>, vector<4x16x8xf32> -> vector<4x16x8xf32>
    %29 = tpu.transpose %28, [2, 0, 1] : vector<4x16x8xf32> -> vector<8x4x16xf32>
    "tpu.trace_stop"() : () -> ()
    %30 = vector.shape_cast %29 : vector<8x4x16xf32> to vector<8x64xf32>
    %31 = arith.truncf %30 : vector<8x64xf32> to vector<8x64xbf16>
    %c0_13 = arith.constant 0 : index
    %c0_14 = arith.constant 0 : index
    %c0_15 = arith.constant 0 : index
    %32 = vector.load %arg5[%c0_13, %c0_14, %c0_15] : memref<1x8x64xbf16, #tpu.memory_space<vmem>>, vector<1x8x64xbf16>
    %33 = vector.shape_cast %32 : vector<1x8x64xbf16> to vector<8x64xbf16>
    %34 = vector.shape_cast %31 : vector<8x64xbf16> to vector<1x8x64xbf16>
    tpu.vector_store %arg5[%c0_13, %c0_14, %c0_15], %34 {strides = array<i32>} : memref<1x8x64xbf16, #tpu.memory_space<vmem>>, vector<1x8x64xbf16>,
    return
  }
  func.func @transform_0(%arg0: i32, %arg1: i32) -> (i32, i32, i32) {
    %c0_i32 = arith.constant 0 : i32
    %c0_i32_0 = arith.constant 0 : i32
    return %arg0, %arg1, %c0_i32 : i32, i32, i32
  }
  func.func @transform_1(%arg0: i32, %arg1: i32) -> (i32, i32, i32) {
    %c0_i32 = arith.constant 0 : i32
    %c0_i32_0 = arith.constant 0 : i32
    %c0_i32_1 = arith.constant 0 : i32
    return %arg0, %c0_i32, %c0_i32_0 : i32, i32, i32
  }
  func.func @transform_2(%arg0: i32, %arg1: i32) -> (i32, i32, i32) {
    %c0_i32 = arith.constant 0 : i32
    %c0_i32_0 = arith.constant 0 : i32
    return %arg0, %arg1, %c0_i32 : i32, i32, i32
  }
  func.func @transform_3(%arg0: i32, %arg1: i32) -> (i32, i32, i32) {
    %c0_i32 = arith.constant 0 : i32
    %c0_i32_0 = arith.constant 0 : i32
    return %arg0, %arg1, %c0_i32 : i32, i32, i32
  }
}

module attributes {stable_mosaic.version = 11 : i64} {
  func.func @_matmul_kernel(%arg0: i32, %arg1: memref<8x64xbf16, #tpu.memory_space<vmem>>, %arg2: memref<64x192xbf16, #tpu.memory_space<vmem>>, %arg3: memref<8x192xbf16, #tpu.memory_space<vmem>>) attributes {dimension_semantics = [#tpu.dimension_semantics<parallel>], iteration_bounds = array<i64: 2>, scalar_prefetch = 0 : i64, scratch_operands = 0 : i64, tpu.core_type = #tpu.core_type<tc>, window_params = [{transform_indices = @transform_0, window_bounds = array<i64: 8, 64>}, {pipeline_mode = #tpu.pipeline_mode<synchronous>, transform_indices = @transform_1, window_bounds = array<i64: 64, 192>}, {transform_indices = @transform_2, window_bounds = array<i64: 8, 192>}]} {
    %c0 = arith.constant 0 : index
    %c0_0 = arith.constant 0 : index
    %0 = vector.load %arg1[%c0, %c0_0] : memref<8x64xbf16, #tpu.memory_space<vmem>>, vector<8x64xbf16>
    %c0_1 = arith.constant 0 : index
    %c0_2 = arith.constant 0 : index
    %1 = vector.load %arg2[%c0_1, %c0_2] : memref<64x192xbf16, #tpu.memory_space<vmem>>, vector<64x192xbf16>
    %cst = arith.constant dense<0.000000e+00> : vector<8x192xf32>
    %2 = tpu.matmul %0, %1, %cst {dimension_numbers = #tpu.dot_dimension_numbers<[1], [0], [0], [1], [0, 0, 1, 1], [], []>} : vector<8x64xbf16>, vector<64x192xbf16>, vector<8x192xf32> -> vector<8x192xf32>
    %3 = arith.truncf %2 : vector<8x192xf32> to vector<8x192xbf16>
    %c0_3 = arith.constant 0 : index
    %c0_4 = arith.constant 0 : index
    %4 = vector.load %arg3[%c0_3, %c0_4] : memref<8x192xbf16, #tpu.memory_space<vmem>>, vector<8x192xbf16>
    tpu.vector_store %arg3[%c0_3, %c0_4], %3 {strides = array<i32>} : memref<8x192xbf16, #tpu.memory_space<vmem>>, vector<8x192xbf16>,
    return
  }
  func.func @transform_0(%arg0: i32) -> (i32, i32) {
    %c0_i32 = arith.constant 0 : i32
    %c0_i32_0 = arith.constant 0 : i32
    return %arg0, %c0_i32 : i32, i32
  }
  func.func @transform_1(%arg0: i32) -> (i32, i32) {
    %c0_i32 = arith.constant 0 : i32
    %c0_i32_0 = arith.constant 0 : i32
    %c0_i32_1 = arith.constant 0 : i32
    return %c0_i32, %c0_i32_0 : i32, i32
  }
  func.func @transform_2(%arg0: i32) -> (i32, i32) {
    %c0_i32 = arith.constant 0 : i32
    %c0_i32_0 = arith.constant 0 : i32
    return %arg0, %c0_i32 : i32, i32
  }
}

module attributes {stable_mosaic.version = 11 : i64} {
  func.func @_matmul_kernel(%arg0: i32, %arg1: memref<8x64xbf16, #tpu.memory_space<vmem>>, %arg2: memref<64x64xbf16, #tpu.memory_space<vmem>>, %arg3: memref<8x64xbf16, #tpu.memory_space<vmem>>) attributes {dimension_semantics = [#tpu.dimension_semantics<parallel>], iteration_bounds = array<i64: 2>, scalar_prefetch = 0 : i64, scratch_operands = 0 : i64, tpu.core_type = #tpu.core_type<tc>, window_params = [{transform_indices = @transform_0, window_bounds = array<i64: 8, 64>}, {pipeline_mode = #tpu.pipeline_mode<synchronous>, transform_indices = @transform_1, window_bounds = array<i64: 64, 64>}, {transform_indices = @transform_2, window_bounds = array<i64: 8, 64>}]} {
    %c0 = arith.constant 0 : index
    %c0_0 = arith.constant 0 : index
    %0 = vector.load %arg1[%c0, %c0_0] : memref<8x64xbf16, #tpu.memory_space<vmem>>, vector<8x64xbf16>
    %c0_1 = arith.constant 0 : index
    %c0_2 = arith.constant 0 : index
    %1 = vector.load %arg2[%c0_1, %c0_2] : memref<64x64xbf16, #tpu.memory_space<vmem>>, vector<64x64xbf16>
    %cst = arith.constant dense<0.000000e+00> : vector<8x64xf32>
    %2 = tpu.matmul %0, %1, %cst {dimension_numbers = #tpu.dot_dimension_numbers<[1], [0], [0], [1], [0, 0, 1, 1], [], []>} : vector<8x64xbf16>, vector<64x64xbf16>, vector<8x64xf32> -> vector<8x64xf32>
    %3 = arith.truncf %2 : vector<8x64xf32> to vector<8x64xbf16>
    %c0_3 = arith.constant 0 : index
    %c0_4 = arith.constant 0 : index
    %4 = vector.load %arg3[%c0_3, %c0_4] : memref<8x64xbf16, #tpu.memory_space<vmem>>, vector<8x64xbf16>
    tpu.vector_store %arg3[%c0_3, %c0_4], %3 {strides = array<i32>} : memref<8x64xbf16, #tpu.memory_space<vmem>>, vector<8x64xbf16>,
    return
  }
  func.func @transform_0(%arg0: i32) -> (i32, i32) {
    %c0_i32 = arith.constant 0 : i32
    %c0_i32_0 = arith.constant 0 : i32
    return %arg0, %c0_i32 : i32, i32
  }
  func.func @transform_1(%arg0: i32) -> (i32, i32) {
    %c0_i32 = arith.constant 0 : i32
    %c0_i32_0 = arith.constant 0 : i32
    %c0_i32_1 = arith.constant 0 : i32
    return %c0_i32, %c0_i32_0 : i32, i32
  }
  func.func @transform_2(%arg0: i32) -> (i32, i32) {
    %c0_i32 = arith.constant 0 : i32
    %c0_i32_0 = arith.constant 0 : i32
    return %arg0, %c0_i32 : i32, i32
  }
}

module attributes {stable_mosaic.version = 11 : i64} {
  func.func @_proj_add_ln_kernel(%arg0: i32, %arg1: memref<8x64xbf16, #tpu.memory_space<vmem>>, %arg2: memref<64x64xbf16, #tpu.memory_space<vmem>>, %arg3: memref<1x64xf32, #tpu.memory_space<vmem>>, %arg4: memref<8x64xbf16, #tpu.memory_space<vmem>>, %arg5: memref<1x64xf32, #tpu.memory_space<vmem>>, %arg6: memref<1x64xf32, #tpu.memory_space<vmem>>, %arg7: memref<8x64xbf16, #tpu.memory_space<vmem>>) attributes {dimension_semantics = [#tpu.dimension_semantics<parallel>], iteration_bounds = array<i64: 2>, scalar_prefetch = 0 : i64, scratch_operands = 0 : i64, tpu.core_type = #tpu.core_type<tc>, window_params = [{transform_indices = @transform_0, window_bounds = array<i64: 8, 64>}, {pipeline_mode = #tpu.pipeline_mode<synchronous>, transform_indices = @transform_1, window_bounds = array<i64: 64, 64>}, {pipeline_mode = #tpu.pipeline_mode<synchronous>, transform_indices = @transform_2, window_bounds = array<i64: 1, 64>}, {transform_indices = @transform_3, window_bounds = array<i64: 8, 64>}, {pipeline_mode = #tpu.pipeline_mode<synchronous>, transform_indices = @transform_4, window_bounds = array<i64: 1, 64>}, {pipeline_mode = #tpu.pipeline_mode<synchronous>, transform_indices = @transform_5, window_bounds = array<i64: 1, 64>}, {transform_indices = @transform_6, window_bounds = array<i64: 8, 64>}]} {
    %c0 = arith.constant 0 : index
    %c0_0 = arith.constant 0 : index
    %0 = vector.load %arg1[%c0, %c0_0] : memref<8x64xbf16, #tpu.memory_space<vmem>>, vector<8x64xbf16>
    %c0_1 = arith.constant 0 : index
    %c0_2 = arith.constant 0 : index
    %1 = vector.load %arg2[%c0_1, %c0_2] : memref<64x64xbf16, #tpu.memory_space<vmem>>, vector<64x64xbf16>
    %cst = arith.constant dense<0.000000e+00> : vector<8x64xf32>
    %2 = tpu.matmul %0, %1, %cst {dimension_numbers = #tpu.dot_dimension_numbers<[1], [0], [0], [1], [0, 0, 1, 1], [], []>} : vector<8x64xbf16>, vector<64x64xbf16>, vector<8x64xf32> -> vector<8x64xf32>
    %c0_3 = arith.constant 0 : index
    %c0_4 = arith.constant 0 : index
    %3 = vector.load %arg3[%c0_3, %c0_4] : memref<1x64xf32, #tpu.memory_space<vmem>>, vector<1x64xf32>
    %4 = vector.broadcast %3 : vector<1x64xf32> to vector<8x64xf32>
    %5 = arith.addf %2, %4 : vector<8x64xf32>
    %c0_5 = arith.constant 0 : index
    %c0_6 = arith.constant 0 : index
    %6 = vector.load %arg4[%c0_5, %c0_6] : memref<8x64xbf16, #tpu.memory_space<vmem>>, vector<8x64xbf16>
    %7 = arith.extf %6 : vector<8x64xbf16> to vector<8x64xf32>
    %8 = arith.addf %5, %7 : vector<8x64xf32>
    %cst_7 = arith.constant dense<0.000000e+00> : vector<8xf32>
    %9 = vector.multi_reduction <add>, %8, %cst_7 [1] : vector<8x64xf32> to vector<8xf32>
    %10 = vector.shape_cast %9 : vector<8xf32> to vector<8x1xf32>
    %cst_8 = arith.constant 6.400000e+01 : f32
    %11 = vector.broadcast %cst_8 : f32 to vector<8x1xf32>
    %12 = arith.divf %10, %11 : vector<8x1xf32>
    %13 = vector.broadcast %12 : vector<8x1xf32> to vector<8x64xf32>
    %14 = arith.subf %8, %13 : vector<8x64xf32>
    %15 = arith.mulf %14, %14 : vector<8x64xf32>
    %cst_9 = arith.constant dense<0.000000e+00> : vector<8xf32>
    %16 = vector.multi_reduction <add>, %15, %cst_9 [1] : vector<8x64xf32> to vector<8xf32>
    %17 = vector.shape_cast %16 : vector<8xf32> to vector<8x1xf32>
    %cst_10 = arith.constant 6.400000e+01 : f32
    %18 = vector.broadcast %cst_10 : f32 to vector<8x1xf32>
    %19 = arith.divf %17, %18 : vector<8x1xf32>
    %20 = vector.broadcast %12 : vector<8x1xf32> to vector<8x64xf32>
    %21 = arith.subf %8, %20 : vector<8x64xf32>
    %cst_11 = arith.constant 9.99999974E-6 : f32
    %22 = vector.broadcast %cst_11 : f32 to vector<8x1xf32>
    %23 = arith.addf %19, %22 : vector<8x1xf32>
    %24 = math.rsqrt %23 : vector<8x1xf32>
    %25 = vector.broadcast %24 : vector<8x1xf32> to vector<8x64xf32>
    %26 = arith.mulf %21, %25 : vector<8x64xf32>
    %c0_12 = arith.constant 0 : index
    %c0_13 = arith.constant 0 : index
    %27 = vector.load %arg5[%c0_12, %c0_13] : memref<1x64xf32, #tpu.memory_space<vmem>>, vector<1x64xf32>
    %28 = vector.broadcast %27 : vector<1x64xf32> to vector<8x64xf32>
    %29 = arith.mulf %26, %28 : vector<8x64xf32>
    %c0_14 = arith.constant 0 : index
    %c0_15 = arith.constant 0 : index
    %30 = vector.load %arg6[%c0_14, %c0_15] : memref<1x64xf32, #tpu.memory_space<vmem>>, vector<1x64xf32>
    %31 = vector.broadcast %30 : vector<1x64xf32> to vector<8x64xf32>
    %32 = arith.addf %29, %31 : vector<8x64xf32>
    %33 = arith.truncf %32 : vector<8x64xf32> to vector<8x64xbf16>
    %c0_16 = arith.constant 0 : index
    %c0_17 = arith.constant 0 : index
    %34 = vector.load %arg7[%c0_16, %c0_17] : memref<8x64xbf16, #tpu.memory_space<vmem>>, vector<8x64xbf16>
    tpu.vector_store %arg7[%c0_16, %c0_17], %33 {strides = array<i32>} : memref<8x64xbf16, #tpu.memory_space<vmem>>, vector<8x64xbf16>,
    return
  }
  func.func @transform_0(%arg0: i32) -> (i32, i32) {
    %c0_i32 = arith.constant 0 : i32
    %c0_i32_0 = arith.constant 0 : i32
    return %arg0, %c0_i32 : i32, i32
  }
  func.func @transform_1(%arg0: i32) -> (i32, i32) {
    %c0_i32 = arith.constant 0 : i32
    %c0_i32_0 = arith.constant 0 : i32
    %c0_i32_1 = arith.constant 0 : i32
    return %c0_i32, %c0_i32_0 : i32, i32
  }
  func.func @transform_2(%arg0: i32) -> (i32, i32) {
    %c0_i32 = arith.constant 0 : i32
    %c0_i32_0 = arith.constant 0 : i32
    %c0_i32_1 = arith.constant 0 : i32
    return %c0_i32, %c0_i32_0 : i32, i32
  }
  func.func @transform_3(%arg0: i32) -> (i32, i32) {
    %c0_i32 = arith.constant 0 : i32
    %c0_i32_0 = arith.constant 0 : i32
    return %arg0, %c0_i32 : i32, i32
  }
  func.func @transform_4(%arg0: i32) -> (i32, i32) {
    %c0_i32 = arith.constant 0 : i32
    %c0_i32_0 = arith.constant 0 : i32
    %c0_i32_1 = arith.constant 0 : i32
    return %c0_i32, %c0_i32_0 : i32, i32
  }
  func.func @transform_5(%arg0: i32) -> (i32, i32) {
    %c0_i32 = arith.constant 0 : i32
    %c0_i32_0 = arith.constant 0 : i32
    %c0_i32_1 = arith.constant 0 : i32
    return %c0_i32, %c0_i32_0 : i32, i32
  }
  func.func @transform_6(%arg0: i32) -> (i32, i32) {
    %c0_i32 = arith.constant 0 : i32
    %c0_i32_0 = arith.constant 0 : i32
    return %arg0, %c0_i32 : i32, i32
  }
}

module attributes {stable_mosaic.version = 11 : i64} {
  func.func @_matmul_kernel(%arg0: i32, %arg1: memref<16x64xbf16, #tpu.memory_space<vmem>>, %arg2: memref<64x256xbf16, #tpu.memory_space<vmem>>, %arg3: memref<16x256xbf16, #tpu.memory_space<vmem>>) attributes {dimension_semantics = [#tpu.dimension_semantics<parallel>], iteration_bounds = array<i64: 2>, scalar_prefetch = 0 : i64, scratch_operands = 0 : i64, tpu.core_type = #tpu.core_type<tc>, window_params = [{transform_indices = @transform_0, window_bounds = array<i64: 16, 64>}, {pipeline_mode = #tpu.pipeline_mode<synchronous>, transform_indices = @transform_1, window_bounds = array<i64: 64, 256>}, {transform_indices = @transform_2, window_bounds = array<i64: 16, 256>}]} {
    %c0 = arith.constant 0 : index
    %c0_0 = arith.constant 0 : index
    %0 = vector.load %arg1[%c0, %c0_0] : memref<16x64xbf16, #tpu.memory_space<vmem>>, vector<16x64xbf16>
    %c0_1 = arith.constant 0 : index
    %c0_2 = arith.constant 0 : index
    %1 = vector.load %arg2[%c0_1, %c0_2] : memref<64x256xbf16, #tpu.memory_space<vmem>>, vector<64x256xbf16>
    %cst = arith.constant dense<0.000000e+00> : vector<16x256xf32>
    %2 = tpu.matmul %0, %1, %cst {dimension_numbers = #tpu.dot_dimension_numbers<[1], [0], [0], [1], [0, 0, 1, 1], [], []>} : vector<16x64xbf16>, vector<64x256xbf16>, vector<16x256xf32> -> vector<16x256xf32>
    %3 = arith.truncf %2 : vector<16x256xf32> to vector<16x256xbf16>
    %c0_3 = arith.constant 0 : index
    %c0_4 = arith.constant 0 : index
    %4 = vector.load %arg3[%c0_3, %c0_4] : memref<16x256xbf16, #tpu.memory_space<vmem>>, vector<16x256xbf16>
    tpu.vector_store %arg3[%c0_3, %c0_4], %3 {strides = array<i32>} : memref<16x256xbf16, #tpu.memory_space<vmem>>, vector<16x256xbf16>,
    return
  }
  func.func @transform_0(%arg0: i32) -> (i32, i32) {
    %c0_i32 = arith.constant 0 : i32
    %c0_i32_0 = arith.constant 0 : i32
    return %arg0, %c0_i32 : i32, i32
  }
  func.func @transform_1(%arg0: i32) -> (i32, i32) {
    %c0_i32 = arith.constant 0 : i32
    %c0_i32_0 = arith.constant 0 : i32
    %c0_i32_1 = arith.constant 0 : i32
    return %c0_i32, %c0_i32_0 : i32, i32
  }
  func.func @transform_2(%arg0: i32) -> (i32, i32) {
    %c0_i32 = arith.constant 0 : i32
    %c0_i32_0 = arith.constant 0 : i32
    return %arg0, %c0_i32 : i32, i32
  }
}

module attributes {stable_mosaic.version = 11 : i64} {
  func.func @_attn_kernel(%arg0: i32, %arg1: i32, %arg2: memref<1x8x64xbf16, #tpu.memory_space<vmem>>, %arg3: memref<1x16x128xbf16, #tpu.memory_space<vmem>>, %arg4: memref<1x8x16xf32, #tpu.memory_space<vmem>>, %arg5: memref<1x8x64xbf16, #tpu.memory_space<vmem>>) attributes {dimension_semantics = [#tpu.dimension_semantics<parallel>, #tpu.dimension_semantics<parallel>], iteration_bounds = array<i64: 2, 1>, scalar_prefetch = 0 : i64, scratch_operands = 0 : i64, tpu.core_type = #tpu.core_type<tc>, window_params = [{transform_indices = @transform_0, window_bounds = array<i64: 1, 8, 64>}, {transform_indices = @transform_1, window_bounds = array<i64: 1, 16, 128>}, {transform_indices = @transform_2, window_bounds = array<i64: 1, 8, 16>}, {transform_indices = @transform_3, window_bounds = array<i64: 1, 8, 64>}]} {
    %c0 = arith.constant 0 : index
    %c0_0 = arith.constant 0 : index
    %c0_1 = arith.constant 0 : index
    %0 = vector.load %arg2[%c0, %c0_0, %c0_1] : memref<1x8x64xbf16, #tpu.memory_space<vmem>>, vector<1x8x64xbf16>
    %1 = vector.shape_cast %0 : vector<1x8x64xbf16> to vector<8x64xbf16>
    %c0_2 = arith.constant 0 : index
    %c0_3 = arith.constant 0 : index
    %c0_4 = arith.constant 0 : index
    %2 = vector.load %arg3[%c0_2, %c0_3, %c0_4] : memref<1x16x128xbf16, #tpu.memory_space<vmem>>, vector<1x16x64xbf16>
    %3 = vector.shape_cast %2 : vector<1x16x64xbf16> to vector<16x64xbf16>
    %c0_5 = arith.constant 0 : index
    %c0_6 = arith.constant 0 : index
    %c64 = arith.constant 64 : index
    %4 = vector.load %arg3[%c0_5, %c0_6, %c64] : memref<1x16x128xbf16, #tpu.memory_space<vmem>>, vector<1x16x64xbf16>
    %5 = vector.shape_cast %4 : vector<1x16x64xbf16> to vector<16x64xbf16>
    %6 = vector.shape_cast %1 : vector<8x64xbf16> to vector<8x4x16xbf16>
    %7 = vector.shape_cast %3 : vector<16x64xbf16> to vector<16x4x16xbf16>
    %8 = vector.shape_cast %5 : vector<16x64xbf16> to vector<16x4x16xbf16>
    "tpu.trace_start"() <{level = 10 : i32, message = "thd,shd->hts"}> : () -> ()
    %cst = arith.constant dense<0.000000e+00> : vector<4x8x16xf32>
    %9 = tpu.matmul %6, %7, %cst {dimension_numbers = #tpu.dot_dimension_numbers<[2], [2], [0], [0], [0, 1, 0, 0, 1, 0], [1], [1]>} : vector<8x4x16xbf16>, vector<16x4x16xbf16>, vector<4x8x16xf32> -> vector<4x8x16xf32>
    "tpu.trace_stop"() : () -> ()
    %cst_7 = arith.constant 2.500000e-01 : f32
    %10 = vector.broadcast %cst_7 : f32 to vector<4x8x16xf32>
    %11 = arith.mulf %9, %10 : vector<4x8x16xf32>
    %c0_8 = arith.constant 0 : index
    %c0_9 = arith.constant 0 : index
    %c0_10 = arith.constant 0 : index
    %12 = vector.load %arg4[%c0_8, %c0_9, %c0_10] : memref<1x8x16xf32, #tpu.memory_space<vmem>>, vector<1x8x16xf32>
    %13 = vector.shape_cast %12 : vector<1x8x16xf32> to vector<8x16xf32>
    %14 = vector.shape_cast %13 : vector<8x16xf32> to vector<1x8x16xf32>
    %15 = vector.broadcast %14 : vector<1x8x16xf32> to vector<4x8x16xf32>
    %16 = arith.addf %11, %15 : vector<4x8x16xf32>
    %cst_11 = arith.constant dense<0xFF800000> : vector<4x8xf32>
    %17 = vector.multi_reduction <maximumf>, %16, %cst_11 [2] : vector<4x8x16xf32> to vector<4x8xf32>
    %18 = vector.shape_cast %17 : vector<4x8xf32> to vector<4x8x1xf32>
    %19 = vector.broadcast %18 : vector<4x8x1xf32> to vector<4x8x16xf32>
    %20 = arith.subf %16, %19 : vector<4x8x16xf32>
    %21 = math.exp %20 : vector<4x8x16xf32>
    %cst_12 = arith.constant dense<0.000000e+00> : vector<4x8xf32>
    %22 = vector.multi_reduction <add>, %21, %cst_12 [2] : vector<4x8x16xf32> to vector<4x8xf32>
    %23 = vector.shape_cast %22 : vector<4x8xf32> to vector<4x8x1xf32>
    %24 = tpu.reciprocal %23 {approx = true} : vector<4x8x1xf32> -> vector<4x8x1xf32>
    %25 = vector.broadcast %24 : vector<4x8x1xf32> to vector<4x8x16xf32>
    %26 = arith.mulf %21, %25 : vector<4x8x16xf32>
    %27 = arith.truncf %26 : vector<4x8x16xf32> to vector<4x8x16xbf16>
    "tpu.trace_start"() <{level = 10 : i32, message = "hts,shd->thd"}> : () -> ()
    %cst_13 = arith.constant dense<0.000000e+00> : vector<4x16x8xf32>
    %28 = tpu.matmul %8, %27, %cst_13 {dimension_numbers = #tpu.dot_dimension_numbers<[0], [2], [2], [1], [0, 1, 0, 2, 1, 1], [1], [0]>} : vector<16x4x16xbf16>, vector<4x8x16xbf16>, vector<4x16x8xf32> -> vector<4x16x8xf32>
    %29 = tpu.transpose %28, [2, 0, 1] : vector<4x16x8xf32> -> vector<8x4x16xf32>
    "tpu.trace_stop"() : () -> ()
    %30 = vector.shape_cast %29 : vector<8x4x16xf32> to vector<8x64xf32>
    %31 = arith.truncf %30 : vector<8x64xf32> to vector<8x64xbf16>
    %c0_14 = arith.constant 0 : index
    %c0_15 = arith.constant 0 : index
    %c0_16 = arith.constant 0 : index
    %32 = vector.load %arg5[%c0_14, %c0_15, %c0_16] : memref<1x8x64xbf16, #tpu.memory_space<vmem>>, vector<1x8x64xbf16>
    %33 = vector.shape_cast %32 : vector<1x8x64xbf16> to vector<8x64xbf16>
    %34 = vector.shape_cast %31 : vector<8x64xbf16> to vector<1x8x64xbf16>
    tpu.vector_store %arg5[%c0_14, %c0_15, %c0_16], %34 {strides = array<i32>} : memref<1x8x64xbf16, #tpu.memory_space<vmem>>, vector<1x8x64xbf16>,
    return
  }
  func.func @transform_0(%arg0: i32, %arg1: i32) -> (i32, i32, i32) {
    %c0_i32 = arith.constant 0 : i32
    %c0_i32_0 = arith.constant 0 : i32
    return %arg0, %arg1, %c0_i32 : i32, i32, i32
  }
  func.func @transform_1(%arg0: i32, %arg1: i32) -> (i32, i32, i32) {
    %c0_i32 = arith.constant 0 : i32
    %c0_i32_0 = arith.constant 0 : i32
    %c0_i32_1 = arith.constant 0 : i32
    return %arg0, %c0_i32, %c0_i32_0 : i32, i32, i32
  }
  func.func @transform_2(%arg0: i32, %arg1: i32) -> (i32, i32, i32) {
    %c0_i32 = arith.constant 0 : i32
    %c0_i32_0 = arith.constant 0 : i32
    return %arg0, %arg1, %c0_i32 : i32, i32, i32
  }
  func.func @transform_3(%arg0: i32, %arg1: i32) -> (i32, i32, i32) {
    %c0_i32 = arith.constant 0 : i32
    %c0_i32_0 = arith.constant 0 : i32
    return %arg0, %arg1, %c0_i32 : i32, i32, i32
  }
}

module attributes {stable_mosaic.version = 11 : i64} {
  func.func @_ffn_kernel(%arg0: i32, %arg1: memref<8x64xbf16, #tpu.memory_space<vmem>>, %arg2: memref<64x128xbf16, #tpu.memory_space<vmem>>, %arg3: memref<1x128xf32, #tpu.memory_space<vmem>>, %arg4: memref<128x64xbf16, #tpu.memory_space<vmem>>, %arg5: memref<1x64xf32, #tpu.memory_space<vmem>>, %arg6: memref<1x64xf32, #tpu.memory_space<vmem>>, %arg7: memref<1x64xf32, #tpu.memory_space<vmem>>, %arg8: memref<8x64xbf16, #tpu.memory_space<vmem>>) attributes {dimension_semantics = [#tpu.dimension_semantics<parallel>], iteration_bounds = array<i64: 2>, scalar_prefetch = 0 : i64, scratch_operands = 0 : i64, tpu.core_type = #tpu.core_type<tc>, window_params = [{transform_indices = @transform_0, window_bounds = array<i64: 8, 64>}, {pipeline_mode = #tpu.pipeline_mode<synchronous>, transform_indices = @transform_1, window_bounds = array<i64: 64, 128>}, {pipeline_mode = #tpu.pipeline_mode<synchronous>, transform_indices = @transform_2, window_bounds = array<i64: 1, 128>}, {pipeline_mode = #tpu.pipeline_mode<synchronous>, transform_indices = @transform_3, window_bounds = array<i64: 128, 64>}, {pipeline_mode = #tpu.pipeline_mode<synchronous>, transform_indices = @transform_4, window_bounds = array<i64: 1, 64>}, {pipeline_mode = #tpu.pipeline_mode<synchronous>, transform_indices = @transform_5, window_bounds = array<i64: 1, 64>}, {pipeline_mode = #tpu.pipeline_mode<synchronous>, transform_indices = @transform_6, window_bounds = array<i64: 1, 64>}, {transform_indices = @transform_7, window_bounds = array<i64: 8, 64>}]} {
    %c0 = arith.constant 0 : index
    %c0_0 = arith.constant 0 : index
    %0 = vector.load %arg1[%c0, %c0_0] : memref<8x64xbf16, #tpu.memory_space<vmem>>, vector<8x64xbf16>
    %c0_1 = arith.constant 0 : index
    %c0_2 = arith.constant 0 : index
    %1 = vector.load %arg2[%c0_1, %c0_2] : memref<64x128xbf16, #tpu.memory_space<vmem>>, vector<64x128xbf16>
    %cst = arith.constant dense<0.000000e+00> : vector<8x128xf32>
    %2 = tpu.matmul %0, %1, %cst {dimension_numbers = #tpu.dot_dimension_numbers<[1], [0], [0], [1], [0, 0, 1, 1], [], []>} : vector<8x64xbf16>, vector<64x128xbf16>, vector<8x128xf32> -> vector<8x128xf32>
    %c0_3 = arith.constant 0 : index
    %c0_4 = arith.constant 0 : index
    %3 = vector.load %arg3[%c0_3, %c0_4] : memref<1x128xf32, #tpu.memory_space<vmem>>, vector<1x128xf32>
    %4 = vector.broadcast %3 : vector<1x128xf32> to vector<8x128xf32>
    %5 = arith.addf %2, %4 : vector<8x128xf32>
    %cst_5 = arith.constant 0.000000e+00 : f32
    %6 = vector.broadcast %cst_5 : f32 to vector<8x128xf32>
    %7 = arith.maximumf %5, %6 : vector<8x128xf32>
    %8 = arith.truncf %7 : vector<8x128xf32> to vector<8x128xbf16>
    %c0_6 = arith.constant 0 : index
    %c0_7 = arith.constant 0 : index
    %9 = vector.load %arg4[%c0_6, %c0_7] : memref<128x64xbf16, #tpu.memory_space<vmem>>, vector<128x64xbf16>
    %cst_8 = arith.constant dense<0.000000e+00> : vector<8x64xf32>
    %10 = tpu.matmul %8, %9, %cst_8 {dimension_numbers = #tpu.dot_dimension_numbers<[1], [0], [0], [1], [0, 0, 1, 1], [], []>} : vector<8x128xbf16>, vector<128x64xbf16>, vector<8x64xf32> -> vector<8x64xf32>
    %c0_9 = arith.constant 0 : index
    %c0_10 = arith.constant 0 : index
    %11 = vector.load %arg5[%c0_9, %c0_10] : memref<1x64xf32, #tpu.memory_space<vmem>>, vector<1x64xf32>
    %12 = vector.broadcast %11 : vector<1x64xf32> to vector<8x64xf32>
    %13 = arith.addf %10, %12 : vector<8x64xf32>
    %14 = arith.extf %0 : vector<8x64xbf16> to vector<8x64xf32>
    %15 = arith.addf %13, %14 : vector<8x64xf32>
    %cst_11 = arith.constant dense<0.000000e+00> : vector<8xf32>
    %16 = vector.multi_reduction <add>, %15, %cst_11 [1] : vector<8x64xf32> to vector<8xf32>
    %17 = vector.shape_cast %16 : vector<8xf32> to vector<8x1xf32>
    %cst_12 = arith.constant 6.400000e+01 : f32
    %18 = vector.broadcast %cst_12 : f32 to vector<8x1xf32>
    %19 = arith.divf %17, %18 : vector<8x1xf32>
    %20 = vector.broadcast %19 : vector<8x1xf32> to vector<8x64xf32>
    %21 = arith.subf %15, %20 : vector<8x64xf32>
    %22 = arith.mulf %21, %21 : vector<8x64xf32>
    %cst_13 = arith.constant dense<0.000000e+00> : vector<8xf32>
    %23 = vector.multi_reduction <add>, %22, %cst_13 [1] : vector<8x64xf32> to vector<8xf32>
    %24 = vector.shape_cast %23 : vector<8xf32> to vector<8x1xf32>
    %cst_14 = arith.constant 6.400000e+01 : f32
    %25 = vector.broadcast %cst_14 : f32 to vector<8x1xf32>
    %26 = arith.divf %24, %25 : vector<8x1xf32>
    %27 = vector.broadcast %19 : vector<8x1xf32> to vector<8x64xf32>
    %28 = arith.subf %15, %27 : vector<8x64xf32>
    %cst_15 = arith.constant 9.99999974E-6 : f32
    %29 = vector.broadcast %cst_15 : f32 to vector<8x1xf32>
    %30 = arith.addf %26, %29 : vector<8x1xf32>
    %31 = math.rsqrt %30 : vector<8x1xf32>
    %32 = vector.broadcast %31 : vector<8x1xf32> to vector<8x64xf32>
    %33 = arith.mulf %28, %32 : vector<8x64xf32>
    %c0_16 = arith.constant 0 : index
    %c0_17 = arith.constant 0 : index
    %34 = vector.load %arg6[%c0_16, %c0_17] : memref<1x64xf32, #tpu.memory_space<vmem>>, vector<1x64xf32>
    %35 = vector.broadcast %34 : vector<1x64xf32> to vector<8x64xf32>
    %36 = arith.mulf %33, %35 : vector<8x64xf32>
    %c0_18 = arith.constant 0 : index
    %c0_19 = arith.constant 0 : index
    %37 = vector.load %arg7[%c0_18, %c0_19] : memref<1x64xf32, #tpu.memory_space<vmem>>, vector<1x64xf32>
    %38 = vector.broadcast %37 : vector<1x64xf32> to vector<8x64xf32>
    %39 = arith.addf %36, %38 : vector<8x64xf32>
    %40 = arith.truncf %39 : vector<8x64xf32> to vector<8x64xbf16>
    %c0_20 = arith.constant 0 : index
    %c0_21 = arith.constant 0 : index
    %41 = vector.load %arg8[%c0_20, %c0_21] : memref<8x64xbf16, #tpu.memory_space<vmem>>, vector<8x64xbf16>
    tpu.vector_store %arg8[%c0_20, %c0_21], %40 {strides = array<i32>} : memref<8x64xbf16, #tpu.memory_space<vmem>>, vector<8x64xbf16>,
    return
  }
  func.func @transform_0(%arg0: i32) -> (i32, i32) {
    %c0_i32 = arith.constant 0 : i32
    %c0_i32_0 = arith.constant 0 : i32
    return %arg0, %c0_i32 : i32, i32
  }
  func.func @transform_1(%arg0: i32) -> (i32, i32) {
    %c0_i32 = arith.constant 0 : i32
    %c0_i32_0 = arith.constant 0 : i32
    %c0_i32_1 = arith.constant 0 : i32
    return %c0_i32, %c0_i32_0 : i32, i32
  }
  func.func @transform_2(%arg0: i32) -> (i32, i32) {
    %c0_i32 = arith.constant 0 : i32
    %c0_i32_0 = arith.constant 0 : i32
    %c0_i32_1 = arith.constant 0 : i32
    return %c0_i32, %c0_i32_0 : i32, i32
  }
  func.func @transform_3(%arg0: i32) -> (i32, i32) {
    %c0_i32 = arith.constant 0 : i32
    %c0_i32_0 = arith.constant 0 : i32
    %c0_i32_1 = arith.constant 0 : i32
    return %c0_i32, %c0_i32_0 : i32, i32
  }
  func.func @transform_4(%arg0: i32) -> (i32, i32) {
    %c0_i32 = arith.constant 0 : i32
    %c0_i32_0 = arith.constant 0 : i32
    %c0_i32_1 = arith.constant 0 : i32
    return %c0_i32, %c0_i32_0 : i32, i32
  }
  func.func @transform_5(%arg0: i32) -> (i32, i32) {
    %c0_i32 = arith.constant 0 : i32
    %c0_i32_0 = arith.constant 0 : i32
    %c0_i32_1 = arith.constant 0 : i32
    return %c0_i32, %c0_i32_0 : i32, i32
  }
  func.func @transform_6(%arg0: i32) -> (i32, i32) {
    %c0_i32 = arith.constant 0 : i32
    %c0_i32_0 = arith.constant 0 : i32
    %c0_i32_1 = arith.constant 0 : i32
    return %c0_i32, %c0_i32_0 : i32, i32
  }
  func.func @transform_7(%arg0: i32) -> (i32, i32) {
    %c0_i32 = arith.constant 0 : i32
    %c0_i32_0 = arith.constant 0 : i32
    return %arg0, %c0_i32 : i32, i32
  }
}

module attributes {stable_mosaic.version = 11 : i64} {
  func.func @_attn_kernel(%arg0: i32, %arg1: i32, %arg2: memref<1x8x64xbf16, #tpu.memory_space<vmem>>, %arg3: memref<1x16x128xbf16, #tpu.memory_space<vmem>>, %arg4: memref<1x8x16xf32, #tpu.memory_space<vmem>>, %arg5: memref<1x8x64xbf16, #tpu.memory_space<vmem>>, %arg6: memref<1x4x8x16xf32, #tpu.memory_space<vmem>>) attributes {dimension_semantics = [#tpu.dimension_semantics<parallel>, #tpu.dimension_semantics<parallel>], iteration_bounds = array<i64: 2, 1>, scalar_prefetch = 0 : i64, scratch_operands = 0 : i64, tpu.core_type = #tpu.core_type<tc>, window_params = [{transform_indices = @transform_0, window_bounds = array<i64: 1, 8, 64>}, {transform_indices = @transform_1, window_bounds = array<i64: 1, 16, 128>}, {transform_indices = @transform_2, window_bounds = array<i64: 1, 8, 16>}, {transform_indices = @transform_3, window_bounds = array<i64: 1, 8, 64>}, {transform_indices = @transform_4, window_bounds = array<i64: 1, 4, 8, 16>}]} {
    %c0 = arith.constant 0 : index
    %c0_0 = arith.constant 0 : index
    %c0_1 = arith.constant 0 : index
    %0 = vector.load %arg2[%c0, %c0_0, %c0_1] : memref<1x8x64xbf16, #tpu.memory_space<vmem>>, vector<1x8x64xbf16>
    %1 = vector.shape_cast %0 : vector<1x8x64xbf16> to vector<8x64xbf16>
    %c0_2 = arith.constant 0 : index
    %c0_3 = arith.constant 0 : index
    %c0_4 = arith.constant 0 : index
    %2 = vector.load %arg3[%c0_2, %c0_3, %c0_4] : memref<1x16x128xbf16, #tpu.memory_space<vmem>>, vector<1x16x64xbf16>
    %3 = vector.shape_cast %2 : vector<1x16x64xbf16> to vector<16x64xbf16>
    %c0_5 = arith.constant 0 : index
    %c0_6 = arith.constant 0 : index
    %c64 = arith.constant 64 : index
    %4 = vector.load %arg3[%c0_5, %c0_6, %c64] : memref<1x16x128xbf16, #tpu.memory_space<vmem>>, vector<1x16x64xbf16>
    %5 = vector.shape_cast %4 : vector<1x16x64xbf16> to vector<16x64xbf16>
    %6 = vector.shape_cast %1 : vector<8x64xbf16> to vector<8x4x16xbf16>
    %7 = vector.shape_cast %3 : vector<16x64xbf16> to vector<16x4x16xbf16>
    %8 = vector.shape_cast %5 : vector<16x64xbf16> to vector<16x4x16xbf16>
    "tpu.trace_start"() <{level = 10 : i32, message = "thd,shd->hts"}> : () -> ()
    %cst = arith.constant dense<0.000000e+00> : vector<4x8x16xf32>
    %9 = tpu.matmul %6, %7, %cst {dimension_numbers = #tpu.dot_dimension_numbers<[2], [2], [0], [0], [0, 1, 0, 0, 1, 0], [1], [1]>} : vector<8x4x16xbf16>, vector<16x4x16xbf16>, vector<4x8x16xf32> -> vector<4x8x16xf32>
    "tpu.trace_stop"() : () -> ()
    %cst_7 = arith.constant 2.500000e-01 : f32
    %10 = vector.broadcast %cst_7 : f32 to vector<4x8x16xf32>
    %11 = arith.mulf %9, %10 : vector<4x8x16xf32>
    %c0_8 = arith.constant 0 : index
    %c0_9 = arith.constant 0 : index
    %c0_10 = arith.constant 0 : index
    %12 = vector.load %arg4[%c0_8, %c0_9, %c0_10] : memref<1x8x16xf32, #tpu.memory_space<vmem>>, vector<1x8x16xf32>
    %13 = vector.shape_cast %12 : vector<1x8x16xf32> to vector<8x16xf32>
    %14 = vector.shape_cast %13 : vector<8x16xf32> to vector<1x8x16xf32>
    %15 = vector.broadcast %14 : vector<1x8x16xf32> to vector<4x8x16xf32>
    %16 = arith.addf %11, %15 : vector<4x8x16xf32>
    %cst_11 = arith.constant dense<0xFF800000> : vector<4x8xf32>
    %17 = vector.multi_reduction <maximumf>, %16, %cst_11 [2] : vector<4x8x16xf32> to vector<4x8xf32>
    %18 = vector.shape_cast %17 : vector<4x8xf32> to vector<4x8x1xf32>
    %19 = vector.broadcast %18 : vector<4x8x1xf32> to vector<4x8x16xf32>
    %20 = arith.subf %16, %19 : vector<4x8x16xf32>
    %21 = math.exp %20 : vector<4x8x16xf32>
    %cst_12 = arith.constant dense<0.000000e+00> : vector<4x8xf32>
    %22 = vector.multi_reduction <add>, %21, %cst_12 [2] : vector<4x8x16xf32> to vector<4x8xf32>
    %23 = vector.shape_cast %22 : vector<4x8xf32> to vector<4x8x1xf32>
    %24 = vector.broadcast %23 : vector<4x8x1xf32> to vector<4x8x16xf32>
    %25 = arith.divf %21, %24 : vector<4x8x16xf32>
    %26 = arith.truncf %25 : vector<4x8x16xf32> to vector<4x8x16xbf16>
    "tpu.trace_start"() <{level = 10 : i32, message = "hts,shd->thd"}> : () -> ()
    %cst_13 = arith.constant dense<0.000000e+00> : vector<4x16x8xf32>
    %27 = tpu.matmul %8, %26, %cst_13 {dimension_numbers = #tpu.dot_dimension_numbers<[0], [2], [2], [1], [0, 1, 0, 2, 1, 1], [1], [0]>} : vector<16x4x16xbf16>, vector<4x8x16xbf16>, vector<4x16x8xf32> -> vector<4x16x8xf32>
    %28 = tpu.transpose %27, [2, 0, 1] : vector<4x16x8xf32> -> vector<8x4x16xf32>
    "tpu.trace_stop"() : () -> ()
    %29 = vector.shape_cast %28 : vector<8x4x16xf32> to vector<8x64xf32>
    %30 = arith.truncf %29 : vector<8x64xf32> to vector<8x64xbf16>
    %c0_14 = arith.constant 0 : index
    %c0_15 = arith.constant 0 : index
    %c0_16 = arith.constant 0 : index
    %31 = vector.load %arg5[%c0_14, %c0_15, %c0_16] : memref<1x8x64xbf16, #tpu.memory_space<vmem>>, vector<1x8x64xbf16>
    %32 = vector.shape_cast %31 : vector<1x8x64xbf16> to vector<8x64xbf16>
    %33 = vector.shape_cast %30 : vector<8x64xbf16> to vector<1x8x64xbf16>
    tpu.vector_store %arg5[%c0_14, %c0_15, %c0_16], %33 {strides = array<i32>} : memref<1x8x64xbf16, #tpu.memory_space<vmem>>, vector<1x8x64xbf16>,
    %c0_17 = arith.constant 0 : index
    %c0_18 = arith.constant 0 : index
    %c0_19 = arith.constant 0 : index
    %c0_20 = arith.constant 0 : index
    %34 = vector.load %arg6[%c0_17, %c0_18, %c0_19, %c0_20] : memref<1x4x8x16xf32, #tpu.memory_space<vmem>>, vector<1x4x8x16xf32>
    %35 = vector.shape_cast %34 : vector<1x4x8x16xf32> to vector<4x8x16xf32>
    %36 = vector.shape_cast %25 : vector<4x8x16xf32> to vector<1x4x8x16xf32>
    tpu.vector_store %arg6[%c0_17, %c0_18, %c0_19, %c0_20], %36 {strides = array<i32>} : memref<1x4x8x16xf32, #tpu.memory_space<vmem>>, vector<1x4x8x16xf32>,
    return
  }
  func.func @transform_0(%arg0: i32, %arg1: i32) -> (i32, i32, i32) {
    %c0_i32 = arith.constant 0 : i32
    %c0_i32_0 = arith.constant 0 : i32
    return %arg0, %arg1, %c0_i32 : i32, i32, i32
  }
  func.func @transform_1(%arg0: i32, %arg1: i32) -> (i32, i32, i32) {
    %c0_i32 = arith.constant 0 : i32
    %c1_i32 = arith.constant 1 : i32
    %c0_i32_0 = arith.constant 0 : i32
    return %arg0, %c0_i32, %c1_i32 : i32, i32, i32
  }
  func.func @transform_2(%arg0: i32, %arg1: i32) -> (i32, i32, i32) {
    %c0_i32 = arith.constant 0 : i32
    %c0_i32_0 = arith.constant 0 : i32
    return %arg0, %arg1, %c0_i32 : i32, i32, i32
  }
  func.func @transform_3(%arg0: i32, %arg1: i32) -> (i32, i32, i32) {
    %c0_i32 = arith.constant 0 : i32
    %c0_i32_0 = arith.constant 0 : i32
    return %arg0, %arg1, %c0_i32 : i32, i32, i32
  }
  func.func @transform_4(%arg0: i32, %arg1: i32) -> (i32, i32, i32, i32) {
    %c0_i32 = arith.constant 0 : i32
    %c0_i32_0 = arith.constant 0 : i32
    %c0_i32_1 = arith.constant 0 : i32
    return %arg0, %c0_i32, %arg1, %c0_i32_0 : i32, i32, i32, i32
  }
}

module attributes {stable_mosaic.version = 11 : i64} {
  func.func @_classifier_kernel(%arg0: i32, %arg1: i32, %arg2: memref<8x64xbf16, #tpu.memory_space<vmem>>, %arg3: memref<64x128xbf16, #tpu.memory_space<vmem>>, %arg4: memref<1x128xf32, #tpu.memory_space<vmem>>, %arg5: memref<8x128xf32, #tpu.memory_space<vmem>>) attributes {dimension_semantics = [#tpu.dimension_semantics<parallel>, #tpu.dimension_semantics<parallel>], iteration_bounds = array<i64: 1, 2>, scalar_prefetch = 0 : i64, scratch_operands = 0 : i64, tpu.core_type = #tpu.core_type<tc>, window_params = [{transform_indices = @transform_0, window_bounds = array<i64: 8, 64>}, {transform_indices = @transform_1, window_bounds = array<i64: 64, 128>}, {transform_indices = @transform_2, window_bounds = array<i64: 1, 128>}, {transform_indices = @transform_3, window_bounds = array<i64: 8, 128>}]} {
    %c0 = arith.constant 0 : index
    %c0_0 = arith.constant 0 : index
    %0 = vector.load %arg2[%c0, %c0_0] : memref<8x64xbf16, #tpu.memory_space<vmem>>, vector<8x64xbf16>
    %c0_1 = arith.constant 0 : index
    %c0_2 = arith.constant 0 : index
    %1 = vector.load %arg3[%c0_1, %c0_2] : memref<64x128xbf16, #tpu.memory_space<vmem>>, vector<64x128xbf16>
    %cst = arith.constant dense<0.000000e+00> : vector<8x128xf32>
    %2 = tpu.matmul %0, %1, %cst {dimension_numbers = #tpu.dot_dimension_numbers<[1], [0], [0], [1], [0, 0, 1, 1], [], []>} : vector<8x64xbf16>, vector<64x128xbf16>, vector<8x128xf32> -> vector<8x128xf32>
    %c0_3 = arith.constant 0 : index
    %c0_4 = arith.constant 0 : index
    %3 = vector.load %arg4[%c0_3, %c0_4] : memref<1x128xf32, #tpu.memory_space<vmem>>, vector<1x128xf32>
    %4 = vector.broadcast %3 : vector<1x128xf32> to vector<8x128xf32>
    %5 = arith.addf %2, %4 : vector<8x128xf32>
    %c0_5 = arith.constant 0 : index
    %c0_6 = arith.constant 0 : index
    %6 = vector.load %arg5[%c0_5, %c0_6] : memref<8x128xf32, #tpu.memory_space<vmem>>, vector<8x128xf32>
    tpu.vector_store %arg5[%c0_5, %c0_6], %5 {strides = array<i32>} : memref<8x128xf32, #tpu.memory_space<vmem>>, vector<8x128xf32>,
    return
  }
  func.func @transform_0(%arg0: i32, %arg1: i32) -> (i32, i32) {
    %c0_i32 = arith.constant 0 : i32
    %c0_i32_0 = arith.constant 0 : i32
    return %arg1, %c0_i32 : i32, i32
  }
  func.func @transform_1(%arg0: i32, %arg1: i32) -> (i32, i32) {
    %c0_i32 = arith.constant 0 : i32
    %c0_i32_0 = arith.constant 0 : i32
    return %c0_i32, %arg0 : i32, i32
  }
  func.func @transform_2(%arg0: i32, %arg1: i32) -> (i32, i32) {
    %c0_i32 = arith.constant 0 : i32
    %c0_i32_0 = arith.constant 0 : i32
    return %c0_i32, %arg0 : i32, i32
  }
  func.func @transform_3(%arg0: i32, %arg1: i32) -> (i32, i32) {
    %c0_i32 = arith.constant 0 : i32
    return %arg1, %arg0 : i32, i32
  }
}

</mosaic_0001>

<bundles_post_ra>
// kernel: transformer_decoder.17
= control target key start
LH: loop header
LB: loop body
LE: loop exit
PB: predicated region body
PF: predicated region fallthrough
CT: control target
= control target key end

     0   :  { %s370_s9 = smov 0   ;;  %s411_s0 = inlined_call_operand.vmem [shape: bf16[16,64], index: 0, kind: input, shape index: {}]   ;;  %s412_s1 = inlined_call_operand.vmem [shape: bf16[64,192], index: 1, kind: input, shape index: {}]   ;;  %s413_s2 = inlined_call_operand.vmem [shape: bf16[16,192], index: 2, kind: output, shape index: {}]  }
   0x1 LB: > { %s303_s10 = sadd.s32 4294967295, %s352_s9   ;;  %p307_p0 = scmp.ge.s32.totalorder %s352_s9, 1  ;;  %s352_s9 = sphi %s370_s9, %s12_s9  }
   0x2   : > { %p111_p1 = scmp.lt.s32.totalorder %s352_s9, 3 }
   0x4   : > { %p112_p2 = pnand %p307_p0, %p111_p1 }
   0x5   : > { %v334_v0 = vld [vmem:[%s412_s1 + $0x4] ss:$8 sps:$4 sm:$0xff] (!%p112_p2)   ;;  %v336_v1 = vld [vmem:[%s412_s1] ss:$8 sps:$4 sm:$0xff] (!%p112_p2)   ;;  %v354_v2 = vmov (!%p112_p2), 0   ;;  %p132_p3 = scmp.lt.s32.totalorder (!%p112_p2), %s303_s10, 1 }
   0x6   : > { %115 = sbr.rel (%p112_p2) target bundleno = 238 (0xee), region = 28  ;;  %227 = vmatprep.mubr.bf16.mxu0 (!%p112_p2), %v354_v2  ;;  %195 = vmatprep.subr.bf16.mxu0 (!%p112_p2), %v334_v0  ;;  %v337_v3 = vld [vmem:[%s412_s1 + $0x14] ss:$8 sps:$4 sm:$0xff] (!%p112_p2)   ;;  %v339_v4 = vld [vmem:[%s412_s1 + $0x10] ss:$8 sps:$4 sm:$0xff] (!%p112_p2)   ;;  %vm191_vm0 = vcmask (!%p112_p2), 523264  }
   0x7   : > { %196 = vmatpush1.bf16.msra.mxu0 (!%p112_p2), %v336_v1  ;;  %v340_v5 = vld [vmem:[%s412_s1 + $0x24] ss:$8 sps:$4 sm:$0xff] (!%p112_p2)   ;;  %v342_v6 = vld [vmem:[%s412_s1 + $0x20] ss:$8 sps:$4 sm:$0xff] (!%p112_p2)   ;;  %v343_v7 = vld [vmem:[%s412_s1 + $0x34] ss:$8 sps:$4 sm:$0xff] (!%p112_p2)  }
   0x8   : > { %197 = vmatprep.subr.bf16.mxu0 (!%p112_p2), %v337_v3  ;;  %v345_v8 = vld [vmem:[%s412_s1 + $0x30] ss:$8 sps:$4 sm:$0xff] (!%p112_p2)   ;;  %vm244_vm1 = vcmask (!%p112_p2), 1043456   ;;  %vm245_vm2 = vcmask (!%p112_p2), 523268  }
   0x9   : > { %vm246_vm3 = vmor (!%p112_p2), %vm245_vm2, %vm244_vm1 }
   0xb   : > { %198 = vmatpush1.bf16.msra.mxu0 (!%p112_p2), %v339_v4 }
   0xc   : > { %199 = vmatprep.subr.bf16.mxu0 (!%p112_p2), %v340_v5 }
   0xd   : > { %s415_s10 = smov (!%p132_p3, %s303_s10), 1 }
   0xe   : > { %s308_s25 = sshll.u32 %s415_s10, 2  ;;  %s323_s3 = sshll.u32 %s415_s10, 3 }
   0xf   : > { %200 = vmatpush1.bf16.msra.mxu0 %v342_v6  ;;  %s135_s30 = scalar_lea.vmem %s411_s0, %s308_s25  ;;  %s140_s6 = scalar_lea.vmem %s413_s2, %s323_s3 }
  0x10   : > { %201 = vmatprep.subr.bf16.mxu0 %v343_v7  ;;  %v142_v9 = vld [vmem:[%s135_s30] sm:$0xf] }
  0x13   : > { %202 = vmatpush1.bf16.msra.mxu0 %v345_v8 }
  0x16   : > { %319 = vmatmul.mubr.msk.bf16.vlgmr.msra.gmra.mrb[0].mxu0 %vm191_vm0, %v142_v9 }
  0xe9   : > { %v229_v10 = vpop.f32.mrb[0].mxu0 }
  0xea   : > { %v231_v11 = vpop.f32.mrb[1].mxu0 }
  0xeb   : > { %v324_v12 = vpack.c.bf16 %v231_v11, %v229_v10  ;;  %v233_v13 = vpop.f32.mrb[2].mxu0 }
  0xec   : > { %v234_v14 = vpop.f32.mrb[3].mxu0 }
  0xed   : > { %247 = vst.msk [vmem:[%s140_s6] sm:$0xff] %vm246_vm3, %v324_v12 }
  0xee PF: > { %s12_s9 = sadd.s32 1, %s352_s9  }
  0xef   : > { %p9_p4 = scmp.ge.s32.totalorder %s12_s9, 4  }
  0xf1   :  { %11 = sbr.rel (!%p9_p4) target bundleno = 1 (0x1), region = 58 }

// kernel: transformer_decoder.20
= control target key start
LH: loop header
LB: loop body
LE: loop exit
PB: predicated region body
PF: predicated region fallthrough
CT: control target
= control target key end

     0   :  { %s343_s9 = smov 0   ;;  %s372_s0 = inlined_call_operand.vmem [shape: bf16[16,64], index: 0, kind: input, shape index: {}]   ;;  %s373_s1 = inlined_call_operand.vmem [shape: bf16[64,64], index: 1, kind: input, shape index: {}]   ;;  %s374_s2 = inlined_call_operand.vmem [shape: bf16[16,64], index: 2, kind: output, shape index: {}]  }
   0x1 LB: > { %s273_s10 = sadd.s32 4294967295, %s324_s9   ;;  %p277_p0 = scmp.ge.s32.totalorder %s324_s9, 1  ;;  %s324_s9 = sphi %s343_s9, %s12_s9  }
   0x2   : > { %p111_p1 = scmp.lt.s32.totalorder %s324_s9, 3 }
   0x4   : > { %p112_p2 = pnand %p277_p0, %p111_p1 }
   0x5   : > { %v314_v0 = vld [vmem:[%s373_s1] sm:$0xff] (!%p112_p2)   ;;  %v326_v1 = vmov (!%p112_p2), 0.0   ;;  %v315_v2 = vld [vmem:[%s373_s1 + $0x8] sm:$0xff] (!%p112_p2)   ;;  %vm327_vm0 = vmmov (!%p112_p2), 0   ;;  %p131_p3 = scmp.lt.s32.totalorder (!%p112_p2), %s273_s10, 1  ;;  %v316_v3 = vld [vmem:[%s373_s1 + $0x10] sm:$0xff] (!%p112_p2)  }
   0x6   : > { %115 = sbr.rel (%p112_p2) target bundleno = 237 (0xed), region = 28  ;;  %292 = vmatprep.subr.bf16.mxu0 (!%p112_p2), %v326_v1  ;;  %300 = vmatprep.mubr.msk.bf16.mxu0 (!%p112_p2), %vm327_vm0, %v326_v1  ;;  %v317_v4 = vld [vmem:[%s373_s1 + $0x18] sm:$0xff] (!%p112_p2)   ;;  %vm173_vm1 = vcmask (!%p112_p2), 523264   ;;  %vm218_vm2 = vcmask (!%p112_p2), 519168  }
   0x7   : > { %293 = vmatpush3.bf16.msra.mxu0 (!%p112_p2), %v314_v0 }
   0x8   : > { %294 = vmatprep.subr.bf16.mxu0 (!%p112_p2), %v326_v1 }
   0xb   : > { %295 = vmatpush3.bf16.msra.mxu0 (!%p112_p2), %v315_v2 }
   0xc   : > { %296 = vmatprep.subr.bf16.mxu0 (!%p112_p2), %v326_v1 }
   0xd   : > { %s376_s10 = smov (!%p131_p3, %s273_s10), 1 }
   0xe   : > { %s278_s17 = sshll.u32 %s376_s10, 2 }
   0xf   : > { %297 = vmatpush3.bf16.msra.mxu0 %v316_v3  ;;  %s134_s22 = scalar_lea.vmem %s372_s0, %s278_s17  ;;  %s138_s25 = scalar_lea.vmem %s374_s2, %s278_s17 }
  0x10   : > { %298 = vmatprep.subr.bf16.mxu0 %v326_v1  ;;  %v140_v5 = vld [vmem:[%s134_s22] sm:$0xf] }
  0x13   : > { %299 = vmatpush3.bf16.msra.mxu0 %v317_v4 }
  0x16   : > { %301 = vmatmul.mubr.msk.bf16.vlgmr.msra.gmra.mrb[0].mxu0 %vm173_vm1, %v140_v5 }
  0xe9   : > { %v211_v6 = vpop.f32.mrb[0].mxu0 }
  0xea   : > { %v217_v7 = vpack.c.bf16 %v211_v6, %v211_v6  ;;  %v302_v8 = vpop.f32.mrb[1].mxu0 }
  0xeb   : > { %v214_v9 = vpop.f32.mrb[2].mxu0 }
  0xec   : > { %219 = vst.msk [vmem:[%s138_s25] sm:$0xf] %vm218_vm2, %v217_v7  ;;  %v303_v10 = vpop.f32.mrb[3].mxu0 }
  0xed PF: > { %s12_s9 = sadd.s32 1, %s324_s9  }
  0xee   : > { %p9_p4 = scmp.ge.s32.totalorder %s12_s9, 4  }
  0xf0   :  { %11 = sbr.rel (!%p9_p4) target bundleno = 1 (0x1), region = 58 }

// kernel: transformer_decoder.19
= control target key start
LH: loop header
LB: loop body
LE: loop exit
PB: predicated region body
PF: predicated region fallthrough
CT: control target
= control target key end

     0   :  { %s546_s21 = smov 0   ;;  %s595_s0 = inlined_call_operand.vmem [shape: bf16[16,64], index: 0, kind: input, shape index: {}]   ;;  %s596_s1 = inlined_call_operand.vmem [shape: bf16[64,64], index: 1, kind: input, shape index: {}]   ;;  %s597_s2 = inlined_call_operand.vmem [shape: f32[1,64], index: 2, kind: input, shape index: {}]   ;;  %s598_s3 = inlined_call_operand.vmem [shape: bf16[16,64], index: 3, kind: input, shape index: {}]   ;;  %s599_s4 = inlined_call_operand.vmem [shape: f32[1,64], index: 4, kind: input, shape index: {}]   ;;  %s600_s5 = inlined_call_operand.vmem [shape: f32[1,64], index: 5, kind: input, shape index: {}]   ;;  %s601_s6 = inlined_call_operand.vmem [shape: bf16[16,64], index: 6, kind: output, shape index: {}]  }
   0x1 LB: > { %s450_s22 = sadd.s32 4294967295, %s507_s21   ;;  %p454_p0 = scmp.ge.s32.totalorder %s507_s21, 1  ;;  %s507_s21 = sphi %s546_s21, %s16_s21  }
   0x2   : > { %p220_p1 = scmp.lt.s32.totalorder %s507_s21, 3 }
   0x4   : > { %p221_p2 = pnand %p454_p0, %p220_p1 }
   0x5   : > { %v495_v0 = vld [vmem:[%s596_s1] sm:$0xff] (!%p221_p2)   ;;  %v509_v1 = vmov (!%p221_p2), 0.0   ;;  %v496_v2 = vld [vmem:[%s596_s1 + $0x8] sm:$0xff] (!%p221_p2)   ;;  %vm510_vm0 = vmmov (!%p221_p2), 0   ;;  %p252_p3 = scmp.lt.s32.totalorder (!%p221_p2), %s450_s22, 1  ;;  %v497_v3 = vld [vmem:[%s596_s1 + $0x10] sm:$0xff] (!%p221_p2)  }
   0x6   : > { %224 = sbr.rel (%p221_p2) target bundleno = 554 (0x22a), region = 44  ;;  %473 = vmatprep.subr.bf16.mxu0 (!%p221_p2), %v509_v1  ;;  %481 = vmatprep.mubr.msk.bf16.mxu0 (!%p221_p2), %vm510_vm0, %v509_v1  ;;  %v498_v4 = vld [vmem:[%s596_s1 + $0x18] sm:$0xff] (!%p221_p2)   ;;  %vm305_vm1 = vcmask (!%p221_p2), 523264   ;;  %v458_v7 = vld [vmem:[%s597_s2] ss:$0 sm:$0xff] (!%p221_p2)  ;;  %vm383_vm2 = vcmask (!%p221_p2), 519168  }
   0x7   : > { %474 = vmatpush3.bf16.msra.mxu0 (!%p221_p2), %v495_v0  ;;  %v464_v25 = vld [vmem:[%s599_s4] ss:$0 sm:$0xff] (!%p221_p2) }
   0x8   : > { %475 = vmatprep.subr.bf16.mxu0 (!%p221_p2), %v509_v1  ;;  %v465_v27 = vld [vmem:[%s600_s5] ss:$0 sm:$0xff] (!%p221_p2) }
   0xb   : > { %476 = vmatpush3.bf16.msra.mxu0 (!%p221_p2), %v496_v2 }
   0xc   : > { %477 = vmatprep.subr.bf16.mxu0 (!%p221_p2), %v509_v1 }
   0xd   : > { %s603_s22 = smov (!%p252_p3, %s450_s22), 1 }
   0xe   : > { %s563_s29 = sshll.u32 %s603_s22, 2 }
   0xf   : > { %478 = vmatpush3.bf16.msra.mxu0 %v497_v3  ;;  %s255_s10 = scalar_lea.vmem %s595_s0, %s563_s29  ;;  %s259_s13 = scalar_lea.vmem %s598_s3, %s563_s29 }
  0x10   : > { %479 = vmatprep.subr.bf16.mxu0 %v509_v1  ;;  %v265_v5 = vld [vmem:[%s255_s10] sm:$0xf]  ;;  %s263_s23 = scalar_lea.vmem %s601_s6, %s563_s29 }
  0x11   : > { %v349_v6 = vld [vmem:[%s259_s13] sm:$0xf] }
  0x12   : > { %v350_v8 = vunpack.c.l.bf16 %v349_v6 }
  0x13   : > { %480 = vmatpush3.bf16.msra.mxu0 %v498_v4 }
  0x16   : > { %482 = vmatmul.mubr.msk.bf16.vlgmr.msra.gmra.mrb[0].mxu0 %vm305_vm1, %v265_v5 }
  0xe9   : > { %v343_v9 = vpop.f32.mrb[0].mxu0 }
  0xea   : > { %v344_v10 = vadd.f32 %v458_v7, %v343_v9  ;;  %v483_v11 = vpop.f32.mrb[1].mxu0 }
  0xeb   : > { %v346_v12 = vpop.f32.mrb[2].mxu0 }
  0xec   : > { %v484_v13 = vpop.f32.mrb[3].mxu0  ;;  %v351_v14 = vadd.f32 %v350_v8, %v344_v10 }
  0xee   : > { %v352_v15 = vsel %vm305_vm1, %v351_v14, 0.0 }
  0xef   : > { %353 = vadd.xlane.f32.xlu0 %v352_v15 }
 0x17c   : > { %v354_v16 = vpop.xlane.xlu0 %353 }
 0x17d   : > { %v356_v17 = vmul.f32 0.015625, %v354_v16 }
 0x17f   : > { %v357_v18 = vsub.f32 %v351_v14, %v356_v17 }
 0x181   : > { %v358_v19 = vmul.f32 %v357_v18, %v357_v18 }
 0x183   : > { %v359_v20 = vsel %vm305_vm1, %v358_v19, 0.0 }
 0x184   : > { %360 = vadd.xlane.f32.xlu0 %v359_v20 }
 0x211   : > { %v361_v21 = vpop.xlane.xlu0 %360 }
 0x212   : > { %v362_v22 = vmul.f32 0.015625, %v361_v21 }
 0x214   : > { %v363_v23 = vadd.f32 1e-05, %v362_v22 }
 0x216   : > { %499 = vrsqrt.f32 %v363_v23 }
 0x220   : > { %v500_v24 = vpop.eup %499 }
 0x221   : > { %v365_v26 = vmul.f32 %v500_v24, %v357_v18 }
 0x223   : > { %v373_v28 = vmul.f32 %v464_v25, %v365_v26 }
 0x225   : > { %v381_v29 = vadd.f32 %v465_v27, %v373_v28 }
 0x227   : > { %v382_v30 = vpack.c.bf16 %v381_v29, %v381_v29 }
 0x229   : > { %384 = vst.msk [vmem:[%s263_s23] sm:$0xf] %vm383_vm2, %v382_v30 }
 0x22a PF: > { %s16_s21 = sadd.s32 1, %s507_s21  }
 0x22b   : > { %p13_p4 = scmp.ge.s32.totalorder %s16_s21, 4  }
 0x22d   :  { %15 = sbr.rel (!%p13_p4) target bundleno = 1 (0x1), region = 77 }

// kernel: transformer_decoder.16
= control target key start
LH: loop header
LB: loop body
LE: loop exit
PB: predicated region body
PF: predicated region fallthrough
CT: control target
= control target key end

     0   :  { %s397_s9 = smov 0   ;;  %s438_s0 = inlined_call_operand.vmem [shape: bf16[32,64], index: 0, kind: input, shape index: {}]   ;;  %s439_s1 = inlined_call_operand.vmem [shape: bf16[64,256], index: 1, kind: input, shape index: {}]   ;;  %s440_s2 = inlined_call_operand.vmem [shape: bf16[32,256], index: 2, kind: output, shape index: {}]  }
   0x1 LB: > { %s324_s10 = sadd.s32 4294967295, %s379_s9   ;;  %p328_p0 = scmp.ge.s32.totalorder %s379_s9, 1  ;;  %s379_s9 = sphi %s397_s9, %s12_s9  }
   0x2   : > { %p113_p1 = scmp.lt.s32.totalorder %s379_s9, 3 }
   0x4   : > { %p114_p2 = pnand %p328_p0, %p113_p1 }
   0x5   : > { %v360_v0 = vld [vmem:[%s439_s1 + $0x4] ss:$8 sps:$4 sm:$0xff] (!%p114_p2)   ;;  %s329_s13 = sshll.u32 (!%p114_p2), %s324_s10, 1  ;;  %v362_v1 = vld [vmem:[%s439_s1] ss:$8 sps:$4 sm:$0xff] (!%p114_p2)   ;;  %v381_v2 = vmov (!%p114_p2), 0  }
   0x6   : > { %117 = sbr.rel (%p114_p2) target bundleno = 240 (0xf0), region = 28  ;;  %241 = vmatprep.mubr.bf16.mxu0 (!%p114_p2), %v381_v2  ;;  %p137_p3 = scmp.lt.s32.totalorder (!%p114_p2), %s329_s13, 3  ;;  %209 = vmatprep.subr.bf16.mxu0 (!%p114_p2), %v360_v0  ;;  %v363_v3 = vld [vmem:[%s439_s1 + $0x14] ss:$8 sps:$4 sm:$0xff] (!%p114_p2)   ;;  %v365_v4 = vld [vmem:[%s439_s1 + $0x10] ss:$8 sps:$4 sm:$0xff] (!%p114_p2)  }
   0x7   : > { %210 = vmatpush1.bf16.msra.mxu0 (!%p114_p2), %v362_v1  ;;  %v366_v5 = vld [vmem:[%s439_s1 + $0x24] ss:$8 sps:$4 sm:$0xff] (!%p114_p2)   ;;  %v368_v6 = vld [vmem:[%s439_s1 + $0x20] ss:$8 sps:$4 sm:$0xff] (!%p114_p2)   ;;  %v369_v7 = vld [vmem:[%s439_s1 + $0x34] ss:$8 sps:$4 sm:$0xff] (!%p114_p2)  }
   0x8   : > { %211 = vmatprep.subr.bf16.mxu0 (!%p114_p2), %v363_v3  ;;  %v371_v8 = vld [vmem:[%s439_s1 + $0x30] ss:$8 sps:$4 sm:$0xff] (!%p114_p2)   ;;  %vm205_vm0 = vcmask (!%p114_p2), 523264  }
   0xb   : > { %212 = vmatpush1.bf16.msra.mxu0 (!%p114_p2), %v365_v4 }
   0xc   : > { %213 = vmatprep.subr.bf16.mxu0 (!%p114_p2), %v366_v5 }
   0xd   : > { %s442_s13 = smov (!%p137_p3, %s329_s13), 3 }
   0xe   : > { %s330_s22 = sshll.u32 %s442_s13, 2  ;;  %s348_s4 = sshll.u32 %s442_s13, 3 }
   0xf   : > { %s140_s25 = scalar_lea.vmem %s438_s0, %s330_s22  ;;  %214 = vmatpush1.bf16.msra.mxu0 %v368_v6  ;;  %s147_s7 = scalar_lea.vmem %s440_s2, %s348_s4 }
  0x10   : > { %215 = vmatprep.subr.bf16.mxu0 %v369_v7  ;;  %v372_v9 = vld [vmem:[%s140_s25] sm:$0xff]  }
  0x13   : > { %216 = vmatpush1.bf16.msra.mxu0 %v371_v8 }
  0x16   : > { %343 = vmatmul.mubr.msk.bf16.vlgmr.msra.gmra.mrb[0].mxu0 %vm205_vm0, %v372_v9 }
  0xe9   : > { %v243_v10 = vpop.f32.mrb[0].mxu0 }
  0xea   : > { %v245_v11 = vpop.f32.mrb[1].mxu0 }
  0xeb   : > { %v349_v12 = vpack.c.bf16 %v245_v11, %v243_v10  ;;  %v247_v13 = vpop.f32.mrb[2].mxu0 }
  0xec   : > { %v249_v14 = vpop.f32.mrb[3].mxu0 }
  0xed   : > { %264 = vst [vmem:[%s147_s7] sm:$0xff] %v349_v12  ;;  %v350_v15 = vpack.c.bf16 %v249_v14, %v247_v13 }
  0xef   : > { %265 = vst [vmem:[%s147_s7 + $0x8] sm:$0xff] %v350_v15 }
  0xf0 PF: > { %s12_s9 = sadd.s32 1, %s379_s9  }
  0xf1   : > { %p9_p4 = scmp.ge.s32.totalorder %s12_s9, 4  }
  0xf3   :  { %11 = sbr.rel (!%p9_p4) target bundleno = 1 (0x1), region = 58 }

// kernel: transformer_decoder.18
= control target key start
LH: loop header
LB: loop body
LE: loop exit
PB: predicated region body
PF: predicated region fallthrough
CT: control target
= control target key end

     0   :  { %s2927_s12 = smov 0   ;;  %s2929_s13 = smov 0   ;;  %s3206_s0 = inlined_call_operand.vmem [shape: bf16[2,8,192], index: 0, kind: input, shape index: {}, may-alias: {0,1}]   ;;  %s3207_s1 = inlined_call_operand.vmem [shape: bf16[2,8,192], index: 1, kind: input, shape index: {}, may-alias: {0,1}]   ;;  %s3208_s2 = inlined_call_operand.vmem [shape: f32[2,8,8], index: 2, kind: input, shape index: {}]   ;;  %s3209_s3 = inlined_call_operand.vmem [shape: bf16[2,8,64], index: 3, kind: output, shape index: {}]  }
   0x1   :  { %s2931_s14 = smov 0  }
   0x2 LB: > { %s25_s15 = sadd.s32 1, %s2889_s13  ;;  %p2732_p0 = scmp.ge.s32.totalorder %s2893_s14, 1  ;;  %s2893_s14 = sphi %s2931_s14, %s13_s14   ;;  %s2889_s13 = sphi %s2929_s13, %s3211_s13   ;;  %s2885_s12 = sphi %s2927_s12, %s3210_s12  }
   0x3   : > { %p27_p1 = scmp.ge.s32.totalorder %s25_s15, 2  ;;  %p181_p2 = scmp.lt.s32.totalorder %s2893_s14, 3 }
   0x5   : > { %s3213_s15 = smov (%p27_p1, %s25_s15), 0  ;;  %p182_p3 = pnand %p2732_p0, %p181_p2 }
   0x6   : > { %p223_p4 = scmp.lt.s32.totalorder (!%p182_p3), %s2885_s12, 1  ;;  %s2895_s20 = smov (!%p182_p3), 112   ;;  %v2899_v4 = vmov (!%p182_p3), 1983009808   ;;  %v278_v6 = vlaneseq (!%p182_p3)  ;;  %v2900_v10 = vmov (!%p182_p3), 1934713408  }
   0x7   : > { %185 = sbr.rel (%p182_p3) target bundleno = 1657 (0x679), region = 32  ;;  %s2896_s21 = smov (!%p182_p3), 80   ;;  %v276_v5 = vunpack.c.l.s4 (!%p182_p3), %v2899_v4  ;;  %v293_v11 = vunpack.c.l.s4 (!%p182_p3), %v2900_v10  ;;  %v2901_v39 = vmov (!%p182_p3), 0   ;;  %vm2903_vm0 = vmmov (!%p182_p3), 0  }
   0x8   : > { %s2897_s22 = smov (!%p182_p3), 96   ;;  %s2898_s23 = smov (!%p182_p3), 64   ;;  %v279_v9 = vshrl.u32 (!%p182_p3), %v278_v6, 7  ;;  %vm1254_vm1 = vcmask (!%p182_p3), 130048   ;;  %vm1436_vm2 = vcmask (!%p182_p3), 64512   ;;  %vm2614_vm3 = vcmask (!%p182_p3), 261120  }
   0x9   : > { %v277_v8 = vunpack.c.0.s8 (!%p182_p3), %v276_v5  ;;  %v294_v17 = vunpack.c.0.s8 (!%p182_p3), %v293_v11  ;;  %s2904_s30 = smov (!%p182_p3), 32   ;;  %s2905_s4 = smov (!%p182_p3), 16   ;;  %vm2616_vm4 = vcmask (!%p182_p3), 392192   ;;  %vm2619_vm5 = vcmask (!%p182_p3), 519168  }
   0xa   : > { %s2906_s5 = smov (!%p182_p3), 48  }
   0xb   : > { %v2960_v15 = vsub.s32 (!%p182_p3), %v277_v8, %v279_v9  ;;  %v2964_v27 = vsub.s32 (!%p182_p3), %v294_v17, %v279_v9 }
   0xe   : > { %s3215_s12 = smov (!%p223_p4, %s2885_s12), 1 }
   0xf   : > { %s2948_s16 = sshll.u32 %s3215_s12, 3  ;;  %s2738_s6 = sshll.u32 %s3215_s12, 2 }
  0x10   : > { %s2954_s19 = scalar_lea.vmem %s3207_s1, %s2948_s16  ;;  %s231_s26 = scalar_lea.vmem %s3206_s0, %s2948_s16 }
  0x11   : > { %v253_v0 = vld [vmem:[%s2954_s19] sm:$0xf]  ;;  %s243_s29 = scalar_lea.vmem %s3208_s2, %s2948_s16  ;;  %s250_s9 = scalar_lea.vmem %s3209_s3, %s2738_s6 }
  0x12   : > { %343 = vrot.lane.b32.xlu0 %v253_v0, %s2895_s20  ;;  %347 = vrot.lane.b32.xlu1 %v253_v0, %s2896_s21  ;;  %v2976_v38 = vld [vmem:[%s231_s26] sm:$0xf] }
  0x16   : > { %345 = vrot.lane.b32.xlu0 %v253_v0, %s2897_s22  ;;  %349 = vrot.lane.b32.xlu1 %v253_v0, %s2898_s23 }
  0x84   : > { %v344_v1 = vpop.permute.xlu0 %343  ;;  %v348_v2 = vpop.permute.xlu1 %347 }
  0x85   : > { %351 = vrot.lane.b32.xlu0 %v344_v1, %s2898_s23 }
  0x88   : > { %v346_v3 = vpop.permute.xlu0 %345  ;;  %v350_v7 = vpop.permute.xlu1 %349 }
  0x89   : > { %355 = vrot.lane.b32.xlu0 %v348_v2, %s2898_s23  ;;  %353 = vrot.lane.b32.xlu1 %v346_v3, %s2898_s23  ;;  %v360_v13 = vshrl.u32 %v350_v7, 16 }
  0xf7   : > { %v352_v12 = vpop.permute.xlu0 %351 }
  0xf8   : > { %v361_v14 = vshrl.u32 %v352_v12, 16  ;;  %v359_v16 = vpack.i.b16 %v352_v12, %v350_v7 }
  0xfa   : > { %v362_v20 = vpack.i.b16 %v361_v14, %v360_v13  ;;  %v376_v24 = vrot.slane %v359_v16, %v2960_v15 }
  0xfb   : > { %v354_v18 = vpop.permute.xlu1 %353  ;;  %v356_v19 = vpop.permute.xlu0 %355 }
  0xfc   : > { %v366_v21 = vshrl.u32 %v354_v18, 16  ;;  %v365_v22 = vpack.i.b16 %v356_v19, %v354_v18  ;;  %v367_v23 = vshrl.u32 %v356_v19, 16  ;;  %v410_v30 = vrot.slane %v362_v20, %v2960_v15 }
  0xfe   : > { %v368_v25 = vpack.i.b16 %v367_v23, %v366_v21  ;;  %v384_v26 = vrot.slane %v365_v22, %v2960_v15 }
 0x100   : > { %v386_v28 = vcombine.high %v376_v24, %v384_v26  ;;  %v385_v29 = vcombine.low %v376_v24, %v384_v26  ;;  %v418_v31 = vrot.slane %v368_v25, %v2960_v15 }
 0x102   : > { %v400_v32 = vrot.slane %v386_v28, %v2964_v27  ;;  %v393_v33 = vrot.slane %v385_v29, %v2964_v27  ;;  %v419_v34 = vcombine.low %v410_v30, %v418_v31  ;;  %v420_v35 = vcombine.high %v410_v30, %v418_v31 }
 0x104   : > { %650 = vxpose.xlu0.c.b16.start.end [1/1] (short) (narrow) %v400_v32, 16  ;;  %586 = vxpose.xlu1.c.b16.start.end [1/1] (short) (narrow) %v393_v33, 16  ;;  %v427_v36 = vrot.slane %v419_v34, %v2964_v27  ;;  %v434_v37 = vrot.slane %v420_v35, %v2964_v27  ;;  %v401_v40 = vcombine.high %v393_v33, %v2901_v39 }
 0x105   : > { %v402_v41 = vcombine.high %v400_v32, %v2901_v39 }
 0x106   : > { %v435_v42 = vcombine.high %v427_v36, %v2901_v39  ;;  %v436_v43 = vcombine.high %v434_v37, %v2901_v39 }
 0x108   : > { %602 = vxpose.xlu0.c.b16.start.end [1/1] (short) (narrow) %v427_v36, 16  ;;  %666 = vxpose.xlu1.c.b16.start.end [1/1] (short) (narrow) %v434_v37, 16 }
 0x10c   : > { %618 = vxpose.xlu0.c.b16.start.end [1/1] (short) (narrow) %v401_v40, 16  ;;  %258 = vrot.lane.b32.xlu1 %v2976_v38, %s2897_s22 }
 0x110   : > { %682 = vxpose.xlu0.c.b16.start.end [1/1] (short) (narrow) %v402_v41, 16 }
 0x119   : > { %256 = vrot.lane.b32.xlu0 %v2976_v38, %s2895_s20 }
 0x12f   : > { %634 = vxpose.xlu1.c.b16.start.end [1/1] (short) (narrow) %v435_v42, 16  ;;  %v2902_v42 = vmov 0.0  }
 0x130   : > { %2771 = vmatprep.subr.bf16.mxu0 %v2902_v42  ;;  %2777 = vmatprep.subr.bf16.mxu1 %v2902_v42 }
 0x131   : > { %2773 = vmatprep.mubr.msk.bf16.mxu0 %vm2903_vm0, %v2902_v42  ;;  %2779 = vmatprep.mubr.msk.bf16.mxu1 %vm2903_vm0, %v2902_v42 }
 0x133   : > { %698 = vxpose.xlu1.c.b16.start.end [1/1] (short) (narrow) %v436_v43, 16 }
 0x137   : > { %260 = vrot.lane.b32.xlu1 %v2976_v38, %s2896_s21 }
 0x16a   : > { %v594_v44 = vpop.trf.xlu1  ;;  %v658_v45 = vpop.trf.xlu0 }
 0x16b   : > { %v718_v54 = vshrl.u32 %v594_v44, 16  ;;  %v734_v56 = vshrl.u32 %v658_v45, 16 }
 0x16e   : > { %v674_v46 = vpop.trf.xlu1  ;;  %v610_v47 = vpop.trf.xlu0 }
 0x16f   : > { %v732_v52 = vpack.i.b16 %v674_v46, %v658_v45  ;;  %v716_v53 = vpack.i.b16 %v610_v47, %v594_v44  ;;  %v735_v55 = vshrl.u32 %v674_v46, 16  ;;  %v719_v57 = vshrl.u32 %v610_v47, 16 }
 0x171   : > { %v746_v62 = vcombine.low %v716_v53, %v732_v52  ;;  %v736_v2 = vpack.i.b16 %v735_v55, %v734_v56  ;;  %v720_v3 = vpack.i.b16 %v719_v57, %v718_v54  ;;  %v747_v4 = vcombine.high %v716_v53, %v732_v52 }
 0x172   : > { %v626_v48 = vpop.trf.xlu0 }
 0x173   : > { %v726_v58 = vshrl.u32 %v626_v48, 16  ;;  %v754_v9 = vrot.slane %v746_v62, %v2960_v15  ;;  %v814_v13 = vcombine.low %v720_v3, %v736_v2  ;;  %v761_v17 = vrot.slane %v747_v4, %v2960_v15 }
 0x174   : > { %v815_v24 = vcombine.high %v720_v3, %v736_v2 }
 0x175   : > { %v822_v23 = vrot.slane %v814_v13, %v2960_v15 }
 0x176   : > { %v690_v51 = vpop.trf.xlu0  ;;  %v829_v31 = vrot.slane %v815_v24, %v2960_v15 }
 0x177   : > { %v742_v60 = vshrl.u32 %v690_v51, 16 }
 0x17e   : > { %v2988_v49 = vpop.permute.xlu1 %258 }
 0x18b   : > { %v257_v53 = vpop.permute.xlu0 %256 }
 0x18c   : > { %v266_v62 = vshrl.u32 %v257_v53, 16 }
 0x195   : > { %v642_v50 = vpop.trf.xlu1 }
 0x196   : > { %v727_v59 = vshrl.u32 %v642_v50, 16  ;;  %v724_v63 = vpack.i.b16 %v642_v50, %v626_v48  ;;  %v3019_v48 = vld [vmem:[%s2954_s19 + $0x4] sm:$0xf] }
 0x198   : > { %v728_v5 = vpack.i.b16 %v727_v59, %v726_v58 }
 0x199   : > { %v706_v61 = vpop.trf.xlu1 }
 0x19a   : > { %v740_v0 = vpack.i.b16 %v706_v61, %v690_v51  ;;  %v743_v1 = vshrl.u32 %v706_v61, 16  ;;  %v265_v61 = vshrl.u32 %v2976_v38, 16 }
 0x19c   : > { %v744_v6 = vpack.i.b16 %v743_v1, %v742_v60  ;;  %v762_v7 = vcombine.low %v724_v63, %v740_v0  ;;  %v763_v8 = vcombine.high %v724_v63, %v740_v0  ;;  %v271_v63 = vshrl.u32 %v2988_v49, 16 }
 0x19d   : > { %v267_v2 = vpack.i.b16 %v266_v62, %v265_v61 }
 0x19e   : > { %v770_v10 = vrot.slane %v762_v7, %v2960_v15  ;;  %v830_v11 = vcombine.low %v728_v5, %v744_v6  ;;  %v777_v12 = vrot.slane %v763_v8, %v2960_v15  ;;  %v831_v22 = vcombine.high %v728_v5, %v744_v6 }
 0x19f   : > { %v264_v5 = vpack.i.b16 %v257_v53, %v2976_v38  ;;  %v315_v8 = vrot.slane %v267_v2, %v2960_v15 }
 0x1a0   : > { %v779_v14 = vcombine.high %v754_v9, %v770_v10  ;;  %v778_v16 = vcombine.low %v754_v9, %v770_v10  ;;  %v794_v20 = vcombine.low %v761_v17, %v777_v12  ;;  %v838_v21 = vrot.slane %v830_v11, %v2960_v15 }
 0x1a1   : > { %v795_v28 = vcombine.high %v761_v17, %v777_v12  ;;  %v845_v30 = vrot.slane %v831_v22, %v2960_v15  ;;  %v281_v11 = vrot.slane %v264_v5, %v2960_v15 }
 0x1a2   : > { %v793_v18 = vrot.slane %v779_v14, %v2964_v27  ;;  %v786_v19 = vrot.slane %v778_v16, %v2964_v27  ;;  %v802_v25 = vrot.slane %v794_v20, %v2964_v27  ;;  %v847_v29 = vcombine.high %v822_v23, %v838_v21 }
 0x1a3   : > { %v809_v32 = vrot.slane %v795_v28, %v2964_v27  ;;  %v846_v34 = vcombine.low %v822_v23, %v838_v21  ;;  %v862_v35 = vcombine.low %v829_v31, %v845_v30  ;;  %v863_v40 = vcombine.high %v829_v31, %v845_v30 }
 0x1a4   : > { %946 = vxpose.xlu1.c.b16.start.end [1/1] (short) (narrow) %v793_v18, 16  ;;  %882 = vxpose.xlu0.c.b16.start.end [1/1] (short) (narrow) %v786_v19, 16  ;;  %v810_v26 = vcombine.high %v786_v19, %v2901_v39  ;;  %v861_v33 = vrot.slane %v847_v29, %v2964_v27  ;;  %v811_v41 = vcombine.high %v793_v18, %v2901_v39 }
 0x1a5   : > { %v854_v36 = vrot.slane %v846_v34, %v2964_v27  ;;  %v870_v37 = vrot.slane %v862_v35, %v2964_v27  ;;  %v877_v43 = vrot.slane %v863_v40, %v2964_v27  ;;  %v812_v44 = vcombine.high %v802_v25, %v2901_v39 }
 0x1a6   : > { %v813_v46 = vcombine.high %v809_v32, %v2901_v39  ;;  %v879_v47 = vcombine.high %v861_v33, %v2901_v39 }
 0x1a7   : > { %v878_v45 = vcombine.high %v854_v36, %v2901_v39  ;;  %v880_v50 = vcombine.high %v870_v37, %v2901_v39  ;;  %v881_v51 = vcombine.high %v877_v43, %v2901_v39 }
 0x1a8   : > { %1010 = vxpose.xlu1.c.b16.start.end [1/1] (short) (narrow) %v802_v25, 16  ;;  %914 = vxpose.xlu0.c.b16.start.end [1/1] (short) (narrow) %v810_v26, 16 }
 0x1a9   : > { %v261_v52 = vpop.permute.xlu1 %260 }
 0x1aa   : > { %v272_v60 = vshrl.u32 %v261_v52, 16  ;;  %v270_v4 = vpack.i.b16 %v261_v52, %v2988_v49 }
 0x1ac   : > { %1074 = vxpose.xlu1.c.b16.start.end [1/1] (short) (narrow) %v809_v32, 16  ;;  %962 = vxpose.xlu0.c.b16.start.end [1/1] (short) (narrow) %v861_v33, 16  ;;  %v273_v1 = vpack.i.b16 %v272_v60, %v271_v63  ;;  %v289_v10 = vrot.slane %v270_v4, %v2960_v15 }
 0x1ae   : > { %v323_v7 = vrot.slane %v273_v1, %v2960_v15  ;;  %v290_v17 = vcombine.low %v281_v11, %v289_v10  ;;  %v291_v18 = vcombine.high %v281_v11, %v289_v10 }
 0x1b0   : > { %898 = vxpose.xlu1.c.b16.start.end [1/1] (short) (narrow) %v854_v36, 16  ;;  %1026 = vxpose.xlu0.c.b16.start.end [1/1] (short) (narrow) %v870_v37, 16  ;;  %v324_v13 = vcombine.low %v315_v8, %v323_v7  ;;  %v325_v14 = vcombine.high %v315_v8, %v323_v7  ;;  %v298_v24 = vrot.slane %v290_v17, %v2964_v27 }
 0x1b1   : > { %v305_v25 = vrot.slane %v291_v18, %v2964_v27 }
 0x1b2   : > { %v332_v49 = vrot.slane %v324_v13, %v2964_v27  ;;  %v339_v38 = vrot.slane %v325_v14, %v2964_v27 }
 0x1b3   : > { %v524_v36 = vcombine.low %v298_v24, %v305_v25  ;;  %v2739_v37 = vcombine.high %v298_v24, %v305_v25 }
 0x1b4   : > { %978 = vxpose.xlu1.c.b16.start.end [1/1] (short) (narrow) %v811_v41, 16  ;;  %1090 = vxpose.xlu0.c.b16.start.end [1/1] (short) (narrow) %v877_v43, 16  ;;  %v549_v30 = vcombine.low %v332_v49, %v339_v38  ;;  %v2740_v31 = vcombine.high %v332_v49, %v339_v38  ;;  %v447_v38 = vshrl.u32 %v3019_v48, 16 }
 0x1b5   : > { %v531_v53 = vrot.slane %v524_v36, %v2960_v15 }
 0x1b8   : > { %1042 = vxpose.xlu1.c.b16.start.end [1/1] (short) (narrow) %v812_v44, 16  ;;  %930 = vxpose.xlu0.c.b16.start.end [1/1] (short) (narrow) %v878_v45, 16  ;;  %v556_v45 = vrot.slane %v549_v30, %v2960_v15 }
 0x1bc   : > { %1106 = vxpose.xlu1.c.b16.start.end [1/1] (short) (narrow) %v813_v46, 16  ;;  %994 = vxpose.xlu0.c.b16.start.end [1/1] (short) (narrow) %v879_v47, 16  ;;  %v564_v46 = vrot.slane %v2740_v31, %v2960_v15 }
 0x1c0   : > { %438 = vrot.lane.b32.xlu1 %v3019_v48, %s2895_s20  ;;  %1058 = vxpose.xlu0.c.b16.start.end [1/1] (short) (narrow) %v880_v50, 16 }
 0x1c4   : > { %442 = vrot.lane.b32.xlu1 %v3019_v48, %s2896_s21  ;;  %1122 = vxpose.xlu0.c.b16.start.end [1/1] (short) (narrow) %v881_v51, 16 }
 0x1cd   : > { %440 = vrot.lane.b32.xlu0 %v3019_v48, %s2897_s22 }
 0x20a   : > { %v954_v54 = vpop.trf.xlu1  ;;  %v890_v55 = vpop.trf.xlu0 }
 0x20b   : > { %v1138_v26 = vcombine.low %v890_v55, %v954_v54  ;;  %v539_v54 = vrot.slane %v2739_v37, %v2960_v15 }
 0x20d   : > { %v1145_v40 = vrot.slane %v1138_v26, %v2960_v15  ;;  %v540_v62 = vcombine.low %v531_v53, %v539_v54 }
 0x20e   : > { %v1018_v56 = vpop.trf.xlu1  ;;  %v922_v57 = vpop.trf.xlu0 }
 0x20f   : > { %v547_v5 = vrot.slane %v540_v62, %v2964_v27 }
 0x212   : > { %v1082_v58 = vpop.trf.xlu1  ;;  %v970_v59 = vpop.trf.xlu0 }
 0x213   : > { %v1154_v22 = vcombine.low %v1018_v56, %v1082_v58 }
 0x215   : > { %v1161_v33 = vrot.slane %v1154_v22, %v2960_v15  ;;  %v548_v22 = vcombine.high %v547_v5, %v2901_v39 }
 0x216   : > { %v906_v0 = vpop.trf.xlu1  ;;  %v1034_v3 = vpop.trf.xlu0 }
 0x217   : > { %v1188_v34 = vcombine.low %v906_v0, %v970_v59  ;;  %v565_v59 = vcombine.low %v556_v45, %v564_v46 }
 0x219   : > { %v1195_v50 = vrot.slane %v1188_v34, %v2960_v15  ;;  %v572_v2 = vrot.slane %v565_v59, %v2964_v27 }
 0x21a   : > { %v986_v6 = vpop.trf.xlu1  ;;  %v1098_v9 = vpop.trf.xlu0 }
 0x21b   : > { %v1146_v23 = vcombine.low %v922_v57, %v986_v6  ;;  %v1204_v41 = vcombine.low %v1034_v3, %v1098_v9  ;;  %v578_v11 = vshrl.u32 %v572_v2, 16  ;;  %v576_v14 = vpack.i.b16 %v572_v2, %v547_v5 }
 0x21c   : > { %v573_v49 = vcombine.high %v572_v2, %v2901_v39 }
 0x21d   : > { %v1153_v35 = vrot.slane %v1146_v23, %v2960_v15  ;;  %v1211_v55 = vrot.slane %v1204_v41, %v2960_v15 }
 0x21e   : > { %v1050_v12 = vpop.trf.xlu1  ;;  %v938_v16 = vpop.trf.xlu0  ;;  %v584_v25 = vshrl.u32 %v573_v49, 16  ;;  %v582_v31 = vpack.i.b16 %v573_v49, %v548_v22 }
 0x21f   : > { %v1170_v51 = vcombine.low %v1145_v40, %v1153_v35 }
 0x221   : > { %v1177_v61 = vrot.slane %v1170_v51, %v2964_v27 }
 0x222   : > { %v1114_v19 = vpop.trf.xlu1  ;;  %v1002_v21 = vpop.trf.xlu0 }
 0x223   : > { %v1162_v20 = vcombine.low %v1050_v12, %v1114_v19  ;;  %v1196_v29 = vcombine.low %v938_v16, %v1002_v21  ;;  %v577_v16 = vshrl.u32 %v547_v5, 16 }
 0x225   : > { %v1169_v28 = vrot.slane %v1162_v20, %v2960_v15  ;;  %v1203_v44 = vrot.slane %v1196_v29, %v2960_v15  ;;  %v579_v19 = vpack.i.b16 %v578_v11, %v577_v16  ;;  %v583_v29 = vshrl.u32 %v548_v22, 16 }
 0x226   : > { %v1066_v32 = vpop.trf.xlu0 }
 0x227   : > { %v1178_v43 = vcombine.low %v1161_v33, %v1169_v28  ;;  %v1220_v56 = vcombine.low %v1195_v50, %v1203_v44 }
 0x229   : > { %v1185_v58 = vrot.slane %v1178_v43, %v2964_v27  ;;  %v1227_v0 = vrot.slane %v1220_v56, %v2964_v27 }
 0x22a   : > { %v1130_v47 = vpop.trf.xlu0 }
 0x22b   : > { %v1212_v52 = vcombine.low %v1066_v32, %v1130_v47  ;;  %v1186_v63 = vcombine.low %v1177_v61, %v1185_v58  ;;  %v1187_v6 = vcombine.high %v1177_v61, %v1185_v58 }
 0x22d   : > { %v1219_v57 = vrot.slane %v1212_v52, %v2960_v15  ;;  %v1242_v8 = vshrl.u32 %v1186_v63, 16  ;;  %v1250_v18 = vshrl.u32 %v1187_v6, 16 }
 0x22f   : > { %v1228_v60 = vcombine.low %v1211_v55, %v1219_v57 }
 0x231   : > { %v1235_v1 = vrot.slane %v1228_v60, %v2964_v27 }
 0x232   : > { %v439_v10 = vpop.permute.xlu1 %438 }
 0x233   : > { %v1236_v3 = vcombine.low %v1227_v0, %v1235_v1  ;;  %v1237_v4 = vcombine.high %v1227_v0, %v1235_v1  ;;  %v448_v20 = vshrl.u32 %v439_v10, 16  ;;  %v446_v24 = vpack.i.b16 %v439_v10, %v3019_v48 }
 0x234   : > { %v585_v48 = vpack.i.b16 %v584_v25, %v583_v29 }
 0x235   : > { %v1240_v7 = vpack.i.b16 %v1236_v3, %v1186_v63  ;;  %v1243_v9 = vshrl.u32 %v1236_v3, 16  ;;  %v1251_v13 = vshrl.u32 %v1237_v4, 16  ;;  %v1248_v17 = vpack.i.b16 %v1237_v4, %v1187_v6 }
 0x236   : > { %v443_v23 = vpop.permute.xlu1 %442  ;;  %v449_v26 = vpack.i.b16 %v448_v20, %v447_v38  ;;  %v463_v32 = vrot.slane %v446_v24, %v2960_v15 }
 0x237   : > { %2772 = vmatpush3.bf16.msra.mxu0 %v1240_v7  ;;  %v1244_v12 = vpack.i.b16 %v1243_v9, %v1242_v8  ;;  %v1252_v21 = vpack.i.b16 %v1251_v13, %v1250_v18  ;;  %v454_v28 = vshrl.u32 %v443_v23, 16 }
 0x238   : > { %2783 = vmatprep.subr.bf16.mxu0 %v2902_v42  ;;  %v497_v35 = vrot.slane %v449_v26, %v2960_v15 }
 0x239   : > { %2778 = vmatpush3.bf16.msra.mxu1 %v1244_v12 }
 0x23a   : > { %2774 = vmatmul.mubr.msk.bf16.vlgmr.msra.gmra.mrb[0].mxu0 %vm1254_vm1, %v576_v14  ;;  %2789 = vmatprep.subr.bf16.mxu1 %v2902_v42 }
 0x23b   : > { %2784 = vmatpush3.bf16.msra.mxu0 %v1248_v17  ;;  %2785 = vmatprep.mubr.msk.bf16.mxu0 %vm2903_vm0, %v2902_v42 }
 0x23c   : > { %2780 = vmatmul.mubr.msk.bf16.vlgmr.msra.gmra.mrb[0].mxu1 %vm1254_vm1, %v579_v19  ;;  %2795 = vmatprep.subr.bf16.mxu0 %v2902_v42 }
 0x23d   : > { %2790 = vmatpush3.bf16.msra.mxu1 %v1252_v21  ;;  %2791 = vmatprep.mubr.msk.bf16.mxu1 %vm2903_vm0, %v2902_v42 }
 0x23e   : > { %2801 = vmatprep.subr.bf16.mxu1 %v2902_v42 }
 0x23f   : > { %v441_v30 = vpop.permute.xlu0 %440 }
 0x240   : > { %v452_v33 = vpack.i.b16 %v443_v23, %v441_v30  ;;  %v453_v34 = vshrl.u32 %v441_v30, 16 }
 0x242   : > { %2786 = vmatmul.mubr.msk.bf16.vlgmr.msra.gmra.mrb[4].mxu0 %vm1254_vm1, %v582_v31  ;;  %v455_v36 = vpack.i.b16 %v454_v28, %v453_v34  ;;  %v471_v37 = vrot.slane %v452_v33, %v2960_v15 }
 0x243   : > { %2797 = vmatprep.mubr.msk.bf16.mxu0 %vm2903_vm0, %v2902_v42 }
 0x244   : > { %2792 = vmatmul.mubr.msk.bf16.vlgmr.msra.gmra.mrb[4].mxu1 %vm1254_vm1, %v585_v48  ;;  %v472_v40 = vcombine.low %v463_v32, %v471_v37  ;;  %v505_v41 = vrot.slane %v455_v36, %v2960_v15  ;;  %v473_v51 = vcombine.high %v463_v32, %v471_v37 }
 0x245   : > { %2803 = vmatprep.mubr.msk.bf16.mxu1 %vm2903_vm0, %v2902_v42 }
 0x246   : > { %v506_v43 = vcombine.low %v497_v35, %v505_v41  ;;  %v480_v44 = vrot.slane %v472_v40, %v2964_v27  ;;  %v507_v46 = vcombine.high %v497_v35, %v505_v41  ;;  %v487_v53 = vrot.slane %v473_v51, %v2964_v27 }
 0x248   : > { %v514_v45 = vrot.slane %v506_v43, %v2964_v27  ;;  %1485 = vxpose.xlu1.c.b16.start.end [1/1] (short) (narrow) %v480_v44, 16  ;;  %v488_v47 = vcombine.high %v480_v44, %v2901_v39  ;;  %v521_v52 = vrot.slane %v507_v46, %v2964_v27  ;;  %v489_v55 = vcombine.high %v487_v53, %v2901_v39 }
 0x24a   : > { %1501 = vxpose.xlu0.c.b16.start.end [1/1] (short) (narrow) %v514_v45, 16  ;;  %v522_v50 = vcombine.high %v514_v45, %v2901_v39  ;;  %v523_v54 = vcombine.high %v521_v52, %v2901_v39  ;;  %v1431_v45 = vld [vmem:[%s243_s29] sm:$0xff] }
 0x24c   : > { %1533 = vxpose.xlu1.c.b16.start.end [1/1] (short) (narrow) %v522_v50, 16 }
 0x24e   : > { %1517 = vxpose.xlu0.c.b16.start.end [1/1] (short) (narrow) %v488_v47, 16 }
 0x250   : > { %1565 = vxpose.xlu1.c.b16.start.end [1/1] (short) (narrow) %v521_v52, 16 }
 0x252   : > { %1549 = vxpose.xlu0.c.b16.start.end [1/1] (short) (narrow) %v487_v53, 16 }
 0x254   : > { %1597 = vxpose.xlu1.c.b16.start.end [1/1] (short) (narrow) %v523_v54, 16 }
 0x256   : > { %1581 = vxpose.xlu0.c.b16.start.end [1/1] (short) (narrow) %v489_v55, 16 }
 0x2ae   : > { %v1493_v56 = vpop.trf.xlu1 }
 0x2af   : > { %v1617_v61 = vshrl.u32 %v1493_v56, 16 }
 0x2b0   : > { %v1509_v57 = vpop.trf.xlu0 }
 0x2b1   : > { %v1618_v60 = vshrl.u32 %v1509_v57, 16  ;;  %v1615_v63 = vpack.i.b16 %v1509_v57, %v1493_v56 }
 0x2b2   : > { %v1541_v58 = vpop.trf.xlu1 }
 0x2b3   : > { %v1626_v1 = vshrl.u32 %v1541_v58, 16  ;;  %v1619_v4 = vpack.i.b16 %v1618_v60, %v1617_v61 }
 0x2b4   : > { %v1525_v59 = vpop.trf.xlu0 }
 0x2b5   : > { %v1625_v2 = vshrl.u32 %v1525_v59, 16  ;;  %v1623_v7 = vpack.i.b16 %v1541_v58, %v1525_v59 }
 0x2b6   : > { %v1573_v62 = vpop.trf.xlu1 }
 0x2b7   : > { %v1634_v0 = vshrl.u32 %v1573_v62, 16  ;;  %v1627_v13 = vpack.i.b16 %v1626_v1, %v1625_v2 }
 0x2b8   : > { %v1557_v3 = vpop.trf.xlu0 }
 0x2b9   : > { %v1631_v5 = vpack.i.b16 %v1573_v62, %v1557_v3  ;;  %v1633_v6 = vshrl.u32 %v1557_v3, 16 }
 0x2ba   : > { %v1605_v8 = vpop.trf.xlu1 }
 0x2bb   : > { %v1635_v9 = vpack.i.b16 %v1634_v0, %v1633_v6  ;;  %v1645_v10 = vcombine.low %v1615_v63, %v1631_v5  ;;  %v1646_v11 = vcombine.high %v1615_v63, %v1631_v5  ;;  %v1642_v12 = vshrl.u32 %v1605_v8, 16 }
 0x2bc   : > { %v1589_v14 = vpop.trf.xlu0 }
 0x2bd   : > { %v1713_v16 = vcombine.low %v1619_v4, %v1635_v9  ;;  %v1714_v17 = vcombine.high %v1619_v4, %v1635_v9  ;;  %v1639_v18 = vpack.i.b16 %v1605_v8, %v1589_v14  ;;  %v1641_v19 = vshrl.u32 %v1589_v14, 16 }
 0x2be   : > { %v3092_v21 = vrot.slane %v1645_v10, %v2960_v15  ;;  %v3096_v23 = vrot.slane %v1646_v11, %v2960_v15 }
 0x2bf   : > { %v1643_v49 = vpack.i.b16 %v1642_v12, %v1641_v19  ;;  %v1661_v38 = vcombine.low %v1623_v7, %v1639_v18  ;;  %v1662_v20 = vcombine.high %v1623_v7, %v1639_v18  ;;  %v1721_v22 = vrot.slane %v1713_v16, %v2960_v15 }
 0x2c0   : > { %v3103_v29 = vrot.slane %v1714_v17, %v2960_v15 }
 0x2c1   : > { %v1729_v24 = vcombine.low %v1627_v13, %v1643_v49  ;;  %v1730_v25 = vcombine.high %v1627_v13, %v1643_v49  ;;  %v1669_v26 = vrot.slane %v1661_v38, %v2960_v15  ;;  %v3100_v28 = vrot.slane %v1662_v20, %v2960_v15 }
 0x2c3   : > { %v1677_v30 = vcombine.low %v3092_v21, %v1669_v26  ;;  %v1737_v31 = vrot.slane %v1729_v24, %v2960_v15  ;;  %v1678_v32 = vcombine.high %v3092_v21, %v1669_v26  ;;  %v3109_v33 = vrot.slane %v1730_v25, %v2960_v15 }
 0x2c4   : > { %v1693_v34 = vcombine.low %v3096_v23, %v3100_v28  ;;  %v1694_v48 = vcombine.high %v3096_v23, %v3100_v28 }
 0x2c5   : > { %v1685_v35 = vrot.slane %v1677_v30, %v2964_v27  ;;  %v1745_v36 = vcombine.low %v1721_v22, %v1737_v31  ;;  %v1746_v37 = vcombine.high %v1721_v22, %v1737_v31  ;;  %v1761_v40 = vcombine.low %v3103_v29, %v3109_v33 }
 0x2c6   : > { %v1762_v41 = vcombine.high %v3103_v29, %v3109_v33  ;;  %v1692_v14 = vrot.slane %v1678_v32, %v2964_v27  ;;  %v1701_v19 = vrot.slane %v1693_v34, %v2964_v27  ;;  %v1708_v21 = vrot.slane %v1694_v48, %v2964_v27 }
 0x2c7   : > { %1781 = vxpose.xlu0.c.b16.start.end [1/1] (short) (narrow) %v1685_v35, 16  ;;  %v1753_v43 = vrot.slane %v1745_v36, %v2964_v27  ;;  %v1709_v6 = vcombine.high %v1685_v35, %v2901_v39  ;;  %v1760_v13 = vrot.slane %v1746_v37, %v2964_v27  ;;  %v1769_v18 = vrot.slane %v1761_v40, %v2964_v27 }
 0x2c8   : > { %v1710_v17 = vcombine.high %v1692_v14, %v2901_v39  ;;  %v1711_v38 = vcombine.high %v1701_v19, %v2901_v39  ;;  %v1776_v20 = vrot.slane %v1762_v41, %v2964_v27 }
 0x2c9   : > { %1797 = vxpose.xlu1.c.b16.start.end [1/1] (short) (narrow) %v1753_v43, 16  ;;  %v1777_v5 = vcombine.high %v1753_v43, %v2901_v39  ;;  %v1778_v16 = vcombine.high %v1760_v13, %v2901_v39  ;;  %v1779_v49 = vcombine.high %v1769_v18, %v2901_v39 }
 0x30d   : > { %v1292_v44 = vpop.f32.mrb[0].mxu0 }
 0x30e   : > { %v1427_v46 = vmul.f32 0.25, %v1292_v44  ;;  %v2775_v47 = vpop.f32.mrb[1].mxu0 }
 0x30f   : > { %v1295_v50 = vpop.f32.mrb[2].mxu0  ;;  %v1335_v51 = vpop.f32.mrb[0].mxu1 }
 0x310   : > { %v1428_v52 = vmul.f32 0.25, %v1335_v51  ;;  %v2776_v53 = vpop.f32.mrb[3].mxu0  ;;  %v2781_v54 = vpop.f32.mrb[1].mxu1  ;;  %v1432_v55 = vadd.f32 %v1431_v45, %v1427_v46 }
 0x311   : > { %v1338_v56 = vpop.f32.mrb[2].mxu1 }
 0x312   : > { %v2782_v57 = vpop.f32.mrb[3].mxu1  ;;  %v1437_v58 = vsel %vm1436_vm2, %v1432_v55, -inf  ;;  %v1433_v59 = vadd.f32 %v1431_v45, %v1428_v52 }
 0x313   : > { %1438 = vmax.xlane.f32.xlu1 %v1437_v58 }
 0x314   : > { %v1440_v60 = vsel %vm1436_vm2, %v1433_v59, -inf }
 0x315   : > { %1441 = vmax.xlane.f32.xlu0 %v1440_v60  ;;  %v1378_v61 = vpop.f32.mrb[4].mxu0 }
 0x316   : > { %v2787_v62 = vpop.f32.mrb[5].mxu0  ;;  %v1429_v7 = vmul.f32 0.25, %v1378_v61 }
 0x317   : > { %v1381_v63 = vpop.f32.mrb[6].mxu0  ;;  %v1421_v0 = vpop.f32.mrb[4].mxu1 }
 0x318   : > { %v2788_v1 = vpop.f32.mrb[7].mxu0  ;;  %v2793_v2 = vpop.f32.mrb[5].mxu1  ;;  %v1430_v8 = vmul.f32 0.25, %v1421_v0  ;;  %v1434_v9 = vadd.f32 %v1431_v45, %v1429_v7 }
 0x319   : > { %v1424_v3 = vpop.f32.mrb[6].mxu1  ;;  %v1712_v1 = vcombine.high %v1708_v21, %v2901_v39  ;;  %v1780_v2 = vcombine.high %v1776_v20, %v2901_v39 }
 0x31a   : > { %v2794_v4 = vpop.f32.mrb[7].mxu1  ;;  %v1435_v10 = vadd.f32 %v1431_v45, %v1430_v8  ;;  %v1443_v11 = vsel %vm1436_vm2, %v1434_v9, -inf }
 0x31c   : > { %v1446_v12 = vsel %vm1436_vm2, %v1435_v10, -inf }
 0x32d   : > { %v1789_v24 = vpop.trf.xlu0 }
 0x32f   : > { %v1805_v22 = vpop.trf.xlu1 }
 0x340   : > { %1829 = vxpose.xlu1.c.b16.start.end [1/1] (short) (narrow) %v1777_v5, 16 }
 0x342   : > { %1813 = vxpose.xlu0.c.b16.start.end [1/1] (short) (narrow) %v1709_v6, 16 }
 0x34d   : > { %1444 = vmax.xlane.f32.xlu1 %v1443_v11 }
 0x34f   : > { %1447 = vmax.xlane.f32.xlu0 %v1446_v12 }
 0x37a   : > { %1861 = vxpose.xlu1.c.b16.start.end [1/1] (short) (narrow) %v1760_v13, 16 }
 0x37c   : > { %1845 = vxpose.xlu0.c.b16.start.end [1/1] (short) (narrow) %v1692_v14, 16 }
 0x37e   : > { %1893 = vxpose.xlu1.c.b16.start.end [1/1] (short) (narrow) %v1778_v16, 16 }
 0x380   : > { %1877 = vxpose.xlu0.c.b16.start.end [1/1] (short) (narrow) %v1710_v17, 16 }
 0x382   : > { %1925 = vxpose.xlu1.c.b16.start.end [1/1] (short) (narrow) %v1769_v18, 16 }
 0x384   : > { %1909 = vxpose.xlu0.c.b16.start.end [1/1] (short) (narrow) %v1701_v19, 16 }
 0x386   : > { %1957 = vxpose.xlu1.c.b16.start.end [1/1] (short) (narrow) %v1779_v49, 16 }
 0x388   : > { %1941 = vxpose.xlu0.c.b16.start.end [1/1] (short) (narrow) %v1711_v38, 16 }
 0x38a   : > { %1989 = vxpose.xlu1.c.b16.start.end [1/1] (short) (narrow) %v1776_v20, 16 }
 0x38c   : > { %1973 = vxpose.xlu0.c.b16.start.end [1/1] (short) (narrow) %v1708_v21, 16 }
 0x3a0   : > { %v1439_v25 = vpop.xlane.xlu1 %1438 }
 0x3a1   : > { %v1449_v26 = vsub.f32 %v1432_v55, %v1439_v25 }
 0x3a2   : > { %v1442_v29 = vpop.xlane.xlu0 %1441 }
 0x3a3   : > { %v1453_v30 = vmul.f32 1.442695, %v1449_v26  ;;  %v1450_v31 = vsub.f32 %v1433_v59, %v1442_v29 }
 0x3a5   : > { %2855 = vpow2.f32 %v1453_v30  ;;  %v1455_v32 = vmul.f32 1.442695, %v1450_v31 }
 0x3a6   : > { %v1837_v23 = vpop.trf.xlu1 }
 0x3a7   : > { %2857 = vpow2.f32 %v1455_v32 }
 0x3a8   : > { %v1821_v28 = vpop.trf.xlu0 }
 0x3af   : > { %v2856_v33 = vpop.eup %2855 }
 0x3b0   : > { %v1461_v34 = vsel %vm1436_vm2, %v2856_v33, 0.0 }
 0x3b1   : > { %v2858_v35 = vpop.eup %2857  ;;  %1462 = vadd.xlane.f32.xlu0 %v1461_v34 }
 0x3b2   : > { %v1464_v36 = vsel %vm1436_vm2, %v2858_v35, 0.0 }
 0x3b3   : > { %1465 = vadd.xlane.f32.xlu1 %v1464_v36 }
 0x3da   : > { %v1445_v48 = vpop.xlane.xlu1 %1444 }
 0x3db   : > { %v1451_v37 = vsub.f32 %v1434_v9, %v1445_v48 }
 0x3dc   : > { %v1448_v40 = vpop.xlane.xlu0 %1447 }
 0x3dd   : > { %v1457_v41 = vmul.f32 1.442695, %v1451_v37  ;;  %v1452_v43 = vsub.f32 %v1435_v10, %v1448_v40 }
 0x3df   : > { %2859 = vpow2.f32 %v1457_v41  ;;  %v1459_v44 = vmul.f32 1.442695, %v1452_v43 }
 0x3e0   : > { %v1869_v45 = vpop.trf.xlu1 }
 0x3e1   : > { %2861 = vpow2.f32 %v1459_v44  ;;  %v2087_v47 = vcombine.low %v1805_v22, %v1869_v45 }
 0x3e2   : > { %v1853_v46 = vpop.trf.xlu0 }
 0x3e3   : > { %v2037_v51 = vcombine.low %v1789_v24, %v1853_v46  ;;  %v2094_v54 = vrot.slane %v2087_v47, %v2960_v15 }
 0x3e4   : > { %v1901_v50 = vpop.trf.xlu1 }
 0x3e5   : > { %v2095_v52 = vcombine.low %v1837_v23, %v1901_v50  ;;  %v2044_v58 = vrot.slane %v2037_v51, %v2960_v15 }
 0x3e6   : > { %v1885_v53 = vpop.trf.xlu0 }
 0x3e7   : > { %v2102_v55 = vrot.slane %v2095_v52, %v2960_v15  ;;  %v2045_v56 = vcombine.low %v1821_v28, %v1885_v53 }
 0x3e8   : > { %v1933_v4 = vpop.trf.xlu1 }
 0x3e9   : > { %v2860_v57 = vpop.eup %2859  ;;  %v2119_v59 = vcombine.low %v2094_v54, %v2102_v55  ;;  %v2052_v60 = vrot.slane %v2045_v56, %v2960_v15 }
 0x3ea   : > { %v1467_v61 = vsel %vm1436_vm2, %v2860_v57, 0.0  ;;  %v1917_v3 = vpop.trf.xlu0 }
 0x3eb   : > { %v2862_v62 = vpop.eup %2861  ;;  %v2069_v63 = vcombine.low %v2044_v58, %v2052_v60  ;;  %1468 = vadd.xlane.f32.xlu0 %v1467_v61  ;;  %v2126_v37 = vrot.slane %v2119_v59, %v2964_v27 }
 0x3ec   : > { %v1470_v0 = vsel %vm1436_vm2, %v2862_v62, 0.0  ;;  %v1965_v6 = vpop.trf.xlu1 }
 0x3ed   : > { %1471 = vadd.xlane.f32.xlu1 %v1470_v0 }
 0x3ee   : > { %v1949_v5 = vpop.trf.xlu0 }
 0x3f0   : > { %v1997_v8 = vpop.trf.xlu1 }
 0x3f1   : > { %v2103_v21 = vcombine.low %v1933_v4, %v1997_v8 }
 0x3f2   : > { %v1981_v7 = vpop.trf.xlu0 }
 0x3f3   : > { %v2053_v38 = vcombine.low %v1917_v3, %v1981_v7  ;;  %v2110_v31 = vrot.slane %v2103_v21, %v2960_v15 }
 0x3f5   : > { %v2060_v25 = vrot.slane %v2053_v38, %v2960_v15 }
 0x418   : > { %2005 = vxpose.xlu0.c.b16.start.end [1/1] (short) (narrow) %v1712_v1, 16 }
 0x41a   : > { %2021 = vxpose.xlu1.c.b16.start.end [1/1] (short) (narrow) %v1780_v2, 16 }
 0x43e   : > { %v1463_v9 = vpop.xlane.xlu0 %1462 }
 0x43f   : > { %2863 = vrcp.f32 %v1463_v9 }
 0x440   : > { %v1466_v10 = vpop.xlane.xlu1 %1465 }
 0x441   : > { %2865 = vrcp.f32 %v1466_v10 }
 0x449   : > { %v2864_v11 = vpop.eup %2863 }
 0x44a   : > { %v1477_v12 = vmul.f32 %v2864_v11, %v2856_v33 }
 0x44b   : > { %v2866_v13 = vpop.eup %2865 }
 0x44c   : > { %v1481_v14 = vpack.c.bf16 %v1477_v12, %v1477_v12  ;;  %v1478_v16 = vmul.f32 %v2866_v13, %v2858_v35  ;;  %v2076_v35 = vrot.slane %v2069_v63, %v2964_v27 }
 0x44e   : > { %v2153_v17 = vsel %vm1436_vm2, %v1481_v14, 0  ;;  %v1482_v39 = vpack.c.bf16 %v1478_v16, %v1478_v16 }
 0x44f   : > { %2796 = vmatpush3.bf16.xpose.msra.mxu0 %v2153_v17 }
 0x450   : > { %v2200_v18 = vsel %vm1436_vm2, %v1482_v39, 0  ;;  %2807 = vmatprep.subr.bf16.mxu0 %v2902_v42 }
 0x451   : > { %2802 = vmatpush3.bf16.xpose.msra.mxu1 %v2200_v18 }
 0x452   : > { %2813 = vmatprep.subr.bf16.mxu1 %v2902_v42 }
 0x478   : > { %v1469_v19 = vpop.xlane.xlu0 %1468 }
 0x479   : > { %2867 = vrcp.f32 %v1469_v19 }
 0x47a   : > { %v1472_v49 = vpop.xlane.xlu1 %1471 }
 0x47b   : > { %2869 = vrcp.f32 %v1472_v49 }
 0x47e   : > { %v2013_v20 = vpop.trf.xlu0 }
 0x47f   : > { %v2061_v22 = vcombine.low %v1949_v5, %v2013_v20 }
 0x480   : > { %v2029_v24 = vpop.trf.xlu1 }
 0x481   : > { %v2068_v26 = vrot.slane %v2061_v22, %v2960_v15  ;;  %v2111_v29 = vcombine.low %v1965_v6, %v2029_v24 }
 0x483   : > { %v2868_v30 = vpop.eup %2867  ;;  %v2077_v32 = vcombine.low %v2060_v25, %v2068_v26  ;;  %v2118_v33 = vrot.slane %v2111_v29, %v2960_v15 }
 0x484   : > { %v1479_v28 = vmul.f32 %v2868_v30, %v2860_v57 }
 0x485   : > { %v2870_v34 = vpop.eup %2869  ;;  %v2084_v36 = vrot.slane %v2077_v32, %v2964_v27  ;;  %v2127_v23 = vcombine.low %v2110_v31, %v2118_v33 }
 0x486   : > { %v1480_v48 = vmul.f32 %v2870_v34, %v2862_v62  ;;  %v1483_v46 = vpack.c.bf16 %v1479_v28, %v1479_v28 }
 0x487   : > { %v2085_v40 = vcombine.low %v2076_v35, %v2084_v36  ;;  %v2086_v41 = vcombine.high %v2076_v35, %v2084_v36  ;;  %v2134_v43 = vrot.slane %v2127_v23, %v2964_v27 }
 0x488   : > { %v1484_v51 = vpack.c.bf16 %v1480_v48, %v1480_v48  ;;  %v2247_v56 = vsel %vm1436_vm2, %v1483_v46, 0 }
 0x489   : > { %v2135_v44 = vcombine.low %v2126_v37, %v2134_v43  ;;  %v2136_v45 = vcombine.high %v2126_v37, %v2134_v43  ;;  %v2140_v47 = vshrl.u32 %v2085_v40, 16  ;;  %v2146_v50 = vshrl.u32 %v2086_v41, 16 }
 0x48a   : > { %v2294_v59 = vsel %vm1436_vm2, %v1484_v51, 0 }
 0x48b   : > { %v2139_v52 = vpack.i.b16 %v2135_v44, %v2085_v40  ;;  %v2141_v53 = vshrl.u32 %v2135_v44, 16  ;;  %v2145_v54 = vpack.i.b16 %v2136_v45, %v2086_v41  ;;  %v2147_v55 = vshrl.u32 %v2136_v45, 16 }
 0x48d   : > { %2798 = vmatmul.mubr.msk.bf16.vlgmr.msra.gmra.mrb[8].mxu0 %vm1436_vm2, %v2139_v52  ;;  %v2142_v57 = vpack.i.b16 %v2141_v53, %v2140_v47  ;;  %v2148_v58 = vpack.i.b16 %v2147_v55, %v2146_v50 }
 0x48e   : > { %2808 = vmatpush3.bf16.xpose.msra.mxu0 %v2247_v56  ;;  %2809 = vmatprep.mubr.msk.bf16.mxu0 %vm2903_vm0, %v2902_v42 }
 0x48f   : > { %2804 = vmatmul.mubr.msk.bf16.vlgmr.msra.gmra.mrb[8].mxu1 %vm1436_vm2, %v2142_v57 }
 0x490   : > { %2814 = vmatpush3.bf16.xpose.msra.mxu1 %v2294_v59  ;;  %2815 = vmatprep.mubr.msk.bf16.mxu1 %vm2903_vm0, %v2902_v42 }
 0x495   : > { %2810 = vmatmul.mubr.msk.bf16.vlgmr.msra.gmra.mrb[12].mxu0 %vm1436_vm2, %v2145_v54 }
 0x497   : > { %2816 = vmatmul.mubr.msk.bf16.vlgmr.msra.gmra.mrb[12].mxu1 %vm1436_vm2, %v2148_v58 }
 0x560   : > { %v2189_v60 = vpop.f32.mrb[8].mxu0 }
 0x561   : > { %2337 = vxpose.xlu0.b32.start [1/2] (short) (narrow) %v2189_v60, 8  ;;  %v2799_v61 = vpop.f32.mrb[9].mxu0 }
 0x562   : > { %v2192_v62 = vpop.f32.mrb[10].mxu0  ;;  %v2236_v63 = vpop.f32.mrb[8].mxu1 }
 0x563   : > { %2369 = vxpose.xlu1.b32.start [1/2] (short) (narrow) %v2236_v63, 8  ;;  %v2800_v0 = vpop.f32.mrb[11].mxu0  ;;  %v2805_v1 = vpop.f32.mrb[9].mxu1 }
 0x564   : > { %v2239_v2 = vpop.f32.mrb[10].mxu1 }
 0x565   : > { %v2806_v3 = vpop.f32.mrb[11].mxu1  ;;  %2338 = vxpose.xlu0.b32.end [2/2] (short) (narrow) %v2192_v62, 8 }
 0x567   : > { %2370 = vxpose.xlu1.b32.end [2/2] (short) (narrow) %v2239_v2, 8 }
 0x568   : > { %v2283_v4 = vpop.f32.mrb[12].mxu0 }
 0x569   : > { %2401 = vxpose.xlu0.b32.start [1/2] (short) (narrow) %v2283_v4, 8  ;;  %v2811_v5 = vpop.f32.mrb[13].mxu0 }
 0x56a   : > { %v2286_v42 = vpop.f32.mrb[14].mxu0  ;;  %v2330_v6 = vpop.f32.mrb[12].mxu1 }
 0x56b   : > { %2433 = vxpose.xlu1.b32.start [1/2] (short) (narrow) %v2330_v6, 8  ;;  %v2812_v7 = vpop.f32.mrb[15].mxu0  ;;  %v2817_v8 = vpop.f32.mrb[13].mxu1 }
 0x56c   : > { %v2333_v9 = vpop.f32.mrb[14].mxu1 }
 0x56d   : > { %v2818_v10 = vpop.f32.mrb[15].mxu1  ;;  %2402 = vxpose.xlu0.b32.end [2/2] (short) (narrow) %v2286_v42, 8 }
 0x56f   : > { %2434 = vxpose.xlu1.b32.end [2/2] (short) (narrow) %v2333_v9, 8 }
 0x5e1   : > { %v2353_v11 = vpop.trf.xlu0 }
 0x5e3   : > { %v2385_v12 = vpop.trf.xlu1 }
 0x5e9   : > { %v2417_v13 = vpop.trf.xlu0 }
 0x5ea   : > { %v2465_v14 = vcombine.low %v2353_v11, %v2417_v13  ;;  %v2466_v16 = vcombine.high %v2353_v11, %v2417_v13 }
 0x5eb   : > { %v2449_v17 = vpop.trf.xlu1 }
 0x5ec   : > { %v2481_v39 = vcombine.low %v2385_v12, %v2449_v17  ;;  %v2482_v18 = vcombine.high %v2385_v12, %v2449_v17  ;;  %v2473_v19 = vrot.slane %v2465_v14, %v2960_v15  ;;  %v2480_v49 = vrot.slane %v2466_v16, %v2960_v15 }
 0x5ee   : > { %v2489_v38 = vrot.slane %v2481_v39, %v2960_v15  ;;  %v2496_v20 = vrot.slane %v2482_v18, %v2960_v15 }
 0x5f0   : > { %v2497_v21 = vcombine.low %v2473_v19, %v2489_v38  ;;  %v2498_v22 = vcombine.high %v2473_v19, %v2489_v38  ;;  %v2513_v24 = vcombine.low %v2480_v49, %v2496_v20  ;;  %v2514_v25 = vcombine.high %v2480_v49, %v2496_v20 }
 0x5f2   : > { %v2505_v26 = vrot.slane %v2497_v21, %v2964_v27  ;;  %v2512_v29 = vrot.slane %v2498_v22, %v2964_v27  ;;  %v2521_v30 = vrot.slane %v2513_v24, %v2964_v27  ;;  %v2528_v31 = vrot.slane %v2514_v25, %v2964_v27 }
 0x5f4   : > { %v2533_v32 = vcombine.low %v2505_v26, %v2512_v29  ;;  %v2749_v33 = vcombine.high %v2505_v26, %v2512_v29  ;;  %v2549_v34 = vcombine.low %v2521_v30, %v2528_v31  ;;  %v2750_v35 = vcombine.high %v2521_v30, %v2528_v31 }
 0x5f6   : > { %v2540_v36 = vrot.slane %v2533_v32, %v2960_v15  ;;  %v2548_v23 = vrot.slane %v2749_v33, %v2960_v15  ;;  %v2556_v28 = vrot.slane %v2549_v34, %v2960_v15  ;;  %v2564_v48 = vrot.slane %v2750_v35, %v2960_v15 }
 0x5f8   : > { %v2566_v37 = vcombine.high %v2540_v36, %v2548_v23  ;;  %v2582_v40 = vcombine.high %v2556_v28, %v2564_v48  ;;  %v2565_v41 = vcombine.low %v2540_v36, %v2548_v23  ;;  %v2581_v43 = vcombine.low %v2556_v28, %v2564_v48 }
 0x5fa   : > { %v2580_v44 = vrot.slane %v2566_v37, %v2964_v27  ;;  %v2596_v45 = vrot.slane %v2582_v40, %v2964_v27  ;;  %v2573_v46 = vrot.slane %v2565_v41, %v2964_v27  ;;  %v2589_v47 = vrot.slane %v2581_v43, %v2964_v27 }
 0x5fc   : > { %v2599_v50 = vcombine.low %v2580_v44, %v2596_v45  ;;  %v2598_v51 = vcombine.high %v2573_v46, %v2589_v47  ;;  %v2597_v52 = vcombine.low %v2573_v46, %v2589_v47  ;;  %v2600_v15 = vcombine.high %v2580_v44, %v2596_v45 }
 0x5fe   : > { %2606 = vrot.lane.b32.xlu1 %v2599_v50, %s2904_s30  ;;  %2602 = vrot.lane.b32.xlu0 %v2598_v51, %s2905_s4 }
 0x602   : > { %2610 = vrot.lane.b32.xlu1 %v2600_v15, %s2906_s5 }
 0x670   : > { %v2607_v53 = vpop.permute.xlu1 %2606  ;;  %v2603_v54 = vpop.permute.xlu0 %2602 }
 0x671   : > { %v2613_v55 = vsel %vm1254_vm1, %v2597_v52, %v2603_v54 }
 0x672   : > { %v2615_v57 = vsel %vm2614_vm3, %v2613_v55, %v2607_v53 }
 0x674   : > { %v2611_v56 = vpop.permute.xlu1 %2610 }
 0x675   : > { %v2617_v27 = vsel %vm2616_vm4, %v2615_v57, %v2611_v56 }
 0x676   : > { %v2618_v58 = vpack.c.bf16 %v2617_v27, %v2617_v27 }
 0x678   : > { %2620 = vst.msk [vmem:[%s250_s9] sm:$0xf] %vm2619_vm5, %v2618_v58 }
 0x679 PF: > { %s13_s14 = sadd.s32 1, %s2893_s14   ;;  %s3210_s12 = smov %s2889_s13 }
 0x67a   : > { %p10_p5 = scmp.ge.s32.totalorder %s13_s14, 4   ;;  %s3211_s13 = smov %s3213_s15 }
 0x67c   :  { %12 = sbr.rel (!%p10_p5) target bundleno = 2 (0x2), region = 68 }

// kernel: transformer_decoder.23
= control target key start
LH: loop header
LB: loop body
LE: loop exit
PB: predicated region body
PF: predicated region fallthrough
CT: control target
= control target key end

     0   :  { %s706_s24 = smov 0   ;;  %s781_s0 = inlined_call_operand.vmem [shape: bf16[16,64], index: 0, kind: input, shape index: {}]   ;;  %s782_s1 = inlined_call_operand.vmem [shape: bf16[64,128], index: 1, kind: input, shape index: {}]   ;;  %s783_s2 = inlined_call_operand.vmem [shape: f32[1,128], index: 2, kind: input, shape index: {}]   ;;  %s784_s3 = inlined_call_operand.vmem [shape: bf16[128,64], index: 3, kind: input, shape index: {}]   ;;  %s785_s4 = inlined_call_operand.vmem [shape: f32[1,64], index: 4, kind: input, shape index: {}]   ;;  %s786_s5 = inlined_call_operand.vmem [shape: f32[1,64], index: 5, kind: input, shape index: {}]   ;;  %s787_s6 = inlined_call_operand.vmem [shape: f32[1,64], index: 6, kind: input, shape index: {}]   ;;  %s788_s7 = inlined_call_operand.vmem [shape: bf16[16,64], index: 7, kind: output, shape index: {}]  }
   0x1 LB: > { %s560_s25 = sadd.s32 4294967295, %s662_s24   ;;  %p564_p0 = scmp.ge.s32.totalorder %s662_s24, 1  ;;  %s662_s24 = sphi %s706_s24, %s17_s24  }
   0x2   : > { %p236_p1 = scmp.lt.s32.totalorder %s662_s24, 3 }
   0x4   : > { %p237_p2 = pnand %p564_p0, %p236_p1 }
   0x5   : > { %v642_v0 = vld [vmem:[%s782_s1] sm:$0xff] (!%p237_p2)   ;;  %v664_v1 = vmov (!%p237_p2), 0.0   ;;  %v643_v2 = vld [vmem:[%s782_s1 + $0x8] sm:$0xff] (!%p237_p2)   ;;  %vm665_vm0 = vmmov (!%p237_p2), 0   ;;  %p266_p3 = scmp.lt.s32.totalorder (!%p237_p2), %s560_s25, 1  ;;  %v644_v4 = vld [vmem:[%s782_s1 + $0x10] sm:$0xff] (!%p237_p2)  }
   0x6   : > { %240 = sbr.rel (%p237_p2) target bundleno = 772 (0x304), region = 48  ;;  %600 = vmatprep.subr.bf16.mxu0 (!%p237_p2), %v664_v1  ;;  %612 = vmatprep.subr.bf16.mxu1 (!%p237_p2), %v664_v1  ;;  %v646_v3 = vld [vmem:[%s784_s3] sm:$0xff] (!%p237_p2)   ;;  %v647_v5 = vld [vmem:[%s784_s3 + $0x8] sm:$0xff] (!%p237_p2)   ;;  %v645_v6 = vld [vmem:[%s782_s1 + $0x18] sm:$0xff] (!%p237_p2)   ;;  %vm315_vm1 = vcmask (!%p237_p2), 523264   ;;  %vm505_vm2 = vcmask (!%p237_p2), 519168  }
   0x7   : > { %601 = vmatpush3.bf16.msra.mxu0 (!%p237_p2), %v642_v0  ;;  %608 = vmatprep.mubr.msk.bf16.mxu0 (!%p237_p2), %vm665_vm0, %v664_v1  ;;  %v648_v7 = vld [vmem:[%s784_s3 + $0x10] sm:$0xff] (!%p237_p2)   ;;  %v649_v9 = vld [vmem:[%s784_s3 + $0x18] sm:$0xff] (!%p237_p2)   ;;  %v650_v10 = vld [vmem:[%s784_s3 + $0x20] sm:$0xff] (!%p237_p2)  }
   0x8   : > { %602 = vmatprep.subr.bf16.mxu0 (!%p237_p2), %v664_v1  ;;  %628 = vmatprep.mubr.msk.bf16.mxu1 (!%p237_p2), %vm665_vm0, %v664_v1  ;;  %v651_v11 = vld [vmem:[%s784_s3 + $0x28] sm:$0xff] (!%p237_p2)   ;;  %v652_v12 = vld [vmem:[%s784_s3 + $0x30] sm:$0xff] (!%p237_p2)   ;;  %v653_v13 = vld [vmem:[%s784_s3 + $0x38] sm:$0xff] (!%p237_p2)  }
   0x9   : > { %613 = vmatpush3.bf16.msra.mxu1 (!%p237_p2), %v646_v3  ;;  %v567_v14 = vld [vmem:[%s783_s2] ss:$0 sm:$0xff] (!%p237_p2) }
   0xa   : > { %614 = vmatprep.subr.bf16.mxu1 (!%p237_p2), %v664_v1  ;;  %v573_v22 = vld [vmem:[%s785_s4] ss:$0 sm:$0xff] (!%p237_p2) }
   0xb   : > { %603 = vmatpush3.bf16.msra.mxu0 (!%p237_p2), %v643_v2  ;;  %v582_v40 = vld [vmem:[%s786_s5] ss:$0 sm:$0xff] (!%p237_p2) }
   0xc   : > { %604 = vmatprep.subr.bf16.mxu0 (!%p237_p2), %v664_v1  ;;  %v583_v42 = vld [vmem:[%s787_s6] ss:$0 sm:$0xff] (!%p237_p2) }
   0xd   : > { %s790_s25 = smov (!%p266_p3, %s560_s25), 1  ;;  %615 = vmatpush3.bf16.msra.mxu1 %v647_v5 }
   0xe   : > { %s565_s13 = sshll.u32 %s790_s25, 2  ;;  %616 = vmatprep.subr.bf16.mxu1 %v664_v1 }
   0xf   : > { %605 = vmatpush3.bf16.msra.mxu0 %v644_v4  ;;  %s269_s20 = scalar_lea.vmem %s781_s0, %s565_s13  ;;  %s273_s21 = scalar_lea.vmem %s788_s7, %s565_s13 }
  0x10   : > { %606 = vmatprep.subr.bf16.mxu0 %v664_v1  ;;  %v275_v8 = vld [vmem:[%s269_s20] sm:$0xf] }
  0x11   : > { %617 = vmatpush3.bf16.msra.mxu1 %v648_v7  ;;  %v472_v23 = vunpack.c.l.bf16 %v275_v8 }
  0x12   : > { %618 = vmatprep.subr.bf16.mxu1 %v664_v1 }
  0x13   : > { %607 = vmatpush3.bf16.msra.mxu0 %v645_v6 }
  0x15   : > { %619 = vmatpush3.bf16.msra.mxu1 %v649_v9 }
  0x16   : > { %609 = vmatmul.mubr.msk.bf16.vlgmr.msra.gmra.mrb[0].mxu0 %vm315_vm1, %v275_v8  ;;  %620 = vmatprep.subr.bf16.mxu1 %v664_v1 }
  0x19   : > { %621 = vmatpush3.bf16.msra.mxu1 %v650_v10 }
  0x1a   : > { %622 = vmatprep.subr.bf16.mxu1 %v664_v1 }
  0x1d   : > { %623 = vmatpush3.bf16.msra.mxu1 %v651_v11 }
  0x1e   : > { %624 = vmatprep.subr.bf16.mxu1 %v664_v1 }
  0x21   : > { %625 = vmatpush3.bf16.msra.mxu1 %v652_v12 }
  0x22   : > { %626 = vmatprep.subr.bf16.mxu1 %v664_v1 }
  0x25   : > { %627 = vmatpush3.bf16.msra.mxu1 %v653_v13 }
  0xe9   : > { %v353_v15 = vpop.f32.mrb[0].mxu0 }
  0xea   : > { %v354_v16 = vadd.f32 %v567_v14, %v353_v15  ;;  %v610_v17 = vpop.f32.mrb[1].mxu0 }
  0xeb   : > { %v356_v18 = vpop.f32.mrb[2].mxu0 }
  0xec   : > { %v359_v19 = vmax.f32 %v354_v16, 0.0  ;;  %v611_v20 = vpop.f32.mrb[3].mxu0 }
  0xee   : > { %v360_v21 = vpack.c.bf16 %v359_v19, %v359_v19 }
  0xf0   : > { %629 = vmatmul.mubr.bf16.vlgmr.msra.gmra.mrb[0].mxu1 %v360_v21 }
 0x1c3   : > { %v466_v24 = vpop.f32.mrb[0].mxu1 }
 0x1c4   : > { %v467_v25 = vadd.f32 %v573_v22, %v466_v24  ;;  %v630_v26 = vpop.f32.mrb[1].mxu1 }
 0x1c5   : > { %v469_v27 = vpop.f32.mrb[2].mxu1 }
 0x1c6   : > { %v631_v28 = vpop.f32.mrb[3].mxu1  ;;  %v473_v29 = vadd.f32 %v472_v23, %v467_v25 }
 0x1c8   : > { %v474_v30 = vsel %vm315_vm1, %v473_v29, 0.0 }
 0x1c9   : > { %475 = vadd.xlane.f32.xlu0 %v474_v30 }
 0x256   : > { %v476_v31 = vpop.xlane.xlu0 %475 }
 0x257   : > { %v478_v32 = vmul.f32 0.015625, %v476_v31 }
 0x259   : > { %v479_v33 = vsub.f32 %v473_v29, %v478_v32 }
 0x25b   : > { %v480_v34 = vmul.f32 %v479_v33, %v479_v33 }
 0x25d   : > { %v481_v35 = vsel %vm315_vm1, %v480_v34, 0.0 }
 0x25e   : > { %482 = vadd.xlane.f32.xlu0 %v481_v35 }
 0x2eb   : > { %v483_v36 = vpop.xlane.xlu0 %482 }
 0x2ec   : > { %v484_v37 = vmul.f32 0.015625, %v483_v36 }
 0x2ee   : > { %v485_v38 = vadd.f32 1e-05, %v484_v37 }
 0x2f0   : > { %654 = vrsqrt.f32 %v485_v38 }
 0x2fa   : > { %v655_v39 = vpop.eup %654 }
 0x2fb   : > { %v487_v41 = vmul.f32 %v655_v39, %v479_v33 }
 0x2fd   : > { %v495_v43 = vmul.f32 %v582_v40, %v487_v41 }
 0x2ff   : > { %v503_v44 = vadd.f32 %v583_v42, %v495_v43 }
 0x301   : > { %v504_v45 = vpack.c.bf16 %v503_v44, %v503_v44 }
 0x303   : > { %506 = vst.msk [vmem:[%s273_s21] sm:$0xf] %vm505_vm2, %v504_v45 }
 0x304 PF: > { %s17_s24 = sadd.s32 1, %s662_s24  }
 0x305   : > { %p14_p4 = scmp.ge.s32.totalorder %s17_s24, 4  }
 0x307   :  { %16 = sbr.rel (!%p14_p4) target bundleno = 1 (0x1), region = 78 }

// kernel: transformer_decoder.21
= control target key start
LH: loop header
LB: loop body
LE: loop exit
PB: predicated region body
PF: predicated region fallthrough
CT: control target
= control target key end

     0   :  { %s3758_s12 = smov 0   ;;  %s3760_s13 = smov 0   ;;  %s4209_s0 = inlined_call_operand.vmem [shape: bf16[2,8,64], index: 0, kind: input, shape index: {}]   ;;  %s4210_s1 = inlined_call_operand.vmem [shape: bf16[2,16,256], index: 1, kind: input, shape index: {}]   ;;  %s4211_s2 = inlined_call_operand.vmem [shape: f32[2,8,16], index: 2, kind: input, shape index: {}]   ;;  %s4212_s3 = inlined_call_operand.vmem [shape: bf16[2,8,64], index: 3, kind: output, shape index: {}]  }
   0x1   :  { %s3762_s14 = smov 0   ;;  %s3764_s15 = smov 0  }
   0x2   :  { %s3766_s16 = smov 0  }
   0x3 LB: > { %s25_s17 = sadd.s32 1, %s3720_s15  ;;  %p67_p1 = scmp.ne.s32.totalorder %s3712_s13, %s3708_s12  ;;  %s3724_s16 = sphi %s3766_s16, %s13_s16   ;;  %s3720_s15 = sphi %s3764_s15, %s4216_s15   ;;  %s3716_s14 = sphi %s3762_s14, %s4215_s14   ;;  %s3712_s13 = sphi %s3760_s13, %s4214_s13   ;;  %s3708_s12 = sphi %s3758_s12, %s4213_s12  }
   0x4   : > { %p27_p0 = scmp.ge.s32.totalorder %s25_s17, 2  ;;  %p68_p2 = scmp.eq.s32.totalorder %s3724_s16, 0 }
   0x5   : > { %s60_s19 = sadd.s32 1, %s3712_s13  ;;  %p3530_p5 = scmp.ge.s32.totalorder %s3724_s16, 2 }
   0x6   : > { %s4218_s17 = smov (%p27_p0, %s25_s17), 0  ;;  %p69_p3 = por %p68_p2, %p67_p1 }
   0x7   : > { %s57_s18 = ssub.s32 %s3720_s15, %s4218_s17  ;;  %149 = sbr.rel (%p3530_p5) target bundleno = 21 (0x15), region = 16 }
   0x8   : > { %p58_p4 = scmp.eq.s32.totalorder %s57_s18, 0 }
   0xa   : > { %s3793_s20 = scalar_select %p58_p4, %s3712_s13, %s60_s19  }
   0xe   : > { %162 = sbr.rel (!%p69_p3) target bundleno = 21 (0x15), region = 24  ;;  %s164_s21 = sand.u32 (%p69_p3), 1, %s3712_s13  }
   0xf   : > { %s3553_s22 = sshll.u32 (%p69_p3), %s3720_s15, 4  ;;  %s3531_s23 = sshll.u32 (%p69_p3), %s164_s21, 3 }
  0x10   : > { %s169_s26 = scalar_lea.vmem (%p69_p3), %s4210_s1, %s3553_s22  ;;  %s166_s27 = scalar_lea.vmem (%p69_p3), [#allocation2], %s3531_s23 }
  0x11   : > { %v185_v0 = vld [vmem:[%s169_s26] sm:$0xf] (%p69_p3)  ;;  %v187_v1 = vld [vmem:[%s169_s26 + $0x8] sm:$0xf] (%p69_p3) }
  0x12   : > { %186 = vst [vmem:[%s166_s27] sm:$0xf] (%p69_p3), %v185_v0  ;;  %188 = vst [vmem:[%s166_s27 + $0x4] sm:$0xf] (%p69_p3), %v187_v1 }
  0x15 PF: > { %p3534_p6 = scmp.ge.s32.totalorder %s3724_s16, 1  ;;  %p224_p7 = scmp.lt.s32.totalorder %s3724_s16, 3 }
  0x17   : > { %p225_p8 = pnand %p3534_p6, %p224_p7 }
  0x18   : > { %s231_s28 = sand.u32 (!%p225_p8), 1, %s3708_s12   ;;  %p270_p9 = scmp.lt.s32.totalorder (!%p225_p8), %s3716_s14, 1  ;;  %v3729_v5 = vmov (!%p225_p8), 1983009808   ;;  %v318_v7 = vlaneseq (!%p225_p8)  ;;  %v3730_v10 = vmov (!%p225_p8), 1934713408  }
  0x19   : > { %228 = sbr.rel (%p225_p8) target bundleno = 1539 (0x603), region = 69  ;;  %s3535_s29 = sshll.u32 (!%p225_p8), %s231_s28, 3  ;;  %v316_v6 = vunpack.c.l.s4 (!%p225_p8), %v3729_v5  ;;  %v333_v11 = vunpack.c.l.s4 (!%p225_p8), %v3730_v10  ;;  %v3731_v50 = vmov (!%p225_p8), 0   ;;  %vm3733_vm0 = vmmov (!%p225_p8), 0  }
  0x1a   : > { %s233_s30 = scalar_lea.vmem (!%p225_p8), [#allocation2], %s3535_s29  ;;  %s3726_s4 = smov (!%p225_p8), 96   ;;  %v319_v13 = vshrl.u32 (!%p225_p8), %v318_v7, 7  ;;  %vm1758_vm1 = vcmask (!%p225_p8), 130048   ;;  %vm3413_vm2 = vcmask (!%p225_p8), 261120   ;;  %vm3415_vm3 = vcmask (!%p225_p8), 392192  }
  0x1b   : > { %v3804_v2 = vld [vmem:[%s233_s30] sm:$0xf] (!%p225_p8)  ;;  %s3727_s5 = smov (!%p225_p8), 112   ;;  %v3810_v3 = vld [vmem:[%s233_s30 + $0x4] sm:$0xf] (!%p225_p8)  ;;  %s3728_s10 = smov (!%p225_p8), 80   ;;  %v317_v12 = vunpack.c.0.s8 (!%p225_p8), %v316_v6  ;;  %v334_v16 = vunpack.c.0.s8 (!%p225_p8), %v333_v11 }
  0x1c   : > { %388 = vrot.lane.b32.xlu1 (!%p225_p8), %v3804_v2, %s3726_s4  ;;  %384 = vrot.lane.b32.xlu0 (!%p225_p8), %v3804_v2, %s3727_s5  ;;  %v399_v20 = vshrl.u32 (!%p225_p8), %v3804_v2, 16  ;;  %v411_v36 = vshrl.u32 (!%p225_p8), %v3810_v3, 16  ;;  %s3734_s11 = smov (!%p225_p8), 64   ;;  %s3735_s22 = smov (!%p225_p8), 32   ;;  %vm3418_vm4 = vcmask (!%p225_p8), 519168  }
  0x1d   : > { %v3842_v19 = vsub.s32 (!%p225_p8), %v317_v12, %v319_v13  ;;  %v3859_v30 = vsub.s32 (!%p225_p8), %v334_v16, %v319_v13  ;;  %s3736_s23 = smov (!%p225_p8), 16   ;;  %s3737_s24 = smov (!%p225_p8), 48  }
  0x20   : > { %s4220_s14 = smov (!%p270_p9, %s3716_s14), 1  ;;  %390 = vrot.lane.b32.xlu1 %v3810_v3, %s3726_s4  ;;  %386 = vrot.lane.b32.xlu0 %v3810_v3, %s3727_s5 }
  0x21   : > { %s3536_s6 = sshll.u32 %s4220_s14, 2  ;;  %s3537_s12 = sshll.u32 %s4220_s14, 3 }
  0x22   : > { %s276_s9 = scalar_lea.vmem %s4209_s0, %s3536_s6  ;;  %s283_s21 = scalar_lea.vmem %s4211_s2, %s3537_s12 }
  0x23   : > { %v3828_v4 = vld [vmem:[%s276_s9] sm:$0xf]  ;;  %s290_s27 = scalar_lea.vmem %s4212_s3, %s3536_s6 }
  0x24   : > { %394 = vrot.lane.b32.xlu1 %v3810_v3, %s3728_s10  ;;  %392 = vrot.lane.b32.xlu0 %v3804_v2, %s3728_s10 }
  0x28   : > { %296 = vrot.lane.b32.xlu1 %v3828_v4, %s3727_s5 }
  0x8e   : > { %v3831_v8 = vpop.permute.xlu1 %388  ;;  %v3833_v9 = vpop.permute.xlu0 %384 }
  0x8f   : > { %v405_v17 = vshrl.u32 %v3831_v8, 16  ;;  %v398_v18 = vpack.i.b16 %v3833_v9, %v3804_v2  ;;  %v400_v21 = vshrl.u32 %v3833_v9, 16 }
  0x91   : > { %v427_v32 = vrot.slane %v398_v18, %v3842_v19  ;;  %v401_v35 = vpack.i.b16 %v400_v21, %v399_v20 }
  0x92   : > { %v3835_v14 = vpop.permute.xlu1 %390  ;;  %v3837_v15 = vpop.permute.xlu0 %386 }
  0x93   : > { %v410_v24 = vpack.i.b16 %v3837_v15, %v3810_v3  ;;  %v417_v28 = vshrl.u32 %v3835_v14, 16  ;;  %v412_v37 = vshrl.u32 %v3837_v15, 16  ;;  %v461_v47 = vrot.slane %v401_v35, %v3842_v19 }
  0x95   : > { %v495_v40 = vrot.slane %v410_v24, %v3842_v19  ;;  %v413_v46 = vpack.i.b16 %v412_v37, %v411_v36 }
  0x96   : > { %v3846_v22 = vpop.permute.xlu1 %394  ;;  %v3848_v23 = vpop.permute.xlu0 %392 }
  0x97   : > { %v416_v25 = vpack.i.b16 %v3846_v22, %v3835_v14  ;;  %v404_v26 = vpack.i.b16 %v3848_v23, %v3831_v8  ;;  %v406_v27 = vshrl.u32 %v3848_v23, 16  ;;  %v418_v29 = vshrl.u32 %v3846_v22, 16 }
  0x98   : > { %v529_v54 = vrot.slane %v413_v46, %v3842_v19 }
  0x99   : > { %v407_v31 = vpack.i.b16 %v406_v27, %v405_v17  ;;  %v435_v33 = vrot.slane %v404_v26, %v3842_v19  ;;  %v503_v34 = vrot.slane %v416_v25, %v3842_v19  ;;  %v419_v41 = vpack.i.b16 %v418_v29, %v417_v28 }
  0x9a   : > { %v3891_v11 = vpop.permute.xlu1 %296 }
  0x9b   : > { %v437_v38 = vcombine.high %v427_v32, %v435_v33  ;;  %v436_v39 = vcombine.low %v427_v32, %v435_v33  ;;  %v504_v44 = vcombine.low %v495_v40, %v503_v34  ;;  %v469_v45 = vrot.slane %v407_v31, %v3842_v19 }
  0x9c   : > { %v505_v48 = vcombine.high %v495_v40, %v503_v34  ;;  %v537_v53 = vrot.slane %v419_v41, %v3842_v19 }
  0x9d   : > { %v451_v42 = vrot.slane %v437_v38, %v3859_v30  ;;  %v444_v43 = vrot.slane %v436_v39, %v3859_v30  ;;  %v512_v49 = vrot.slane %v504_v44, %v3859_v30  ;;  %v471_v52 = vcombine.high %v461_v47, %v469_v45 }
  0x9e   : > { %v519_v55 = vrot.slane %v505_v48, %v3859_v30  ;;  %v538_v57 = vcombine.low %v529_v54, %v537_v53  ;;  %v470_v58 = vcombine.low %v461_v47, %v469_v45  ;;  %v539_v61 = vcombine.high %v529_v54, %v537_v53 }
  0x9f   : > { %858 = vxpose.xlu1.c.b16.start.end [1/1] (short) (narrow) %v451_v42, 16  ;;  %794 = vxpose.xlu0.c.b16.start.end [1/1] (short) (narrow) %v444_v43, 16  ;;  %v452_v51 = vcombine.high %v444_v43, %v3731_v50  ;;  %v485_v56 = vrot.slane %v471_v52, %v3859_v30  ;;  %v453_v63 = vcombine.high %v451_v42, %v3731_v50 }
  0xa0   : > { %v546_v59 = vrot.slane %v538_v57, %v3859_v30  ;;  %v478_v60 = vrot.slane %v470_v58, %v3859_v30  ;;  %v553_v62 = vrot.slane %v539_v61, %v3859_v30  ;;  %v520_v0 = vcombine.high %v512_v49, %v3731_v50 }
  0xa1   : > { %v521_v5 = vcombine.high %v519_v55, %v3731_v50  ;;  %v487_v6 = vcombine.high %v485_v56, %v3731_v50 }
  0xa2   : > { %v486_v1 = vcombine.high %v478_v60, %v3731_v50  ;;  %v554_v7 = vcombine.high %v546_v59, %v3731_v50  ;;  %v555_v10 = vcombine.high %v553_v62, %v3731_v50 }
  0xa3   : > { %922 = vxpose.xlu1.c.b16.start.end [1/1] (short) (narrow) %v512_v49, 16  ;;  %826 = vxpose.xlu0.c.b16.start.end [1/1] (short) (narrow) %v452_v51, 16 }
  0xa7   : > { %986 = vxpose.xlu1.c.b16.start.end [1/1] (short) (narrow) %v519_v55, 16  ;;  %874 = vxpose.xlu0.c.b16.start.end [1/1] (short) (narrow) %v485_v56, 16 }
  0xab   : > { %938 = vxpose.xlu0.c.b16.start.end [1/1] (short) (narrow) %v546_v59, 16  ;;  %810 = vxpose.xlu1.c.b16.start.end [1/1] (short) (narrow) %v478_v60, 16 }
  0xaf   : > { %1002 = vxpose.xlu0.c.b16.start.end [1/1] (short) (narrow) %v553_v62, 16  ;;  %890 = vxpose.xlu1.c.b16.start.end [1/1] (short) (narrow) %v453_v63, 16 }
  0xb3   : > { %954 = vxpose.xlu1.c.b16.start.end [1/1] (short) (narrow) %v520_v0, 16  ;;  %842 = vxpose.xlu0.c.b16.start.end [1/1] (short) (narrow) %v486_v1, 16 }
  0xb7   : > { %1018 = vxpose.xlu1.c.b16.start.end [1/1] (short) (narrow) %v521_v5, 16  ;;  %906 = vxpose.xlu0.c.b16.start.end [1/1] (short) (narrow) %v487_v6, 16 }
  0xbb   : > { %970 = vxpose.xlu0.c.b16.start.end [1/1] (short) (narrow) %v554_v7, 16  ;;  %300 = vrot.lane.b32.xlu1 %v3828_v4, %s3728_s10 }
  0xbf   : > { %1034 = vxpose.xlu0.c.b16.start.end [1/1] (short) (narrow) %v555_v10, 16 }
  0xc8   : > { %298 = vrot.lane.b32.xlu0 %v3828_v4, %s3726_s4 }
 0x105   : > { %v3893_v12 = vpop.trf.xlu1  ;;  %v3895_v13 = vpop.trf.xlu0 }
 0x106   : > { %v1050_v37 = vcombine.low %v3895_v13, %v3893_v12  ;;  %v1051_v51 = vcombine.high %v3895_v13, %v3893_v12 }
 0x108   : > { %v1058_v46 = vrot.slane %v1050_v37, %v3842_v19 }
 0x109   : > { %v930_v16 = vpop.trf.xlu1  ;;  %v3897_v17 = vpop.trf.xlu0 }
 0x10d   : > { %v994_v18 = vpop.trf.xlu1  ;;  %v882_v20 = vpop.trf.xlu0 }
 0x10e   : > { %v1082_v33 = vcombine.low %v930_v16, %v994_v18  ;;  %v1083_v40 = vcombine.high %v930_v16, %v994_v18 }
 0x110   : > { %v1090_v41 = vrot.slane %v1082_v33, %v3842_v19  ;;  %v3911_v52 = vrot.slane %v1083_v40, %v3842_v19 }
 0x111   : > { %v946_v21 = vpop.trf.xlu0  ;;  %v818_v24 = vpop.trf.xlu1 }
 0x112   : > { %v1186_v38 = vcombine.low %v818_v24, %v882_v20  ;;  %v1187_v63 = vcombine.high %v818_v24, %v882_v20 }
 0x114   : > { %v1194_v47 = vrot.slane %v1186_v38, %v3842_v19 }
 0x115   : > { %v1010_v25 = vpop.trf.xlu0  ;;  %v898_v26 = vpop.trf.xlu1 }
 0x116   : > { %v1066_v34 = vcombine.low %v3897_v17, %v898_v26  ;;  %v1218_v42 = vcombine.low %v946_v21, %v1010_v25  ;;  %v1219_v53 = vcombine.high %v946_v21, %v1010_v25  ;;  %v1067_v7 = vcombine.high %v3897_v17, %v898_v26 }
 0x118   : > { %v1074_v43 = vrot.slane %v1066_v34, %v3842_v19  ;;  %v1226_v55 = vrot.slane %v1218_v42, %v3842_v19  ;;  %v1233_v6 = vrot.slane %v1219_v53, %v3842_v19 }
 0x119   : > { %v962_v27 = vpop.trf.xlu1  ;;  %v850_v28 = vpop.trf.xlu0 }
 0x11a   : > { %v1114_v56 = vcombine.low %v1058_v46, %v1074_v43  ;;  %v1115_v10 = vcombine.high %v1058_v46, %v1074_v43 }
 0x11c   : > { %v1122_v13 = vrot.slane %v1114_v56, %v3859_v30  ;;  %v1129_v34 = vrot.slane %v1115_v10, %v3859_v30  ;;  %v3732_v10 = vmov 0.0  }
 0x11d   : > { %v1026_v29 = vpop.trf.xlu1  ;;  %v914_v31 = vpop.trf.xlu0  ;;  %3570 = vmatprep.subr.bf16.mxu0 %v3732_v10  ;;  %3576 = vmatprep.subr.bf16.mxu1 %v3732_v10 }
 0x11e   : > { %v1098_v32 = vcombine.low %v962_v27, %v1026_v29  ;;  %v1202_v35 = vcombine.low %v850_v28, %v914_v31  ;;  %v1099_v59 = vcombine.high %v962_v27, %v1026_v29  ;;  %v1203_v61 = vcombine.high %v850_v28, %v914_v31  ;;  %3572 = vmatprep.mubr.msk.bf16.mxu0 %vm3733_vm0, %v3732_v10 }
 0x11f   : > { %v1201_v31 = vrot.slane %v1187_v63, %v3842_v19  ;;  %3578 = vmatprep.mubr.msk.bf16.mxu1 %vm3733_vm0, %v3732_v10 }
 0x120   : > { %v1106_v39 = vrot.slane %v1098_v32, %v3842_v19  ;;  %v1210_v44 = vrot.slane %v1202_v35, %v3842_v19  ;;  %v1113_v20 = vrot.slane %v1099_v59, %v3842_v19  ;;  %v1217_v24 = vrot.slane %v1203_v61, %v3842_v19 }
 0x121   : > { %v978_v36 = vpop.trf.xlu0  ;;  %v1081_v32 = vrot.slane %v1067_v7, %v3842_v19 }
 0x122   : > { %v1146_v48 = vcombine.low %v1090_v41, %v1106_v39  ;;  %v1250_v57 = vcombine.low %v1194_v47, %v1210_v44  ;;  %v1147_v60 = vcombine.high %v1090_v41, %v1106_v39  ;;  %v1251_v62 = vcombine.high %v1194_v47, %v1210_v44 }
 0x123   : > { %v1065_v39 = vrot.slane %v1051_v51, %v3842_v19  ;;  %v1162_v40 = vcombine.low %v3911_v52, %v1113_v20  ;;  %v1266_v41 = vcombine.low %v1201_v31, %v1217_v24  ;;  %v1267_v63 = vcombine.high %v1201_v31, %v1217_v24 }
 0x124   : > { %v1154_v0 = vrot.slane %v1146_v48, %v3859_v30  ;;  %v1258_v16 = vrot.slane %v1250_v57, %v3859_v30  ;;  %v1161_v25 = vrot.slane %v1147_v60, %v3859_v30  ;;  %v1265_v27 = vrot.slane %v1251_v62, %v3859_v30 }
 0x125   : > { %v1042_v45 = vpop.trf.xlu0  ;;  %v1130_v44 = vcombine.low %v1065_v39, %v1081_v32  ;;  %v1170_v51 = vrot.slane %v1162_v40, %v3859_v30  ;;  %v1163_v62 = vcombine.high %v3911_v52, %v1113_v20  ;;  %v1281_v52 = vrot.slane %v1267_v63, %v3859_v30 }
 0x126   : > { %v1234_v49 = vcombine.low %v978_v36, %v1042_v45  ;;  %v1235_v54 = vcombine.high %v978_v36, %v1042_v45  ;;  %v1179_v17 = vcombine.high %v1122_v13, %v1154_v0  ;;  %v3927_v28 = vcombine.low %v1122_v13, %v1154_v0 }
 0x127   : > { %v1180_v42 = vcombine.low %v1129_v34, %v1161_v25  ;;  %v1181_v53 = vcombine.high %v1129_v34, %v1161_v25  ;;  %v1138_v57 = vrot.slane %v1130_v44, %v3859_v30 }
 0x128   : > { %v1242_v58 = vrot.slane %v1234_v49, %v3842_v19  ;;  %v1249_v12 = vrot.slane %v1235_v54, %v3842_v19  ;;  %v1334_v43 = vshrl.u32 %v1179_v17, 16 }
 0x129   : > { %v1342_v54 = vshrl.u32 %v1180_v42, 16  ;;  %v1182_v0 = vcombine.low %v1138_v57, %v1170_v51 }
 0x12a   : > { %v1282_v1 = vcombine.low %v1226_v55, %v1242_v58  ;;  %v1283_v5 = vcombine.high %v1226_v55, %v1242_v58  ;;  %v1298_v33 = vcombine.low %v1233_v6, %v1249_v12  ;;  %v1274_v55 = vrot.slane %v1266_v41, %v3859_v30 }
 0x12b   : > { %v1299_v56 = vcombine.high %v1233_v6, %v1249_v12  ;;  %v1358_v20 = vshrl.u32 %v1182_v0, 16 }
 0x12c   : > { %v1290_v18 = vrot.slane %v1282_v1, %v3859_v30  ;;  %v1297_v21 = vrot.slane %v1283_v5, %v3859_v30  ;;  %v1306_v45 = vrot.slane %v1298_v33, %v3859_v30  ;;  %v1350_v1 = vshrl.u32 %v1181_v53, 16 }
 0x12d   : > { %v1131_v5 = vcombine.high %v1065_v39, %v1081_v32  ;;  %v1313_v7 = vrot.slane %v1299_v56, %v3859_v30 }
 0x12e   : > { %v1315_v26 = vcombine.high %v1258_v16, %v1290_v18  ;;  %v3929_v29 = vcombine.low %v1258_v16, %v1290_v18  ;;  %v1316_v37 = vcombine.low %v1265_v27, %v1297_v21  ;;  %v1317_v48 = vcombine.high %v1265_v27, %v1297_v21 }
 0x12f   : > { %v1318_v60 = vcombine.low %v1274_v55, %v1306_v45  ;;  %v1319_v13 = vcombine.high %v1274_v55, %v1306_v45  ;;  %v1177_v18 = vrot.slane %v1163_v62, %v3859_v30  ;;  %v1183_v21 = vcombine.high %v1138_v57, %v1170_v51 }
 0x130   : > { %v1332_v35 = vpack.i.b16 %v1315_v26, %v1179_v17  ;;  %v1324_v36 = vpack.i.b16 %v3929_v29, %v3927_v28  ;;  %v1335_v38 = vshrl.u32 %v1315_v26, 16  ;;  %v1340_v46 = vpack.i.b16 %v1316_v37, %v1180_v42 }
 0x131   : > { %v1343_v49 = vshrl.u32 %v1316_v37, 16  ;;  %v1348_v58 = vpack.i.b16 %v1317_v48, %v1181_v53  ;;  %v1351_v61 = vshrl.u32 %v1317_v48, 16  ;;  %v1356_v6 = vpack.i.b16 %v1318_v60, %v1182_v0 }
 0x132   : > { %1418 = vxpose.xlu0.c.b16.start.end [1/1] (short) (narrow) %v1332_v35, 16  ;;  %1386 = vxpose.xlu1.c.b16.start.end [1/1] (short) (narrow) %v1324_v36, 16  ;;  %v1336_v47 = vpack.i.b16 %v1335_v38, %v1334_v43  ;;  %v1359_v16 = vshrl.u32 %v1318_v60, 16  ;;  %v1145_v24 = vrot.slane %v1131_v5, %v3859_v30  ;;  %v1320_v25 = vcombine.low %v1281_v52, %v1313_v7 }
 0x133   : > { %v1344_v59 = vpack.i.b16 %v1343_v49, %v1342_v54  ;;  %v1352_v12 = vpack.i.b16 %v1351_v61, %v1350_v1  ;;  %v1364_v27 = vpack.i.b16 %v1319_v13, %v1183_v21  ;;  %v1367_v26 = vshrl.u32 %v1319_v13, 16 }
 0x134   : > { %v1360_v17 = vpack.i.b16 %v1359_v16, %v1358_v20  ;;  %v1184_v31 = vcombine.low %v1145_v24, %v1177_v18  ;;  %v1366_v32 = vshrl.u32 %v1183_v21, 16  ;;  %v1327_v35 = vshrl.u32 %v3929_v29, 16 }
 0x135   : > { %v1375_v36 = vshrl.u32 %v1320_v25, 16  ;;  %v1321_v37 = vcombine.high %v1281_v52, %v1313_v7  ;;  %v1326_v38 = vshrl.u32 %v3927_v28, 16  ;;  %v1185_v40 = vcombine.high %v1145_v24, %v1177_v18  ;;  %v301_v28 = vpop.permute.xlu1 %300 }
 0x136   : > { %1450 = vxpose.xlu0.c.b16.start.end [1/1] (short) (narrow) %v1340_v46, 16  ;;  %1434 = vxpose.xlu1.c.b16.start.end [1/1] (short) (narrow) %v1336_v47, 16  ;;  %v1372_v33 = vpack.i.b16 %v1320_v25, %v1184_v31  ;;  %v1368_v34 = vpack.i.b16 %v1367_v26, %v1366_v32  ;;  %v1374_v39 = vshrl.u32 %v1184_v31, 16  ;;  %v312_v49 = vshrl.u32 %v301_v28, 16 }
 0x137   : > { %v1328_v41 = vpack.i.b16 %v1327_v35, %v1326_v38  ;;  %v1383_v43 = vshrl.u32 %v1321_v37, 16  ;;  %v1382_v44 = vshrl.u32 %v1185_v40, 16  ;;  %v1380_v45 = vpack.i.b16 %v1321_v37, %v1185_v40 }
 0x138   : > { %v1376_v42 = vpack.i.b16 %v1375_v36, %v1374_v39 }
 0x139   : > { %v1384_v46 = vpack.i.b16 %v1383_v43, %v1382_v44 }
 0x13a   : > { %1482 = vxpose.xlu0.c.b16.start.end [1/1] (short) (narrow) %v1348_v58, 16  ;;  %1466 = vxpose.xlu1.c.b16.start.end [1/1] (short) (narrow) %v1344_v59, 16  ;;  %v299_v29 = vpop.permute.xlu0 %298 }
 0x13b   : > { %v310_v55 = vpack.i.b16 %v301_v28, %v299_v29 }
 0x13d   : > { %v329_v59 = vrot.slane %v310_v55, %v3842_v19 }
 0x13e   : > { %1514 = vxpose.xlu0.c.b16.start.end [1/1] (short) (narrow) %v1356_v6, 16  ;;  %1498 = vxpose.xlu1.c.b16.start.end [1/1] (short) (narrow) %v1352_v12, 16 }
 0x142   : > { %1546 = vxpose.xlu0.c.b16.start.end [1/1] (short) (narrow) %v1364_v27, 16  ;;  %1530 = vxpose.xlu1.c.b16.start.end [1/1] (short) (narrow) %v1360_v17, 16 }
 0x146   : > { %1578 = vxpose.xlu0.c.b16.start.end [1/1] (short) (narrow) %v1372_v33, 16  ;;  %1562 = vxpose.xlu1.c.b16.start.end [1/1] (short) (narrow) %v1368_v34, 16 }
 0x14a   : > { %1402 = vxpose.xlu0.c.b16.start.end [1/1] (short) (narrow) %v1328_v41, 16  ;;  %1594 = vxpose.xlu1.c.b16.start.end [1/1] (short) (narrow) %v1376_v42, 16 }
 0x14e   : > { %1610 = vxpose.xlu0.c.b16.start.end [1/1] (short) (narrow) %v1380_v45, 16  ;;  %1626 = vxpose.xlu1.c.b16.start.end [1/1] (short) (narrow) %v1384_v46, 16 }
 0x152   : > { %558 = vrot.lane.b32.xlu1 %v3810_v3, %s3734_s11  ;;  %v311_v3 = vshrl.u32 %v299_v29, 16 }
 0x154   : > { %v313_v54 = vpack.i.b16 %v312_v49, %v311_v3 }
 0x156   : > { %560 = vrot.lane.b32.xlu1 %v3833_v9, %s3734_s11 }
 0x157   : > { %556 = vrot.lane.b32.xlu0 %v3804_v2, %s3734_s11  ;;  %v305_v2 = vshrl.u32 %v3828_v4, 16 }
 0x15a   : > { %564 = vrot.lane.b32.xlu1 %v3831_v8, %s3734_s11  ;;  %v306_v8 = vshrl.u32 %v3891_v11, 16 }
 0x15b   : > { %562 = vrot.lane.b32.xlu0 %v3837_v15, %s3734_s11 }
 0x15e   : > { %568 = vrot.lane.b32.xlu1 %v3848_v23, %s3734_s11  ;;  %v307_v23 = vpack.i.b16 %v306_v8, %v305_v2 }
 0x15f   : > { %566 = vrot.lane.b32.xlu0 %v3835_v14, %s3734_s11  ;;  %v304_v14 = vpack.i.b16 %v3891_v11, %v3828_v4 }
 0x160   : > { %v355_v58 = vrot.slane %v307_v23, %v3842_v19 }
 0x161   : > { %v321_v60 = vrot.slane %v304_v14, %v3842_v19 }
 0x163   : > { %570 = vrot.lane.b32.xlu0 %v3846_v22, %s3734_s11  ;;  %v363_v22 = vrot.slane %v313_v54, %v3842_v19  ;;  %v330_v1 = vcombine.low %v321_v60, %v329_v59  ;;  %v331_v5 = vcombine.high %v321_v60, %v329_v59 }
 0x165   : > { %v364_v61 = vcombine.low %v355_v58, %v363_v22  ;;  %v365_v62 = vcombine.high %v355_v58, %v363_v22  ;;  %v338_v12 = vrot.slane %v330_v1, %v3859_v30  ;;  %v345_v13 = vrot.slane %v331_v5, %v3859_v30 }
 0x167   : > { %v372_v7 = vrot.slane %v364_v61, %v3859_v30  ;;  %v379_v4 = vrot.slane %v365_v62, %v3859_v30  ;;  %v732_v17 = vcombine.low %v338_v12, %v345_v13  ;;  %v3539_v26 = vcombine.high %v338_v12, %v345_v13 }
 0x169   : > { %v757_v18 = vcombine.low %v372_v7, %v379_v4  ;;  %v3540_v52 = vcombine.high %v372_v7, %v379_v4  ;;  %v739_v43 = vrot.slane %v732_v17, %v3842_v19  ;;  %v747_v44 = vrot.slane %v3539_v26, %v3842_v19 }
 0x16b   : > { %v764_v35 = vrot.slane %v757_v18, %v3842_v19  ;;  %v772_v36 = vrot.slane %v3540_v52, %v3842_v19 }
 0x16d   : > { %v773_v49 = vcombine.low %v764_v35, %v772_v36 }
 0x198   : > { %v1394_v47 = vpop.trf.xlu1  ;;  %v1426_v48 = vpop.trf.xlu0 }
 0x19c   : > { %v1442_v53 = vpop.trf.xlu1  ;;  %v1458_v9 = vpop.trf.xlu0 }
 0x19d   : > { %v1642_v21 = vcombine.low %v1394_v47, %v1458_v9  ;;  %v748_v9 = vcombine.low %v739_v43, %v747_v44 }
 0x19f   : > { %v1649_v37 = vrot.slane %v1642_v21, %v3842_v19 }
 0x1a0   : > { %v1474_v15 = vpop.trf.xlu1  ;;  %v1490_v51 = vpop.trf.xlu0 }
 0x1a1   : > { %v1650_v16 = vcombine.low %v1426_v48, %v1490_v51  ;;  %v780_v51 = vrot.slane %v773_v49, %v3859_v30 }
 0x1a3   : > { %v1657_v31 = vrot.slane %v1650_v16, %v3842_v19  ;;  %v786_v60 = vshrl.u32 %v780_v51, 16 }
 0x1a4   : > { %v1506_v56 = vpop.trf.xlu1  ;;  %v1522_v57 = vpop.trf.xlu0 }
 0x1a5   : > { %v1700_v25 = vcombine.low %v1442_v53, %v1506_v56  ;;  %v1674_v45 = vcombine.low %v1649_v37, %v1657_v31  ;;  %v755_v56 = vrot.slane %v748_v9, %v3859_v30 }
 0x1a7   : > { %v1707_v40 = vrot.slane %v1700_v25, %v3842_v19  ;;  %v1681_v2 = vrot.slane %v1674_v45, %v3859_v30  ;;  %v785_v1 = vshrl.u32 %v755_v56, 16  ;;  %v756_v12 = vcombine.high %v755_v56, %v3731_v50 }
 0x1a8   : > { %v1538_v63 = vpop.trf.xlu1  ;;  %v1554_v0 = vpop.trf.xlu0 }
 0x1a9   : > { %v787_v4 = vpack.i.b16 %v786_v60, %v785_v1  ;;  %v791_v21 = vshrl.u32 %v756_v12, 16 }
 0x1ac   : > { %v1570_v11 = vpop.trf.xlu1  ;;  %v1586_v6 = vpop.trf.xlu0 }
 0x1ad   : > { %v1658_v32 = vcombine.low %v1522_v57, %v1586_v6 }
 0x1af   : > { %v1665_v46 = vrot.slane %v1658_v32, %v3842_v19 }
 0x1b0   : > { %v1602_v20 = vpop.trf.xlu1  ;;  %v1410_v24 = vpop.trf.xlu0 }
 0x1b1   : > { %v1692_v27 = vcombine.low %v1410_v24, %v1474_v15  ;;  %v1708_v33 = vcombine.low %v1538_v63, %v1602_v20 }
 0x1b3   : > { %v1699_v34 = vrot.slane %v1692_v27, %v3842_v19  ;;  %v1715_v28 = vrot.slane %v1708_v33, %v3842_v19 }
 0x1b4   : > { %v1634_v38 = vpop.trf.xlu1  ;;  %v1618_v39 = vpop.trf.xlu0 }
 0x1b5   : > { %v1716_v41 = vcombine.low %v1570_v11, %v1634_v38  ;;  %v1666_v42 = vcombine.low %v1554_v0, %v1618_v39  ;;  %v1724_v29 = vcombine.low %v1699_v34, %v1707_v40  ;;  %v784_v0 = vpack.i.b16 %v780_v51, %v755_v56 }
 0x1b6   : > { %v781_v11 = vcombine.high %v780_v51, %v3731_v50 }
 0x1b7   : > { %v1723_v47 = vrot.slane %v1716_v41, %v3842_v19  ;;  %v1673_v48 = vrot.slane %v1666_v42, %v3842_v19  ;;  %v1731_v54 = vrot.slane %v1724_v29, %v3859_v30 }
 0x1b8   : > { %v792_v16 = vshrl.u32 %v781_v11, 16  ;;  %v790_v52 = vpack.i.b16 %v781_v11, %v756_v12 }
 0x1b9   : > { %v1732_v3 = vcombine.low %v1715_v28, %v1723_v47  ;;  %v1682_v53 = vcombine.low %v1665_v46, %v1673_v48 }
 0x1ba   : > { %v793_v24 = vpack.i.b16 %v792_v16, %v791_v21 }
 0x1bb   : > { %v1689_v8 = vrot.slane %v1682_v53, %v3859_v30  ;;  %v1739_v15 = vrot.slane %v1732_v3, %v3859_v30 }
 0x1bd   : > { %v1690_v23 = vcombine.low %v1681_v2, %v1689_v8  ;;  %v1691_v55 = vcombine.high %v1681_v2, %v1689_v8  ;;  %v1740_v14 = vcombine.low %v1731_v54, %v1739_v15  ;;  %v1741_v22 = vcombine.high %v1731_v54, %v1739_v15 }
 0x1bf   : > { %v1744_v57 = vpack.i.b16 %v1740_v14, %v1690_v23  ;;  %v1746_v58 = vshrl.u32 %v1690_v23, 16  ;;  %v1747_v59 = vshrl.u32 %v1740_v14, 16  ;;  %v1754_v62 = vshrl.u32 %v1691_v55, 16 }
 0x1c0   : > { %v1755_v63 = vshrl.u32 %v1741_v22, 16  ;;  %v1752_v5 = vpack.i.b16 %v1741_v22, %v1691_v55 }
 0x1c1   : > { %3571 = vmatpush3.bf16.msra.mxu0 %v1744_v57  ;;  %v1748_v61 = vpack.i.b16 %v1747_v59, %v1746_v58 }
 0x1c2   : > { %3582 = vmatprep.subr.bf16.mxu0 %v3732_v10  ;;  %v1756_v6 = vpack.i.b16 %v1755_v63, %v1754_v62 }
 0x1c3   : > { %3577 = vmatpush3.bf16.msra.mxu1 %v1748_v61 }
 0x1c4   : > { %v559_v7 = vpop.permute.xlu1 %558  ;;  %3573 = vmatmul.mubr.msk.bf16.vlgmr.msra.gmra.mrb[0].mxu0 %vm1758_vm1, %v784_v0  ;;  %3588 = vmatprep.subr.bf16.mxu1 %v3732_v10 }
 0x1c5   : > { %3583 = vmatpush3.bf16.msra.mxu0 %v1752_v5  ;;  %3584 = vmatprep.mubr.msk.bf16.mxu0 %vm3733_vm0, %v3732_v10  ;;  %v587_v37 = vshrl.u32 %v559_v7, 16 }
 0x1c6   : > { %3579 = vmatmul.mubr.msk.bf16.vlgmr.msra.gmra.mrb[0].mxu1 %vm1758_vm1, %v787_v4  ;;  %3594 = vmatprep.subr.bf16.mxu0 %v3732_v10 }
 0x1c7   : > { %3589 = vmatpush3.bf16.msra.mxu1 %v1756_v6  ;;  %3590 = vmatprep.mubr.msk.bf16.mxu1 %vm3733_vm0, %v3732_v10 }
 0x1c8   : > { %v561_v13 = vpop.permute.xlu1 %560  ;;  %3600 = vmatprep.subr.bf16.mxu1 %v3732_v10 }
 0x1c9   : > { %v557_v18 = vpop.permute.xlu0 %556  ;;  %v576_v25 = vshrl.u32 %v561_v13, 16 }
 0x1ca   : > { %v575_v27 = vshrl.u32 %v557_v18, 16  ;;  %v574_v26 = vpack.i.b16 %v561_v13, %v557_v18 }
 0x1cc   : > { %v565_v20 = vpop.permute.xlu1 %564  ;;  %3585 = vmatmul.mubr.msk.bf16.vlgmr.msra.gmra.mrb[4].mxu0 %vm1758_vm1, %v790_v52  ;;  %v577_v32 = vpack.i.b16 %v576_v25, %v575_v27  ;;  %v603_v39 = vrot.slane %v574_v26, %v3842_v19 }
 0x1cd   : > { %v563_v17 = vpop.permute.xlu0 %562  ;;  %3596 = vmatprep.mubr.msk.bf16.mxu0 %vm3733_vm0, %v3732_v10  ;;  %v581_v33 = vshrl.u32 %v565_v20, 16 }
 0x1ce   : > { %3591 = vmatmul.mubr.msk.bf16.vlgmr.msra.gmra.mrb[4].mxu1 %vm1758_vm1, %v793_v24  ;;  %v588_v38 = vshrl.u32 %v563_v17, 16  ;;  %v586_v42 = vpack.i.b16 %v563_v17, %v559_v7  ;;  %v637_v46 = vrot.slane %v577_v32, %v3842_v19 }
 0x1cf   : > { %3602 = vmatprep.mubr.msk.bf16.mxu1 %vm3733_vm0, %v3732_v10 }
 0x1d0   : > { %v569_v31 = vpop.permute.xlu1 %568  ;;  %v589_v29 = vpack.i.b16 %v588_v38, %v587_v37  ;;  %v671_v2 = vrot.slane %v586_v42, %v3842_v19 }
 0x1d1   : > { %v580_v34 = vpack.i.b16 %v569_v31, %v565_v20  ;;  %v582_v35 = vshrl.u32 %v569_v31, 16  ;;  %v567_v36 = vpop.permute.xlu0 %566 }
 0x1d2   : > { %v593_v47 = vshrl.u32 %v567_v36, 16  ;;  %v705_v51 = vrot.slane %v589_v29, %v3842_v19 }
 0x1d3   : > { %v583_v40 = vpack.i.b16 %v582_v35, %v581_v33  ;;  %v611_v41 = vrot.slane %v580_v34, %v3842_v19 }
 0x1d5   : > { %v612_v43 = vcombine.low %v603_v39, %v611_v41  ;;  %v613_v44 = vcombine.high %v603_v39, %v611_v41  ;;  %v571_v45 = vpop.permute.xlu0 %570  ;;  %v645_v28 = vrot.slane %v583_v40, %v3842_v19 }
 0x1d6   : > { %v592_v48 = vpack.i.b16 %v571_v45, %v567_v36  ;;  %v594_v49 = vshrl.u32 %v571_v45, 16 }
 0x1d7   : > { %v627_v3 = vrot.slane %v613_v44, %v3859_v30  ;;  %v620_v53 = vrot.slane %v612_v43, %v3859_v30  ;;  %v647_v9 = vcombine.high %v637_v46, %v645_v28  ;;  %v646_v59 = vcombine.low %v637_v46, %v645_v28 }
 0x1d8   : > { %v595_v8 = vpack.i.b16 %v594_v49, %v593_v47  ;;  %v679_v54 = vrot.slane %v592_v48, %v3842_v19 }
 0x1d9   : > { %2052 = vxpose.xlu0.c.b16.start.end [1/1] (short) (narrow) %v627_v3, 16  ;;  %1988 = vxpose.xlu1.c.b16.start.end [1/1] (short) (narrow) %v620_v53, 16  ;;  %v661_v55 = vrot.slane %v647_v9, %v3859_v30  ;;  %v654_v62 = vrot.slane %v646_v59, %v3859_v30  ;;  %v628_v0 = vcombine.high %v620_v53, %v3731_v50 }
 0x1da   : > { %v680_v15 = vcombine.low %v671_v2, %v679_v54  ;;  %v713_v23 = vrot.slane %v595_v8, %v3842_v19  ;;  %v681_v56 = vcombine.high %v671_v2, %v679_v54  ;;  %v629_v5 = vcombine.high %v627_v3, %v3731_v50 }
 0x1db   : > { %v662_v63 = vcombine.high %v654_v62, %v3731_v50  ;;  %v663_v1 = vcombine.high %v661_v55, %v3731_v50 }
 0x1dc   : > { %v688_v14 = vrot.slane %v680_v15, %v3859_v30  ;;  %v714_v22 = vcombine.low %v705_v51, %v713_v23  ;;  %v715_v58 = vcombine.high %v705_v51, %v713_v23  ;;  %v695_v60 = vrot.slane %v681_v56, %v3859_v30 }
 0x1dd   : > { %2068 = vxpose.xlu1.c.b16.start.end [1/1] (short) (narrow) %v661_v55, 16 }
 0x1de   : > { %2116 = vxpose.xlu0.c.b16.start.end [1/1] (short) (narrow) %v688_v14, 16  ;;  %v722_v57 = vrot.slane %v714_v22, %v3859_v30  ;;  %v729_v61 = vrot.slane %v715_v58, %v3859_v30  ;;  %v696_v4 = vcombine.high %v688_v14, %v3731_v50  ;;  %v697_v6 = vcombine.high %v695_v60, %v3731_v50 }
 0x1e0   : > { %v730_v7 = vcombine.high %v722_v57, %v3731_v50  ;;  %v731_v11 = vcombine.high %v729_v61, %v3731_v50 }
 0x1e1   : > { %2132 = vxpose.xlu1.c.b16.start.end [1/1] (short) (narrow) %v722_v57, 16 }
 0x1e2   : > { %2180 = vxpose.xlu0.c.b16.start.end [1/1] (short) (narrow) %v695_v60, 16 }
 0x1e5   : > { %2196 = vxpose.xlu1.c.b16.start.end [1/1] (short) (narrow) %v729_v61, 16 }
 0x1e6   : > { %2004 = vxpose.xlu0.c.b16.start.end [1/1] (short) (narrow) %v654_v62, 16 }
 0x1e9   : > { %2036 = vxpose.xlu1.c.b16.start.end [1/1] (short) (narrow) %v662_v63, 16 }
 0x1ea   : > { %2020 = vxpose.xlu0.c.b16.start.end [1/1] (short) (narrow) %v628_v0, 16 }
 0x1ed   : > { %2100 = vxpose.xlu1.c.b16.start.end [1/1] (short) (narrow) %v663_v1, 16 }
 0x1ee   : > { %2084 = vxpose.xlu0.c.b16.start.end [1/1] (short) (narrow) %v629_v5, 16 }
 0x1f1   : > { %2164 = vxpose.xlu1.c.b16.start.end [1/1] (short) (narrow) %v730_v7, 16 }
 0x1f2   : > { %2148 = vxpose.xlu0.c.b16.start.end [1/1] (short) (narrow) %v696_v4, 16 }
 0x1f5   : > { %2228 = vxpose.xlu1.c.b16.start.end [1/1] (short) (narrow) %v731_v11, 16 }
 0x1f6   : > { %2212 = vxpose.xlu0.c.b16.start.end [1/1] (short) (narrow) %v697_v6, 16 }
 0x23f   : > { %v1996_v12 = vpop.trf.xlu1  ;;  %v2060_v13 = vpop.trf.xlu0 }
 0x240   : > { %v2245_v16 = vcombine.high %v1996_v12, %v2060_v13  ;;  %v2244_v34 = vcombine.low %v1996_v12, %v2060_v13 }
 0x242   : > { %v2252_v40 = vrot.slane %v2244_v34, %v3842_v19  ;;  %v2259_v41 = vrot.slane %v2245_v16, %v3842_v19 }
 0x243   : > { %v2076_v18 = vpop.trf.xlu1 }
 0x244   : > { %v2124_v52 = vpop.trf.xlu0 }
 0x247   : > { %v2140_v21 = vpop.trf.xlu1 }
 0x248   : > { %v2188_v20 = vpop.trf.xlu0 }
 0x249   : > { %v2277_v24 = vcombine.high %v2124_v52, %v2188_v20  ;;  %v2276_v46 = vcombine.low %v2124_v52, %v2188_v20 }
 0x24b   : > { %v2204_v25 = vpop.trf.xlu1  ;;  %v2284_v23 = vrot.slane %v2276_v46, %v3842_v19  ;;  %v2291_v55 = vrot.slane %v2277_v24, %v3842_v19 }
 0x24c   : > { %v2413_v27 = vcombine.high %v2140_v21, %v2204_v25  ;;  %v2012_v17 = vpop.trf.xlu0  ;;  %v2412_v28 = vcombine.low %v2140_v21, %v2204_v25 }
 0x24d   : > { %v2381_v26 = vcombine.high %v2012_v17, %v2076_v18  ;;  %v2380_v32 = vcombine.low %v2012_v17, %v2076_v18 }
 0x24e   : > { %v2420_v14 = vrot.slane %v2412_v28, %v3842_v19  ;;  %v2427_v22 = vrot.slane %v2413_v27, %v3842_v19 }
 0x24f   : > { %v2044_v31 = vpop.trf.xlu1  ;;  %v2388_v50 = vrot.slane %v2380_v32, %v3842_v19  ;;  %v2395_v36 = vrot.slane %v2381_v26, %v3842_v19 }
 0x250   : > { %v2028_v33 = vpop.trf.xlu0 }
 0x253   : > { %v2108_v35 = vpop.trf.xlu1 }
 0x254   : > { %v2396_v37 = vcombine.low %v2044_v31, %v2108_v35  ;;  %v2397_v38 = vcombine.high %v2044_v31, %v2108_v35  ;;  %v2092_v39 = vpop.trf.xlu0 }
 0x255   : > { %v2260_v42 = vcombine.low %v2028_v33, %v2092_v39  ;;  %v2261_v43 = vcombine.high %v2028_v33, %v2092_v39 }
 0x256   : > { %v2404_v44 = vrot.slane %v2396_v37, %v3842_v19  ;;  %v2411_v45 = vrot.slane %v2397_v38, %v3842_v19 }
 0x257   : > { %v2268_v29 = vrot.slane %v2260_v42, %v3842_v19  ;;  %v2275_v47 = vrot.slane %v2261_v43, %v3842_v19  ;;  %v2172_v48 = vpop.trf.xlu1 }
 0x258   : > { %v2444_v49 = vcombine.low %v2388_v50, %v2404_v44  ;;  %v2445_v3 = vcombine.high %v2388_v50, %v2404_v44  ;;  %v2460_v53 = vcombine.low %v2395_v36, %v2411_v45  ;;  %v2461_v9 = vcombine.high %v2395_v36, %v2411_v45  ;;  %v2156_v2 = vpop.trf.xlu0 }
 0x259   : > { %v2309_v8 = vcombine.high %v2252_v40, %v2268_v29  ;;  %v2324_v54 = vcombine.low %v2259_v41, %v2275_v47  ;;  %v2325_v15 = vcombine.high %v2259_v41, %v2275_v47  ;;  %v2308_v51 = vcombine.low %v2252_v40, %v2268_v29 }
 0x25a   : > { %v2459_v57 = vrot.slane %v2445_v3, %v3859_v30  ;;  %v2452_v61 = vrot.slane %v2444_v49, %v3859_v30  ;;  %v2468_v0 = vrot.slane %v2460_v53, %v3859_v30  ;;  %v4051_v1 = vrot.slane %v2461_v9, %v3859_v30 }
 0x25b   : > { %v2236_v56 = vpop.trf.xlu1  ;;  %v2323_v5 = vrot.slane %v2309_v8, %v3859_v30  ;;  %v2316_v11 = vrot.slane %v2308_v51, %v3859_v30  ;;  %v2332_v13 = vrot.slane %v2324_v54, %v3859_v30  ;;  %v2339_v16 = vrot.slane %v2325_v15, %v3859_v30 }
 0x25c   : > { %v2428_v58 = vcombine.low %v2172_v48, %v2236_v56  ;;  %v2429_v59 = vcombine.high %v2172_v48, %v2236_v56  ;;  %v2220_v60 = vpop.trf.xlu0 }
 0x25d   : > { %v2292_v62 = vcombine.low %v2156_v2, %v2220_v60  ;;  %v2293_v63 = vcombine.high %v2156_v2, %v2220_v60 }
 0x25e   : > { %v2436_v7 = vrot.slane %v2428_v58, %v3842_v19  ;;  %v2443_v4 = vrot.slane %v2429_v59, %v3842_v19 }
 0x25f   : > { %v2300_v6 = vrot.slane %v2292_v62, %v3842_v19  ;;  %v2307_v12 = vrot.slane %v2293_v63, %v3842_v19 }
 0x260   : > { %v2476_v18 = vcombine.low %v2420_v14, %v2436_v7  ;;  %v2477_v52 = vcombine.high %v2420_v14, %v2436_v7  ;;  %v2492_v21 = vcombine.low %v2427_v22, %v2443_v4  ;;  %v2493_v20 = vcombine.high %v2427_v22, %v2443_v4 }
 0x261   : > { %v2340_v24 = vcombine.low %v2284_v23, %v2300_v6  ;;  %v2341_v25 = vcombine.high %v2284_v23, %v2300_v6  ;;  %v2356_v27 = vcombine.low %v2291_v55, %v2307_v12  ;;  %v2357_v17 = vcombine.high %v2291_v55, %v2307_v12 }
 0x262   : > { %v2491_v26 = vrot.slane %v2477_v52, %v3859_v30  ;;  %v2484_v31 = vrot.slane %v2476_v18, %v3859_v30  ;;  %v2500_v32 = vrot.slane %v2492_v21, %v3859_v30  ;;  %v2507_v33 = vrot.slane %v2493_v20, %v3859_v30 }
 0x263   : > { %v2355_v34 = vrot.slane %v2341_v25, %v3859_v30  ;;  %v2348_v35 = vrot.slane %v2340_v24, %v3859_v30  ;;  %v2364_v50 = vrot.slane %v2356_v27, %v3859_v30  ;;  %v2371_v36 = vrot.slane %v2357_v17, %v3859_v30 }
 0x264   : > { %v2508_v37 = vcombine.low %v2452_v61, %v2484_v31  ;;  %v4069_v38 = vcombine.high %v2452_v61, %v2484_v31  ;;  %v4071_v39 = vcombine.low %v2459_v57, %v2491_v26  ;;  %v4073_v40 = vcombine.high %v2459_v57, %v2491_v26 }
 0x265   : > { %v2372_v41 = vcombine.low %v2316_v11, %v2348_v35  ;;  %v4075_v42 = vcombine.high %v2316_v11, %v2348_v35  ;;  %v4077_v43 = vcombine.low %v2323_v5, %v2355_v34  ;;  %v4079_v44 = vcombine.high %v2323_v5, %v2355_v34 }
 0x266   : > { %v2521_v45 = vshrl.u32 %v2508_v37, 16  ;;  %v2529_v46 = vshrl.u32 %v4069_v38, 16  ;;  %v2537_v28 = vshrl.u32 %v4071_v39, 16  ;;  %v2545_v29 = vshrl.u32 %v4073_v40, 16 }
 0x267   : > { %v2518_v47 = vpack.i.b16 %v2508_v37, %v2372_v41  ;;  %v2520_v48 = vshrl.u32 %v2372_v41, 16  ;;  %v2526_v49 = vpack.i.b16 %v4069_v38, %v4075_v42  ;;  %v2528_v3 = vshrl.u32 %v4075_v42, 16 }
 0x268   : > { %v2534_v53 = vpack.i.b16 %v4071_v39, %v4077_v43  ;;  %v2536_v9 = vshrl.u32 %v4077_v43, 16  ;;  %v2542_v2 = vpack.i.b16 %v4073_v40, %v4079_v44  ;;  %v2544_v8 = vshrl.u32 %v4079_v44, 16 }
 0x269   : > { %2580 = vxpose.xlu0.c.b16.start.end [1/1] (short) (narrow) %v2518_v47, 16  ;;  %v2522_v54 = vpack.i.b16 %v2521_v45, %v2520_v48  ;;  %v2530_v15 = vpack.i.b16 %v2529_v46, %v2528_v3  ;;  %v4093_v51 = vcombine.low %v2332_v13, %v2364_v50  ;;  %v4095_v23 = vcombine.low %v2468_v0, %v2500_v32 }
 0x26a   : > { %v2538_v55 = vpack.i.b16 %v2537_v28, %v2536_v9  ;;  %v4097_v14 = vpack.i.b16 %v2545_v29, %v2544_v8  ;;  %v4099_v22 = vcombine.high %v2332_v13, %v2364_v50  ;;  %v4101_v56 = vcombine.high %v2468_v0, %v2500_v32 }
 0x26b   : > { %2596 = vxpose.xlu1.c.b16.start.end [1/1] (short) (narrow) %v2522_v54, 16  ;;  %v2550_v57 = vpack.i.b16 %v4095_v23, %v4093_v51  ;;  %v2552_v58 = vshrl.u32 %v4093_v51, 16  ;;  %v2553_v59 = vshrl.u32 %v4095_v23, 16  ;;  %v2378_v60 = vcombine.low %v2339_v16, %v2371_v36 }
 0x26c   : > { %v2558_v61 = vpack.i.b16 %v4101_v56, %v4099_v22  ;;  %v2560_v62 = vshrl.u32 %v4099_v22, 16  ;;  %v2561_v63 = vshrl.u32 %v4101_v56, 16  ;;  %v2514_v0 = vcombine.low %v4051_v1, %v2507_v33 }
 0x26d   : > { %v2554_v5 = vpack.i.b16 %v2553_v59, %v2552_v58  ;;  %v2568_v7 = vshrl.u32 %v2378_v60, 16  ;;  %v4112_v4 = vcombine.high %v2339_v16, %v2371_v36  ;;  %v4115_v11 = vcombine.high %v4051_v1, %v2507_v33  ;;  %v1935_v16 = vld [vmem:[%s283_s21] sm:$0xff] }
 0x26e   : > { %v2562_v6 = vpack.i.b16 %v2561_v63, %v2560_v62  ;;  %v2566_v12 = vpack.i.b16 %v2514_v0, %v2378_v60  ;;  %v2569_v13 = vshrl.u32 %v2514_v0, 16 }
 0x26f   : > { %v2574_v18 = vpack.i.b16 %v4115_v11, %v4112_v4  ;;  %v2576_v52 = vshrl.u32 %v4112_v4, 16  ;;  %v2577_v21 = vshrl.u32 %v4115_v11, 16 }
 0x270   : > { %v2570_v20 = vpack.i.b16 %v2569_v13, %v2568_v7 }
 0x271   : > { %v4121_v24 = vpack.i.b16 %v2577_v21, %v2576_v52 }
 0x297   : > { %v1796_v1 = vpop.f32.mrb[0].mxu0 }
 0x298   : > { %v1931_v25 = vmul.f32 0.25, %v1796_v1  ;;  %v3574_v27 = vpop.f32.mrb[1].mxu0 }
 0x299   : > { %v1799_v17 = vpop.f32.mrb[2].mxu0  ;;  %v1839_v26 = vpop.f32.mrb[0].mxu1 }
 0x29a   : > { %v1932_v31 = vmul.f32 0.25, %v1839_v26  ;;  %v3575_v32 = vpop.f32.mrb[3].mxu0  ;;  %v3580_v33 = vpop.f32.mrb[1].mxu1  ;;  %v1936_v34 = vadd.f32 %v1935_v16, %v1931_v25 }
 0x29b   : > { %v1842_v35 = vpop.f32.mrb[2].mxu1 }
 0x29c   : > { %v3581_v50 = vpop.f32.mrb[3].mxu1  ;;  %v1940_v36 = vsel %vm1758_vm1, %v1936_v34, -inf  ;;  %v1937_v37 = vadd.f32 %v1935_v16, %v1932_v31 }
 0x29d   : > { %1941 = vmax.xlane.f32.xlu0 %v1940_v36 }
 0x29e   : > { %v1943_v38 = vsel %vm1758_vm1, %v1937_v37, -inf }
 0x29f   : > { %v1882_v41 = vpop.f32.mrb[4].mxu0  ;;  %1944 = vmax.xlane.f32.xlu1 %v1943_v38 }
 0x2a0   : > { %v3586_v42 = vpop.f32.mrb[5].mxu0  ;;  %v1933_v3 = vmul.f32 0.25, %v1882_v41 }
 0x2a1   : > { %v1885_v45 = vpop.f32.mrb[6].mxu0  ;;  %v1925_v46 = vpop.f32.mrb[4].mxu1 }
 0x2a2   : > { %v3587_v28 = vpop.f32.mrb[7].mxu0  ;;  %v3592_v29 = vpop.f32.mrb[5].mxu1  ;;  %v1934_v9 = vmul.f32 0.25, %v1925_v46  ;;  %v1938_v8 = vadd.f32 %v1935_v16, %v1933_v3 }
 0x2a3   : > { %v1928_v47 = vpop.f32.mrb[6].mxu1 }
 0x2a4   : > { %v3593_v48 = vpop.f32.mrb[7].mxu1  ;;  %v1939_v54 = vadd.f32 %v1935_v16, %v1934_v9  ;;  %v1946_v51 = vsel %vm1758_vm1, %v1938_v8, -inf }
 0x2a6   : > { %v1949_v23 = vsel %vm1758_vm1, %v1939_v54, -inf }
 0x2ca   : > { %2612 = vxpose.xlu0.c.b16.start.end [1/1] (short) (narrow) %v2526_v49, 16 }
 0x2cc   : > { %2628 = vxpose.xlu1.c.b16.start.end [1/1] (short) (narrow) %v2530_v15, 16 }
 0x2cf   : > { %v2588_v49 = vpop.trf.xlu0 }
 0x2d1   : > { %v2604_v15 = vpop.trf.xlu1 }
 0x2d7   : > { %1947 = vmax.xlane.f32.xlu0 %v1946_v51 }
 0x2d9   : > { %1950 = vmax.xlane.f32.xlu1 %v1949_v23 }
 0x304   : > { %2644 = vxpose.xlu0.c.b16.start.end [1/1] (short) (narrow) %v2534_v53, 16 }
 0x306   : > { %2660 = vxpose.xlu1.c.b16.start.end [1/1] (short) (narrow) %v2538_v55, 16 }
 0x308   : > { %2676 = vxpose.xlu0.c.b16.start.end [1/1] (short) (narrow) %v2542_v2, 16 }
 0x30a   : > { %2692 = vxpose.xlu1.c.b16.start.end [1/1] (short) (narrow) %v4097_v14, 16 }
 0x30c   : > { %2708 = vxpose.xlu0.c.b16.start.end [1/1] (short) (narrow) %v2550_v57, 16 }
 0x30e   : > { %2724 = vxpose.xlu1.c.b16.start.end [1/1] (short) (narrow) %v2554_v5, 16 }
 0x310   : > { %2740 = vxpose.xlu0.c.b16.start.end [1/1] (short) (narrow) %v2558_v61, 16 }
 0x312   : > { %2756 = vxpose.xlu1.c.b16.start.end [1/1] (short) (narrow) %v2562_v6, 16 }
 0x314   : > { %2772 = vxpose.xlu0.c.b16.start.end [1/1] (short) (narrow) %v2566_v12, 16 }
 0x316   : > { %2788 = vxpose.xlu1.c.b16.start.end [1/1] (short) (narrow) %v2570_v20, 16 }
 0x32a   : > { %v1942_v22 = vpop.xlane.xlu0 %1941 }
 0x32b   : > { %v1952_v56 = vsub.f32 %v1936_v34, %v1942_v22 }
 0x32c   : > { %v1945_v58 = vpop.xlane.xlu1 %1944 }
 0x32d   : > { %v1956_v39 = vmul.f32 1.442695, %v1952_v56  ;;  %v1953_v43 = vsub.f32 %v1937_v37, %v1945_v58 }
 0x32f   : > { %3670 = vpow2.f32 %v1956_v39  ;;  %v1958_v53 = vmul.f32 1.442695, %v1953_v43 }
 0x330   : > { %v2620_v14 = vpop.trf.xlu0 }
 0x331   : > { %3672 = vpow2.f32 %v1958_v53 }
 0x332   : > { %v2636_v57 = vpop.trf.xlu1 }
 0x339   : > { %v3671_v40 = vpop.eup %3670 }
 0x33a   : > { %v1964_v44 = vsel %vm1758_vm1, %v3671_v40, 0.0 }
 0x33b   : > { %v3673_v2 = vpop.eup %3672  ;;  %1965 = vadd.xlane.f32.xlu0 %v1964_v44 }
 0x33c   : > { %v1967_v55 = vsel %vm1758_vm1, %v3673_v2, 0.0 }
 0x33d   : > { %1968 = vadd.xlane.f32.xlu1 %v1967_v55 }
 0x364   : > { %v1948_v59 = vpop.xlane.xlu0 %1947 }
 0x365   : > { %v1954_v60 = vsub.f32 %v1938_v8, %v1948_v59 }
 0x366   : > { %v1951_v61 = vpop.xlane.xlu1 %1950 }
 0x367   : > { %v1960_v62 = vmul.f32 1.442695, %v1954_v60  ;;  %v1955_v63 = vsub.f32 %v1939_v54, %v1951_v61 }
 0x369   : > { %3674 = vpow2.f32 %v1960_v62  ;;  %v1962_v0 = vmul.f32 1.442695, %v1955_v63 }
 0x36a   : > { %v2652_v5 = vpop.trf.xlu0 }
 0x36b   : > { %3676 = vpow2.f32 %v1962_v0  ;;  %v2836_v6 = vcombine.low %v2588_v49, %v2652_v5 }
 0x36c   : > { %v2668_v7 = vpop.trf.xlu1 }
 0x36d   : > { %v2886_v13 = vcombine.low %v2604_v15, %v2668_v7  ;;  %v2843_v20 = vrot.slane %v2836_v6, %v3842_v19 }
 0x36e   : > { %v2684_v12 = vpop.trf.xlu0 }
 0x36f   : > { %v2844_v52 = vcombine.low %v2620_v14, %v2684_v12  ;;  %v2893_v27 = vrot.slane %v2886_v13, %v3842_v19 }
 0x370   : > { %v2700_v21 = vpop.trf.xlu1 }
 0x371   : > { %v2851_v1 = vrot.slane %v2844_v52, %v3842_v19  ;;  %v2894_v16 = vcombine.low %v2636_v57, %v2700_v21 }
 0x372   : > { %v2716_v35 = vpop.trf.xlu0 }
 0x373   : > { %v3675_v25 = vpop.eup %3674  ;;  %v2868_v17 = vcombine.low %v2843_v20, %v2851_v1  ;;  %v2901_v26 = vrot.slane %v2894_v16, %v3842_v19 }
 0x374   : > { %v1970_v31 = vsel %vm1758_vm1, %v3675_v25, 0.0  ;;  %v2732_v50 = vpop.trf.xlu1 }
 0x375   : > { %v3677_v32 = vpop.eup %3676  ;;  %v2918_v33 = vcombine.low %v2893_v27, %v2901_v26  ;;  %1971 = vadd.xlane.f32.xlu0 %v1970_v31 }
 0x376   : > { %v1973_v34 = vsel %vm1758_vm1, %v3677_v32, 0.0  ;;  %v2748_v36 = vpop.trf.xlu0 }
 0x377   : > { %1974 = vadd.xlane.f32.xlu1 %v1973_v34  ;;  %v2925_v57 = vrot.slane %v2918_v33, %v3859_v30 }
 0x378   : > { %v2764_v37 = vpop.trf.xlu1 }
 0x37a   : > { %v2780_v38 = vpop.trf.xlu0 }
 0x37b   : > { %v2852_v9 = vcombine.low %v2716_v35, %v2780_v38 }
 0x37c   : > { %v2796_v41 = vpop.trf.xlu1 }
 0x37d   : > { %v2902_v54 = vcombine.low %v2732_v50, %v2796_v41  ;;  %v2859_v49 = vrot.slane %v2852_v9, %v3842_v19 }
 0x37f   : > { %v2909_v58 = vrot.slane %v2902_v54, %v3842_v19 }
 0x3a2   : > { %2804 = vxpose.xlu0.c.b16.start.end [1/1] (short) (narrow) %v2574_v18, 16 }
 0x3a4   : > { %2820 = vxpose.xlu1.c.b16.start.end [1/1] (short) (narrow) %v4121_v24, 16 }
 0x3c8   : > { %v1966_v42 = vpop.xlane.xlu0 %1965 }
 0x3c9   : > { %3678 = vrcp.f32 %v1966_v42 }
 0x3ca   : > { %v1969_v45 = vpop.xlane.xlu1 %1968 }
 0x3cb   : > { %3680 = vrcp.f32 %v1969_v45 }
 0x3d3   : > { %v3679_v46 = vpop.eup %3678 }
 0x3d4   : > { %v1980_v28 = vmul.f32 %v3679_v46, %v3671_v40  ;;  %v2875_v40 = vrot.slane %v2868_v17, %v3859_v30 }
 0x3d5   : > { %v3681_v29 = vpop.eup %3680 }
 0x3d6   : > { %v1984_v47 = vpack.c.bf16 %v1980_v28, %v1980_v28  ;;  %v1981_v48 = vmul.f32 %v3681_v29, %v3673_v2 }
 0x3d8   : > { %v2952_v4 = vsel %vm1758_vm1, %v1984_v47, 0  ;;  %v1985_v11 = vpack.c.bf16 %v1981_v48, %v1981_v48 }
 0x3d9   : > { %3595 = vmatpush3.bf16.xpose.msra.mxu0 %v2952_v4 }
 0x3da   : > { %v2999_v18 = vsel %vm1758_vm1, %v1985_v11, 0  ;;  %3606 = vmatprep.subr.bf16.mxu0 %v3732_v10 }
 0x3db   : > { %3601 = vmatpush3.bf16.xpose.msra.mxu1 %v2999_v18 }
 0x3dc   : > { %3612 = vmatprep.subr.bf16.mxu1 %v3732_v10 }
 0x402   : > { %v1972_v24 = vpop.xlane.xlu0 %1971 }
 0x403   : > { %3682 = vrcp.f32 %v1972_v24 }
 0x404   : > { %v1975_v3 = vpop.xlane.xlu1 %1974 }
 0x405   : > { %3684 = vrcp.f32 %v1975_v3 }
 0x408   : > { %v2812_v8 = vpop.trf.xlu0 }
 0x409   : > { %v2860_v51 = vcombine.low %v2748_v36, %v2812_v8 }
 0x40a   : > { %v2828_v23 = vpop.trf.xlu1 }
 0x40b   : > { %v2867_v15 = vrot.slane %v2860_v51, %v3842_v19  ;;  %v2910_v22 = vcombine.low %v2764_v37, %v2828_v23 }
 0x40d   : > { %v3683_v56 = vpop.eup %3682  ;;  %v2876_v39 = vcombine.low %v2859_v49, %v2867_v15  ;;  %v2917_v43 = vrot.slane %v2910_v22, %v3842_v19 }
 0x40e   : > { %v1982_v55 = vmul.f32 %v3683_v56, %v3675_v25 }
 0x40f   : > { %v3685_v53 = vpop.eup %3684  ;;  %v2883_v44 = vrot.slane %v2876_v39, %v3859_v30  ;;  %v2926_v2 = vcombine.low %v2909_v58, %v2917_v43 }
 0x410   : > { %v1983_v14 = vmul.f32 %v3685_v53, %v3677_v32  ;;  %v1986_v0 = vpack.c.bf16 %v1982_v55, %v1982_v55 }
 0x411   : > { %v2884_v59 = vcombine.low %v2875_v40, %v2883_v44  ;;  %v2885_v60 = vcombine.high %v2875_v40, %v2883_v44  ;;  %v2933_v61 = vrot.slane %v2926_v2, %v3859_v30 }
 0x412   : > { %v1987_v6 = vpack.c.bf16 %v1983_v14, %v1983_v14  ;;  %v3046_v20 = vsel %vm1758_vm1, %v1986_v0, 0 }
 0x413   : > { %v2934_v62 = vcombine.low %v2925_v57, %v2933_v61  ;;  %v2935_v63 = vcombine.high %v2925_v57, %v2933_v61  ;;  %v2939_v5 = vshrl.u32 %v2884_v59, 16  ;;  %v2945_v7 = vshrl.u32 %v2885_v60, 16 }
 0x414   : > { %v3093_v25 = vsel %vm1758_vm1, %v1987_v6, 0 }
 0x415   : > { %v2938_v12 = vpack.i.b16 %v2934_v62, %v2884_v59  ;;  %v2940_v13 = vshrl.u32 %v2934_v62, 16  ;;  %v2944_v52 = vpack.i.b16 %v2935_v63, %v2885_v60  ;;  %v2946_v21 = vshrl.u32 %v2935_v63, 16 }
 0x417   : > { %3597 = vmatmul.mubr.msk.bf16.vlgmr.msra.gmra.mrb[8].mxu0 %vm1758_vm1, %v2938_v12  ;;  %v2941_v1 = vpack.i.b16 %v2940_v13, %v2939_v5  ;;  %v2947_v16 = vpack.i.b16 %v2946_v21, %v2945_v7 }
 0x418   : > { %3607 = vmatpush3.bf16.xpose.msra.mxu0 %v3046_v20  ;;  %3608 = vmatprep.mubr.msk.bf16.mxu0 %vm3733_vm0, %v3732_v10 }
 0x419   : > { %3603 = vmatmul.mubr.msk.bf16.vlgmr.msra.gmra.mrb[8].mxu1 %vm1758_vm1, %v2941_v1 }
 0x41a   : > { %3613 = vmatpush3.bf16.xpose.msra.mxu1 %v3093_v25  ;;  %3614 = vmatprep.mubr.msk.bf16.mxu1 %vm3733_vm0, %v3732_v10 }
 0x41f   : > { %3609 = vmatmul.mubr.msk.bf16.vlgmr.msra.gmra.mrb[12].mxu0 %vm1758_vm1, %v2944_v52 }
 0x421   : > { %3615 = vmatmul.mubr.msk.bf16.vlgmr.msra.gmra.mrb[12].mxu1 %vm1758_vm1, %v2947_v16 }
 0x4ea   : > { %v2988_v27 = vpop.f32.mrb[8].mxu0 }
 0x4eb   : > { %3136 = vxpose.xlu0.b32.start [1/2] (short) (narrow) %v2988_v27, 8  ;;  %v3598_v17 = vpop.f32.mrb[9].mxu0 }
 0x4ec   : > { %v2991_v26 = vpop.f32.mrb[10].mxu0  ;;  %v3035_v31 = vpop.f32.mrb[8].mxu1 }
 0x4ed   : > { %3168 = vxpose.xlu1.b32.start [1/2] (short) (narrow) %v3035_v31, 8  ;;  %v3599_v32 = vpop.f32.mrb[11].mxu0  ;;  %v3604_v33 = vpop.f32.mrb[9].mxu1 }
 0x4ee   : > { %v3038_v34 = vpop.f32.mrb[10].mxu1 }
 0x4ef   : > { %v3605_v35 = vpop.f32.mrb[11].mxu1  ;;  %3137 = vxpose.xlu0.b32.end [2/2] (short) (narrow) %v2991_v26, 8 }
 0x4f1   : > { %3169 = vxpose.xlu1.b32.end [2/2] (short) (narrow) %v3038_v34, 8 }
 0x4f2   : > { %v3082_v50 = vpop.f32.mrb[12].mxu0 }
 0x4f3   : > { %3200 = vxpose.xlu0.b32.start [1/2] (short) (narrow) %v3082_v50, 8  ;;  %v3610_v36 = vpop.f32.mrb[13].mxu0 }
 0x4f4   : > { %v3085_v10 = vpop.f32.mrb[14].mxu0  ;;  %v3129_v37 = vpop.f32.mrb[12].mxu1 }
 0x4f5   : > { %3232 = vxpose.xlu1.b32.start [1/2] (short) (narrow) %v3129_v37, 8  ;;  %v3611_v38 = vpop.f32.mrb[15].mxu0  ;;  %v3616_v41 = vpop.f32.mrb[13].mxu1 }
 0x4f6   : > { %v3132_v42 = vpop.f32.mrb[14].mxu1 }
 0x4f7   : > { %v3617_v45 = vpop.f32.mrb[15].mxu1  ;;  %3201 = vxpose.xlu0.b32.end [2/2] (short) (narrow) %v3085_v10, 8 }
 0x4f9   : > { %3233 = vxpose.xlu1.b32.end [2/2] (short) (narrow) %v3132_v42, 8 }
 0x56b   : > { %v3152_v46 = vpop.trf.xlu0 }
 0x56d   : > { %v3184_v28 = vpop.trf.xlu1 }
 0x573   : > { %v3216_v29 = vpop.trf.xlu0 }
 0x574   : > { %v3264_v47 = vcombine.low %v3152_v46, %v3216_v29  ;;  %v3265_v48 = vcombine.high %v3152_v46, %v3216_v29 }
 0x575   : > { %v3248_v4 = vpop.trf.xlu1 }
 0x576   : > { %v3280_v11 = vcombine.low %v3184_v28, %v3248_v4  ;;  %v3281_v18 = vcombine.high %v3184_v28, %v3248_v4  ;;  %v3272_v24 = vrot.slane %v3264_v47, %v3842_v19  ;;  %v3279_v3 = vrot.slane %v3265_v48, %v3842_v19 }
 0x578   : > { %v3288_v9 = vrot.slane %v3280_v11, %v3842_v19  ;;  %v3295_v8 = vrot.slane %v3281_v18, %v3842_v19 }
 0x57a   : > { %v3296_v54 = vcombine.low %v3272_v24, %v3288_v9  ;;  %v3297_v51 = vcombine.high %v3272_v24, %v3288_v9  ;;  %v3312_v23 = vcombine.low %v3279_v3, %v3295_v8  ;;  %v3313_v49 = vcombine.high %v3279_v3, %v3295_v8 }
 0x57c   : > { %v3304_v15 = vrot.slane %v3296_v54, %v3859_v30  ;;  %v3311_v22 = vrot.slane %v3297_v51, %v3859_v30  ;;  %v3320_v56 = vrot.slane %v3312_v23, %v3859_v30  ;;  %v3327_v58 = vrot.slane %v3313_v49, %v3859_v30 }
 0x57e   : > { %v3332_v39 = vcombine.low %v3304_v15, %v3311_v22  ;;  %v3549_v43 = vcombine.high %v3304_v15, %v3311_v22  ;;  %v3348_v53 = vcombine.low %v3320_v56, %v3327_v58  ;;  %v3550_v40 = vcombine.high %v3320_v56, %v3327_v58 }
 0x580   : > { %v3339_v44 = vrot.slane %v3332_v39, %v3842_v19  ;;  %v3347_v2 = vrot.slane %v3549_v43, %v3842_v19  ;;  %v3355_v55 = vrot.slane %v3348_v53, %v3842_v19  ;;  %v3363_v14 = vrot.slane %v3550_v40, %v3842_v19 }
 0x582   : > { %v3365_v57 = vcombine.high %v3339_v44, %v3347_v2  ;;  %v3381_v59 = vcombine.high %v3355_v55, %v3363_v14  ;;  %v3364_v60 = vcombine.low %v3339_v44, %v3347_v2  ;;  %v3380_v61 = vcombine.low %v3355_v55, %v3363_v14 }
 0x584   : > { %v3379_v62 = vrot.slane %v3365_v57, %v3859_v30  ;;  %v3395_v63 = vrot.slane %v3381_v59, %v3859_v30  ;;  %v3372_v0 = vrot.slane %v3364_v60, %v3859_v30  ;;  %v3388_v5 = vrot.slane %v3380_v61, %v3859_v30 }
 0x586   : > { %v3398_v7 = vcombine.low %v3379_v62, %v3395_v63  ;;  %v3397_v6 = vcombine.high %v3372_v0, %v3388_v5  ;;  %v3396_v12 = vcombine.low %v3372_v0, %v3388_v5  ;;  %v3399_v19 = vcombine.high %v3379_v62, %v3395_v63 }
 0x588   : > { %3405 = vrot.lane.b32.xlu1 %v3398_v7, %s3735_s22  ;;  %3401 = vrot.lane.b32.xlu0 %v3397_v6, %s3736_s23 }
 0x58c   : > { %3409 = vrot.lane.b32.xlu1 %v3399_v19, %s3737_s24 }
 0x5fa   : > { %v3406_v13 = vpop.permute.xlu1 %3405  ;;  %v3402_v52 = vpop.permute.xlu0 %3401 }
 0x5fb   : > { %v3412_v21 = vsel %vm1758_vm1, %v3396_v12, %v3402_v52 }
 0x5fc   : > { %v3414_v1 = vsel %vm3413_vm2, %v3412_v21, %v3406_v13 }
 0x5fe   : > { %v3410_v20 = vpop.permute.xlu1 %3409 }
 0x5ff   : > { %v3416_v30 = vsel %vm3415_vm3, %v3414_v1, %v3410_v20 }
 0x600   : > { %v3417_v16 = vpack.c.bf16 %v3416_v30, %v3416_v30 }
 0x602   : > { %3419 = vst.msk [vmem:[%s290_s27] sm:$0xf] %vm3418_vm4, %v3417_v16 }
 0x603 PF: > { %s13_s16 = sadd.s32 1, %s3724_s16   ;;  %s4213_s12 = smov %s3712_s13 }
 0x604   : > { %p10_p10 = scmp.ge.s32.totalorder %s13_s16, 4   ;;  %s4214_s13 = smov %s3793_s20 }
 0x605   : > { %s4215_s14 = smov %s3720_s15  ;;  %s4216_s15 = smov %s4218_s17 }
 0x606   :  { %12 = sbr.rel (!%p10_p10) target bundleno = 3 (0x3), region = 114 }

// kernel: transformer_decoder.31
= control target key start
LH: loop header
LB: loop body
LE: loop exit
PB: predicated region body
PF: predicated region fallthrough
CT: control target
= control target key end

     0   :  { %8 = vsyncpa [#allocation3], 0  ;;  %s734_s0 = inlined_call_operand.vmem [shape: bf16[16,64], index: 0, kind: input, shape index: {}]   ;;  %s735_s1 = inlined_call_operand.vmem [shape: bf16[64,128], index: 1, kind: input, shape index: {}]   ;;  %s736_s2 = inlined_call_operand.vmem [shape: f32[1,128], index: 2, kind: input, shape index: {}]   ;;  %s737_s3 = inlined_call_operand.hbm [shape: f32[16,128], index: 3, kind: output, shape index: {}]  }
   0x1   :  { %10 = vsyncpa [#allocation3 + $0x1], 0  ;;  %s607_s12 = smov 0   ;;  %s609_s13 = smov 0  }
   0x2   :  { %s611_s14 = smov 0   ;;  %s613_s15 = smov 0  }
   0x3   :  { %s615_s16 = smov 0   ;;  %s617_s17 = smov 0  }
   0x4 LB: > { %s407_s18 = sadd.s32 4294967295, %s582_s17   ;;  %s408_s19 = sadd.s32 4294967294, %s582_s17   ;;  %s582_s17 = sphi %s617_s17, %s16_s17   ;;  %s578_s16 = sphi %s615_s16, %s744_s16   ;;  %s574_s15 = sphi %s613_s15, %s743_s15   ;;  %s570_s14 = sphi %s611_s14, %s742_s14   ;;  %s566_s13 = sphi %s609_s13, %s741_s13   ;;  %s562_s12 = sphi %s607_s12, %s740_s12  }
   0x5   : > { %s25_s20 = sadd.s32 1, %s578_s16  ;;  %s115_s21 = sadd.s32 1, %s570_s14 }
   0x6   : > { %p26_p0 = scmp.ge.s32.totalorder %s25_s20, 2  ;;  %p125_p1 = scmp.ne.s32.totalorder %s570_s14, %s566_s13 }
   0x7   : > { %p126_p2 = scmp.eq.s32.totalorder %s407_s18, 1  ;;  %p131_p3 = scmp.ne.s32.totalorder %s566_s13, %s562_s12 }
   0x8   : > { %s746_s20 = smov (%p26_p0, %s25_s20), 0  ;;  %p132_p5 = scmp.eq.s32.totalorder %s408_s19, 1 }
   0x9   : > { %p647_p4 = por %p126_p2, %p125_p1  ;;  %s110_s23 = ssub.s32 %s578_s16, %s746_s20 }
   0xa   : > { %p413_p6 = scmp.ge.s32.totalorder %s582_s17, 1  ;;  %p113_p7 = scmp.eq.s32.totalorder %s110_s23, 0 }
   0xb   : > { %p654_p8 = por %p132_p5, %p131_p3  ;;  %p170_p9 = scmp.lt.s32.totalorder %s582_s17, 3 }
   0xc   : > { %s660_s25 = scalar_select %p113_p7, %s570_s14, %s115_s21  }
   0xd   : > { %p171_p10 = pnand %p413_p6, %p170_p9 }
   0xe   : > { %v500_v0 = vld [vmem:[%s735_s1] sm:$0xff] (!%p171_p10)   ;;  %v584_v1 = vmov (!%p171_p10), 0.0   ;;  %v501_v2 = vld [vmem:[%s735_s1 + $0x8] sm:$0xff] (!%p171_p10)   ;;  %vm585_vm0 = vmmov (!%p171_p10), 0   ;;  %p200_p11 = scmp.lt.s32.totalorder (!%p171_p10), %s574_s15, 1  ;;  %v502_v3 = vld [vmem:[%s735_s1 + $0x10] sm:$0xff] (!%p171_p10)  }
   0xf   : > { %174 = sbr.rel (%p171_p10) target bundleno = 259 (0x103), region = 32  ;;  %431 = vmatprep.subr.bf16.mxu0 (!%p171_p10), %v584_v1  ;;  %439 = vmatprep.mubr.msk.bf16.mxu0 (!%p171_p10), %vm585_vm0, %v584_v1  ;;  %v503_v4 = vld [vmem:[%s735_s1 + $0x18] sm:$0xff] (!%p171_p10)   ;;  %vm252_vm1 = vcmask (!%p171_p10), 523264   ;;  %s197_s18 = sand.u32 (!%p171_p10), 1, %s566_s13   ;;  %v416_v6 = vld [vmem:[%s736_s2] ss:$0 sm:$0xff] (!%p171_p10) }
  0x10   : > { %432 = vmatpush3.bf16.msra.mxu0 (!%p171_p10), %v500_v0  ;;  %s414_s19 = sshll.u32 (!%p171_p10), %s197_s18, 3  ;;  %s423_s26 = sshll.u32 (!%p171_p10), %s574_s15, 7 }
  0x11   : > { %433 = vmatprep.subr.bf16.mxu0 (!%p171_p10), %v584_v1  ;;  %s199_s27 = scalar_lea.vmem (!%p171_p10), [#allocation2], %s414_s19  ;;  %s687_s4 = scalar_lea.hbm (!%p171_p10), %s737_s3, %s423_s26 }
  0x12   : > { %s312_s28 = sshll.u32 (!%p171_p10), %s199_s27, 4  ;;  %s298_s5 = scalar_lea.sflag (!%p171_p10), [#allocation3], %s197_s18  ;;  %s689_s28 = int_to_ptr.vmem [resolvable:$true] %s312_s28 }
  0x14   : > { %434 = vmatpush3.bf16.msra.mxu0 (!%p171_p10), %v501_v2 }
  0x15   : > { %435 = vmatprep.subr.bf16.mxu0 (!%p171_p10), %v584_v1 }
  0x16   : > { %s201_s30 = scalar_select %p200_p11, %s574_s15, 1 }
  0x17   : > { %s504_s15 = scalar_lea.vmem %s689_s28, 128 }
  0x18   : > { %s415_s6 = sshll.u32 %s201_s30, 2  ;;  %436 = vmatpush3.bf16.msra.mxu0 %v502_v3  ;;  %p505_p12 = scmp.ne.s32.totalorder %s689_s28, %s504_s15 }
  0x19   : > { %437 = vmatprep.subr.bf16.mxu0 %v584_v1  ;;  %s203_s11 = scalar_lea.vmem %s734_s0, %s415_s6  ;;  %s586_s6 = smov [#allocation2]  }
  0x1a   : > { %v212_v5 = vld [vmem:[%s203_s11] sm:$0xf]  ;;  %p506_p13 = pnand %p505_p12, %p647_p4  ;;  %s508_s7 = sshll.u32 %s586_s6, 4  ;;  %s509_s7 = int_to_ptr.vmem [resolvable:$false] %s508_s7 }
  0x1b   : > { %s510_s8 = scalar_lea.vmem %s509_s7, 256  ;;  %p511_p1 = scmp.lt.s32.totalorder %s689_s28, %s509_s7 }
  0x1c   : > { %438 = vmatpush3.bf16.msra.mxu0 %v503_v4  ;;  %p507_p0 = pneg %p506_p13  ;;  %p512_p2 = scmp.lt.s32.totalorder %s510_s8, %s504_s15 }
  0x1e   : > { %p513_p3 = por %p512_p2, %p511_p1 }
  0x1f   : > { %440 = vmatmul.mubr.msk.bf16.vlgmr.msra.gmra.mrb[0].mxu0 %vm252_vm1, %v212_v5 }
  0x20   : > { %p514_p5 = pnand %p513_p3, %p507_p0 }
  0xf2   : > { %v290_v7 = vpop.f32.mrb[0].mxu0 }
  0xf3   : > { %v291_v8 = vadd.f32 %v416_v6, %v290_v7  ;;  %v441_v9 = vpop.f32.mrb[1].mxu0 }
  0xf4   : > { %v293_v10 = vpop.f32.mrb[2].mxu0 }
  0xf5   : > { %296 = vst [vmem:[%s199_s27] sm:$0xff] %v291_v8  ;;  %v442_v11 = vpop.f32.mrb[3].mxu0 }
  0xf6   : > { %517 = shalt.err (!%p514_p5)
}
  0xf7   : > { %s518_s9 = scalar_lea.hbm %s687_s4, 128  ;;  %s522_s18 = scalar_lea.hbm %s737_s3, 256 }
  0xf8   : > { %p519_p6 = scmp.ne.s32.totalorder %s687_s4, %s518_s9  ;;  %p523_p10 = scmp.lt.u32.totalorder %s687_s4, %s737_s3 }
  0xf9   : > { %p524_p11 = scmp.lt.u32.totalorder %s522_s18, %s518_s9  ;;  %p526_p13 = scmp.lt.u32.totalorder %s518_s9, %s687_s4 }
  0xfa   : > { %p520_p7 = pnand %p519_p6, %p647_p4 }
  0xfb   : > { %p525_p12 = por %p524_p11, %p523_p10 }
  0xfc   : > { %p521_p9 = pneg %p520_p7 }
  0xfd   : > { %p527_p0 = por %p526_p13, %p525_p12 }
  0xff   : > { %p528_p1 = pnand %p527_p0, %p521_p9 }
 0x101   : > { %531 = shalt.err (!%p528_p1)
}
 0x102   : > { %443 = dma.vmem_to_hbm [thread:$0]  (%p647_p4), %s689_s28, 128, %s687_s4, %s298_s5  }
 0x103 PF: > { %p449_p2 = scmp.ge.s32.totalorder %s582_s17, 2  ;;  %s324_s23 = sand.u32 1, %s562_s12  }
 0x104   : > { %s325_s26 = scalar_lea.sflag [#allocation3], %s324_s23 }
 0x105   : > { %p446_p3 = pnand %p449_p2, %p654_p8 }
 0x107   : > { %557 = dma.done.wait (!%p446_p3), %s325_s26, 128  }
 0x108   : > { %559 = vsyncadd (!%p446_p3), %s325_s26, 4294967168  ;;  %s16_s17 = sadd.s32 1, %s582_s17   ;;  %s740_s12 = smov %s566_s13 }
 0x109   : > { %p13_p5 = scmp.ge.s32.totalorder %s16_s17, 4   ;;  %s741_s13 = smov %s570_s14 }
 0x10a   : > { %s742_s14 = smov %s660_s25  ;;  %s743_s15 = smov %s578_s16 }
 0x10b   : > { %s744_s16 = smov %s746_s20  ;;  %15 = sbr.rel (!%p13_p5) target bundleno = 4 (0x4), region = 73 }
 0x112   :  { %330 = vsyncpa [#allocation3], 1 }
 0x113   :  { %332 = vsyncpa [#allocation3 + $0x1], 1 }

// kernel: transformer_decoder.28
= control target key start
LH: loop header
LB: loop body
LE: loop exit
PB: predicated region body
PF: predicated region fallthrough
CT: control target
= control target key end

     0   :  { %10 = vsyncpa [#allocation4], 0  ;;  %s4459_s0 = inlined_call_operand.vmem [shape: bf16[2,8,64], index: 0, kind: input, shape index: {}]   ;;  %s4460_s1 = inlined_call_operand.vmem [shape: bf16[2,16,256], index: 1, kind: input, shape index: {}]   ;;  %s4461_s2 = inlined_call_operand.vmem [shape: f32[2,8,16], index: 2, kind: input, shape index: {}]   ;;  %s4462_s3 = inlined_call_operand.vmem [shape: bf16[2,8,64], index: 3, kind: output, shape index: {0}]   ;;  %s4463_s4 = inlined_call_operand.hbm [shape: f32[2,4,8,16], index: 4, kind: output, shape index: {1}]  }
   0x1   :  { %12 = vsyncpa [#allocation4 + $0x1], 0  ;;  %s3934_s15 = smov 0   ;;  %s3936_s16 = smov 0  }
   0x2   :  { %s3938_s17 = smov 0   ;;  %s3940_s18 = smov 0  }
   0x3   :  { %s3942_s19 = smov 0   ;;  %s3944_s20 = smov 0  }
   0x4 LB: > { %s3631_s21 = sadd.s32 4294967295, %s3892_s20   ;;  %s3632_s22 = sadd.s32 4294967294, %s3892_s20   ;;  %s3892_s20 = sphi %s3944_s20, %s18_s20   ;;  %s3888_s19 = sphi %s3942_s19, %s4470_s19   ;;  %s3884_s18 = sphi %s3940_s18, %s4469_s18   ;;  %s3880_s17 = sphi %s3938_s17, %s4468_s17   ;;  %s3876_s16 = sphi %s3936_s16, %s4467_s16   ;;  %s3872_s15 = sphi %s3934_s15, %s4466_s15  }
   0x5   : > { %s30_s23 = sadd.s32 1, %s3888_s19  ;;  %s65_s24 = sadd.s32 1, %s3880_s17 }
   0x6   : > { %p32_p0 = scmp.ge.s32.totalorder %s30_s23, 2  ;;  %p72_p1 = scmp.ne.s32.totalorder %s3880_s17, %s3876_s16 }
   0x7   : > { %p73_p2 = scmp.eq.s32.totalorder %s3892_s20, 0  ;;  %p160_p3 = scmp.eq.s32.totalorder %s3631_s21, 1 }
   0x8   : > { %s4472_s23 = smov (%p32_p0, %s30_s23), 0  ;;  %p165_p6 = scmp.ne.s32.totalorder %s3876_s16, %s3872_s15 }
   0x9   : > { %p74_p4 = por %p73_p2, %p72_p1  ;;  %p3973_p5 = por %p160_p3, %p72_p1 }
   0xa   : > { %s62_s26 = ssub.s32 %s3888_s19, %s4472_s23  ;;  %p166_p8 = scmp.eq.s32.totalorder %s3632_s22, 1 }
   0xb   : > { %p63_p7 = scmp.eq.s32.totalorder %s62_s26, 0  ;;  %p3634_p10 = scmp.ge.s32.totalorder %s3892_s20, 2 }
   0xc   : > { %p3984_p9 = por %p166_p8, %p165_p6 }
   0xd   : > { %s3982_s27 = scalar_select %p63_p7, %s3880_s17, %s65_s24  }
   0xe   : > { %182 = sbr.rel (%p3634_p10) target bundleno = 28 (0x1c), region = 16 }
  0x15   : > { %195 = sbr.rel (!%p74_p4) target bundleno = 28 (0x1c), region = 24  ;;  %s197_s29 = sand.u32 (%p74_p4), 1, %s3880_s17  }
  0x16   : > { %s3663_s30 = sshll.u32 (%p74_p4), %s3888_s19, 4  ;;  %s3635_s5 = sshll.u32 (%p74_p4), %s197_s29, 3 }
  0x17   : > { %s3531_s8 = scalar_lea.vmem (%p74_p4), %s4460_s1, %s3663_s30  ;;  %s199_s9 = scalar_lea.vmem (%p74_p4), [#allocation2], %s3635_s5 }
  0x18   : > { %v3638_v0 = vld [vmem:[%s3531_s8 + $0x4] sm:$0xf] (%p74_p4)  ;;  %v3639_v1 = vld [vmem:[%s3531_s8 + $0xc] sm:$0xf] (%p74_p4) }
  0x19   : > { %220 = vst [vmem:[%s199_s9] sm:$0xf] (%p74_p4), %v3638_v0  ;;  %222 = vst [vmem:[%s199_s9 + $0x4] sm:$0xf] (%p74_p4), %v3639_v1 }
  0x1c PF: > { %p3640_p11 = scmp.ge.s32.totalorder %s3892_s20, 1  ;;  %p258_p12 = scmp.lt.s32.totalorder %s3892_s20, 3 }
  0x1e   : > { %p259_p13 = pnand %p3640_p11, %p258_p12 }
  0x1f   : > { %s3999_s10 = sand.u32 (!%p259_p13), 1, %s3876_s16   ;;  %s3894_s13 = smov (!%p259_p13), 96   ;;  %v3897_v5 = vmov (!%p259_p13), 1983009808   ;;  %v359_v7 = vlaneseq (!%p259_p13)  ;;  %v3898_v10 = vmov (!%p259_p13), 1934713408  }
  0x20   : > { %262 = sbr.rel (%p259_p13) target bundleno = 1558 (0x616), region = 69  ;;  %s3641_s11 = sshll.u32 (!%p259_p13), %s3999_s10, 3  ;;  %v357_v6 = vunpack.c.l.s4 (!%p259_p13), %v3897_v5  ;;  %v374_v11 = vunpack.c.l.s4 (!%p259_p13), %v3898_v10  ;;  %v3899_v50 = vmov (!%p259_p13), 0   ;;  %vm3901_vm0 = vmmov (!%p259_p13), 0  }
  0x21   : > { %s267_s12 = scalar_lea.vmem (!%p259_p13), [#allocation2], %s3641_s11  ;;  %s3895_s14 = smov (!%p259_p13), 112   ;;  %v360_v13 = vshrl.u32 (!%p259_p13), %v359_v7, 7  ;;  %vm1799_vm1 = vcmask (!%p259_p13), 130048  }
  0x22   : > { %v4002_v2 = vld [vmem:[%s267_s12] sm:$0xf] (!%p259_p13)  ;;  %p311_p0 = scmp.lt.s32.totalorder (!%p259_p13), %s3884_s18, 1  ;;  %v4008_v3 = vld [vmem:[%s267_s12 + $0x4] sm:$0xf] (!%p259_p13)  ;;  %s3896_s30 = smov (!%p259_p13), 80   ;;  %v358_v12 = vunpack.c.0.s8 (!%p259_p13), %v357_v6  ;;  %v375_v16 = vunpack.c.0.s8 (!%p259_p13), %v374_v11 }
  0x23   : > { %429 = vrot.lane.b32.xlu1 (!%p259_p13), %v4002_v2, %s3894_s13  ;;  %425 = vrot.lane.b32.xlu0 (!%p259_p13), %v4002_v2, %s3895_s14  ;;  %v440_v20 = vshrl.u32 (!%p259_p13), %v4002_v2, 16  ;;  %v452_v36 = vshrl.u32 (!%p259_p13), %v4008_v3, 16  ;;  %s3902_s5 = smov (!%p259_p13), 64   ;;  %s3642_s11 = sshll.u32 (!%p259_p13), %s3999_s10, 5 }
  0x24   : > { %v4040_v19 = vsub.s32 (!%p259_p13), %v358_v12, %v360_v13  ;;  %v4057_v30 = vsub.s32 (!%p259_p13), %v375_v16, %v360_v13  ;;  %s4349_s12 = scalar_lea.vmem (!%p259_p13), [#allocation3], %s3642_s11 }
  0x27   : > { %s4011_s21 = scalar_select %p311_p0, %s3884_s18, 1  ;;  %431 = vrot.lane.b32.xlu1 %v4008_v3, %s3894_s13  ;;  %427 = vrot.lane.b32.xlu0 %v4008_v3, %s3895_s14 }
  0x29   : > { %s3643_s22 = sshll.u32 %s4011_s21, 2  ;;  %s3644_s6 = sshll.u32 %s4011_s21, 3 }
  0x2a   : > { %s317_s29 = scalar_lea.vmem %s4459_s0, %s3643_s22  ;;  %s324_s9 = scalar_lea.vmem %s4461_s2, %s3644_s6 }
  0x2b   : > { %435 = vrot.lane.b32.xlu1 %v4008_v3, %s3896_s30  ;;  %433 = vrot.lane.b32.xlu0 %v4002_v2, %s3896_s30  ;;  %v4026_v4 = vld [vmem:[%s317_s29] sm:$0xf] }
  0x2f   : > { %337 = vrot.lane.b32.xlu1 %v4026_v4, %s3895_s14  ;;  %s3490_s14 = sshll.u32 %s4349_s12, 4  ;;  %s4400_s14 = int_to_ptr.vmem [resolvable:$true] %s3490_s14 }
  0x95   : > { %v4029_v8 = vpop.permute.xlu1 %429  ;;  %v4031_v9 = vpop.permute.xlu0 %425 }
  0x96   : > { %v446_v17 = vshrl.u32 %v4029_v8, 16  ;;  %v439_v18 = vpack.i.b16 %v4031_v9, %v4002_v2  ;;  %v441_v21 = vshrl.u32 %v4031_v9, 16 }
  0x98   : > { %v468_v32 = vrot.slane %v439_v18, %v4040_v19  ;;  %v442_v35 = vpack.i.b16 %v441_v21, %v440_v20 }
  0x99   : > { %v4033_v14 = vpop.permute.xlu1 %431  ;;  %v4035_v15 = vpop.permute.xlu0 %427 }
  0x9a   : > { %v451_v24 = vpack.i.b16 %v4035_v15, %v4008_v3  ;;  %v458_v28 = vshrl.u32 %v4033_v14, 16  ;;  %v453_v37 = vshrl.u32 %v4035_v15, 16  ;;  %v502_v47 = vrot.slane %v442_v35, %v4040_v19 }
  0x9c   : > { %v536_v40 = vrot.slane %v451_v24, %v4040_v19  ;;  %v454_v46 = vpack.i.b16 %v453_v37, %v452_v36 }
  0x9d   : > { %v4044_v22 = vpop.permute.xlu1 %435  ;;  %v4046_v23 = vpop.permute.xlu0 %433 }
  0x9e   : > { %v457_v25 = vpack.i.b16 %v4044_v22, %v4033_v14  ;;  %v445_v26 = vpack.i.b16 %v4046_v23, %v4029_v8  ;;  %v447_v27 = vshrl.u32 %v4046_v23, 16  ;;  %v459_v29 = vshrl.u32 %v4044_v22, 16 }
  0x9f   : > { %v570_v54 = vrot.slane %v454_v46, %v4040_v19 }
  0xa0   : > { %v448_v31 = vpack.i.b16 %v447_v27, %v446_v17  ;;  %v476_v33 = vrot.slane %v445_v26, %v4040_v19  ;;  %v544_v34 = vrot.slane %v457_v25, %v4040_v19  ;;  %v460_v41 = vpack.i.b16 %v459_v29, %v458_v28 }
  0xa1   : > { %v4089_v11 = vpop.permute.xlu1 %337 }
  0xa2   : > { %v478_v38 = vcombine.high %v468_v32, %v476_v33  ;;  %v477_v39 = vcombine.low %v468_v32, %v476_v33  ;;  %v545_v44 = vcombine.low %v536_v40, %v544_v34  ;;  %v510_v45 = vrot.slane %v448_v31, %v4040_v19 }
  0xa3   : > { %v546_v48 = vcombine.high %v536_v40, %v544_v34  ;;  %v578_v53 = vrot.slane %v460_v41, %v4040_v19 }
  0xa4   : > { %v492_v42 = vrot.slane %v478_v38, %v4057_v30  ;;  %v485_v43 = vrot.slane %v477_v39, %v4057_v30  ;;  %v553_v49 = vrot.slane %v545_v44, %v4057_v30  ;;  %v512_v52 = vcombine.high %v502_v47, %v510_v45 }
  0xa5   : > { %v560_v55 = vrot.slane %v546_v48, %v4057_v30  ;;  %v579_v57 = vcombine.low %v570_v54, %v578_v53  ;;  %v511_v58 = vcombine.low %v502_v47, %v510_v45  ;;  %v580_v61 = vcombine.high %v570_v54, %v578_v53 }
  0xa6   : > { %899 = vxpose.xlu1.c.b16.start.end [1/1] (short) (narrow) %v492_v42, 16  ;;  %835 = vxpose.xlu0.c.b16.start.end [1/1] (short) (narrow) %v485_v43, 16  ;;  %v493_v51 = vcombine.high %v485_v43, %v3899_v50  ;;  %v526_v56 = vrot.slane %v512_v52, %v4057_v30  ;;  %v494_v63 = vcombine.high %v492_v42, %v3899_v50 }
  0xa7   : > { %v587_v59 = vrot.slane %v579_v57, %v4057_v30  ;;  %v519_v60 = vrot.slane %v511_v58, %v4057_v30  ;;  %v594_v62 = vrot.slane %v580_v61, %v4057_v30  ;;  %v561_v0 = vcombine.high %v553_v49, %v3899_v50 }
  0xa8   : > { %v562_v5 = vcombine.high %v560_v55, %v3899_v50  ;;  %v528_v6 = vcombine.high %v526_v56, %v3899_v50 }
  0xa9   : > { %v527_v1 = vcombine.high %v519_v60, %v3899_v50  ;;  %v595_v7 = vcombine.high %v587_v59, %v3899_v50  ;;  %v596_v10 = vcombine.high %v594_v62, %v3899_v50 }
  0xaa   : > { %963 = vxpose.xlu1.c.b16.start.end [1/1] (short) (narrow) %v553_v49, 16  ;;  %867 = vxpose.xlu0.c.b16.start.end [1/1] (short) (narrow) %v493_v51, 16 }
  0xae   : > { %1027 = vxpose.xlu1.c.b16.start.end [1/1] (short) (narrow) %v560_v55, 16  ;;  %915 = vxpose.xlu0.c.b16.start.end [1/1] (short) (narrow) %v526_v56, 16 }
  0xb2   : > { %979 = vxpose.xlu0.c.b16.start.end [1/1] (short) (narrow) %v587_v59, 16  ;;  %851 = vxpose.xlu1.c.b16.start.end [1/1] (short) (narrow) %v519_v60, 16 }
  0xb6   : > { %1043 = vxpose.xlu0.c.b16.start.end [1/1] (short) (narrow) %v594_v62, 16  ;;  %931 = vxpose.xlu1.c.b16.start.end [1/1] (short) (narrow) %v494_v63, 16 }
  0xba   : > { %995 = vxpose.xlu1.c.b16.start.end [1/1] (short) (narrow) %v561_v0, 16  ;;  %883 = vxpose.xlu0.c.b16.start.end [1/1] (short) (narrow) %v527_v1, 16 }
  0xbe   : > { %1059 = vxpose.xlu1.c.b16.start.end [1/1] (short) (narrow) %v562_v5, 16  ;;  %947 = vxpose.xlu0.c.b16.start.end [1/1] (short) (narrow) %v528_v6, 16 }
  0xc2   : > { %1011 = vxpose.xlu0.c.b16.start.end [1/1] (short) (narrow) %v595_v7, 16  ;;  %341 = vrot.lane.b32.xlu1 %v4026_v4, %s3896_s30  ;;  %s3814_s30 = scalar_lea.vmem %s4400_s14, 512 }
  0xc3   : > { %p3815_p1 = scmp.ne.s32.totalorder %s4400_s14, %s3814_s30 }
  0xc5   : > { %p3816_p2 = pnand %p3815_p1, %p3973_p5 }
  0xc6   : > { %1075 = vxpose.xlu0.c.b16.start.end [1/1] (short) (narrow) %v596_v10, 16 }
  0xc7   : > { %p3817_p3 = pneg %p3816_p2 }
  0xcf   : > { %339 = vrot.lane.b32.xlu0 %v4026_v4, %s3894_s13  ;;  %s3664_s13 = sshll.u32 %s3884_s18, 9  ;;  %s3473_s18 = scalar_lea.sflag [#allocation4], %s3999_s10 }
  0xd0   : > { %s4398_s29 = scalar_lea.hbm %s4463_s4, %s3664_s13 }
 0x10c   : > { %v4091_v12 = vpop.trf.xlu1  ;;  %v4093_v13 = vpop.trf.xlu0 }
 0x10d   : > { %v1091_v37 = vcombine.low %v4093_v13, %v4091_v12  ;;  %v1092_v51 = vcombine.high %v4093_v13, %v4091_v12 }
 0x10f   : > { %v1099_v46 = vrot.slane %v1091_v37, %v4040_v19 }
 0x110   : > { %v971_v16 = vpop.trf.xlu1  ;;  %v4095_v17 = vpop.trf.xlu0 }
 0x114   : > { %v1035_v18 = vpop.trf.xlu1  ;;  %v923_v20 = vpop.trf.xlu0 }
 0x115   : > { %v1123_v33 = vcombine.low %v971_v16, %v1035_v18  ;;  %v1124_v40 = vcombine.high %v971_v16, %v1035_v18 }
 0x117   : > { %v1131_v41 = vrot.slane %v1123_v33, %v4040_v19  ;;  %v4109_v52 = vrot.slane %v1124_v40, %v4040_v19 }
 0x118   : > { %v987_v21 = vpop.trf.xlu0  ;;  %v859_v24 = vpop.trf.xlu1 }
 0x119   : > { %v1227_v38 = vcombine.low %v859_v24, %v923_v20  ;;  %v1228_v63 = vcombine.high %v859_v24, %v923_v20 }
 0x11b   : > { %v1235_v47 = vrot.slane %v1227_v38, %v4040_v19 }
 0x11c   : > { %v1051_v25 = vpop.trf.xlu0  ;;  %v939_v26 = vpop.trf.xlu1 }
 0x11d   : > { %v1107_v34 = vcombine.low %v4095_v17, %v939_v26  ;;  %v1259_v42 = vcombine.low %v987_v21, %v1051_v25  ;;  %v1260_v53 = vcombine.high %v987_v21, %v1051_v25  ;;  %v1108_v7 = vcombine.high %v4095_v17, %v939_v26 }
 0x11f   : > { %v1115_v43 = vrot.slane %v1107_v34, %v4040_v19  ;;  %v1267_v55 = vrot.slane %v1259_v42, %v4040_v19  ;;  %v1274_v6 = vrot.slane %v1260_v53, %v4040_v19 }
 0x120   : > { %v1003_v27 = vpop.trf.xlu1  ;;  %v891_v28 = vpop.trf.xlu0 }
 0x121   : > { %v1155_v56 = vcombine.low %v1099_v46, %v1115_v43  ;;  %v1156_v10 = vcombine.high %v1099_v46, %v1115_v43 }
 0x123   : > { %v1163_v13 = vrot.slane %v1155_v56, %v4057_v30  ;;  %v1170_v34 = vrot.slane %v1156_v10, %v4057_v30  ;;  %v3900_v10 = vmov 0.0  }
 0x124   : > { %v1067_v29 = vpop.trf.xlu1  ;;  %v955_v31 = vpop.trf.xlu0  ;;  %3681 = vmatprep.subr.bf16.mxu0 %v3900_v10  ;;  %3687 = vmatprep.subr.bf16.mxu1 %v3900_v10 }
 0x125   : > { %v1139_v32 = vcombine.low %v1003_v27, %v1067_v29  ;;  %v1243_v35 = vcombine.low %v891_v28, %v955_v31  ;;  %v1140_v59 = vcombine.high %v1003_v27, %v1067_v29  ;;  %v1244_v61 = vcombine.high %v891_v28, %v955_v31  ;;  %3683 = vmatprep.mubr.msk.bf16.mxu0 %vm3901_vm0, %v3900_v10 }
 0x126   : > { %v1242_v31 = vrot.slane %v1228_v63, %v4040_v19  ;;  %3689 = vmatprep.mubr.msk.bf16.mxu1 %vm3901_vm0, %v3900_v10 }
 0x127   : > { %v1147_v39 = vrot.slane %v1139_v32, %v4040_v19  ;;  %v1251_v44 = vrot.slane %v1243_v35, %v4040_v19  ;;  %v1154_v20 = vrot.slane %v1140_v59, %v4040_v19  ;;  %v1258_v24 = vrot.slane %v1244_v61, %v4040_v19 }
 0x128   : > { %v1019_v36 = vpop.trf.xlu0  ;;  %v1122_v32 = vrot.slane %v1108_v7, %v4040_v19 }
 0x129   : > { %v1187_v48 = vcombine.low %v1131_v41, %v1147_v39  ;;  %v1291_v57 = vcombine.low %v1235_v47, %v1251_v44  ;;  %v1188_v60 = vcombine.high %v1131_v41, %v1147_v39  ;;  %v1292_v62 = vcombine.high %v1235_v47, %v1251_v44 }
 0x12a   : > { %v1106_v39 = vrot.slane %v1092_v51, %v4040_v19  ;;  %v1203_v40 = vcombine.low %v4109_v52, %v1154_v20  ;;  %v1307_v41 = vcombine.low %v1242_v31, %v1258_v24  ;;  %v1308_v63 = vcombine.high %v1242_v31, %v1258_v24 }
 0x12b   : > { %v1195_v0 = vrot.slane %v1187_v48, %v4057_v30  ;;  %v1299_v16 = vrot.slane %v1291_v57, %v4057_v30  ;;  %v1202_v25 = vrot.slane %v1188_v60, %v4057_v30  ;;  %v1306_v27 = vrot.slane %v1292_v62, %v4057_v30 }
 0x12c   : > { %v1083_v45 = vpop.trf.xlu0  ;;  %v1171_v44 = vcombine.low %v1106_v39, %v1122_v32  ;;  %v1211_v51 = vrot.slane %v1203_v40, %v4057_v30  ;;  %v1204_v62 = vcombine.high %v4109_v52, %v1154_v20  ;;  %v1322_v52 = vrot.slane %v1308_v63, %v4057_v30 }
 0x12d   : > { %v1275_v49 = vcombine.low %v1019_v36, %v1083_v45  ;;  %v1276_v54 = vcombine.high %v1019_v36, %v1083_v45  ;;  %v1220_v17 = vcombine.high %v1163_v13, %v1195_v0  ;;  %v4125_v28 = vcombine.low %v1163_v13, %v1195_v0 }
 0x12e   : > { %v1221_v42 = vcombine.low %v1170_v34, %v1202_v25  ;;  %v1222_v53 = vcombine.high %v1170_v34, %v1202_v25  ;;  %v1179_v57 = vrot.slane %v1171_v44, %v4057_v30 }
 0x12f   : > { %v1283_v58 = vrot.slane %v1275_v49, %v4040_v19  ;;  %v1290_v12 = vrot.slane %v1276_v54, %v4040_v19  ;;  %v1375_v43 = vshrl.u32 %v1220_v17, 16 }
 0x130   : > { %v1383_v54 = vshrl.u32 %v1221_v42, 16  ;;  %v1223_v0 = vcombine.low %v1179_v57, %v1211_v51 }
 0x131   : > { %v1323_v1 = vcombine.low %v1267_v55, %v1283_v58  ;;  %v1324_v5 = vcombine.high %v1267_v55, %v1283_v58  ;;  %v1339_v33 = vcombine.low %v1274_v6, %v1290_v12  ;;  %v1315_v55 = vrot.slane %v1307_v41, %v4057_v30 }
 0x132   : > { %v1340_v56 = vcombine.high %v1274_v6, %v1290_v12  ;;  %v1399_v20 = vshrl.u32 %v1223_v0, 16 }
 0x133   : > { %v1331_v18 = vrot.slane %v1323_v1, %v4057_v30  ;;  %v1338_v21 = vrot.slane %v1324_v5, %v4057_v30  ;;  %v1347_v45 = vrot.slane %v1339_v33, %v4057_v30  ;;  %v1391_v1 = vshrl.u32 %v1222_v53, 16 }
 0x134   : > { %v1172_v5 = vcombine.high %v1106_v39, %v1122_v32  ;;  %v1354_v7 = vrot.slane %v1340_v56, %v4057_v30 }
 0x135   : > { %v1356_v26 = vcombine.high %v1299_v16, %v1331_v18  ;;  %v4127_v29 = vcombine.low %v1299_v16, %v1331_v18  ;;  %v1357_v37 = vcombine.low %v1306_v27, %v1338_v21  ;;  %v1358_v48 = vcombine.high %v1306_v27, %v1338_v21 }
 0x136   : > { %v1359_v60 = vcombine.low %v1315_v55, %v1347_v45  ;;  %v1360_v13 = vcombine.high %v1315_v55, %v1347_v45  ;;  %v1218_v18 = vrot.slane %v1204_v62, %v4057_v30  ;;  %v1224_v21 = vcombine.high %v1179_v57, %v1211_v51 }
 0x137   : > { %v1373_v35 = vpack.i.b16 %v1356_v26, %v1220_v17  ;;  %v1365_v36 = vpack.i.b16 %v4127_v29, %v4125_v28  ;;  %v1376_v38 = vshrl.u32 %v1356_v26, 16  ;;  %v1381_v46 = vpack.i.b16 %v1357_v37, %v1221_v42 }
 0x138   : > { %v1384_v49 = vshrl.u32 %v1357_v37, 16  ;;  %v1389_v58 = vpack.i.b16 %v1358_v48, %v1222_v53  ;;  %v1392_v61 = vshrl.u32 %v1358_v48, 16  ;;  %v1397_v6 = vpack.i.b16 %v1359_v60, %v1223_v0 }
 0x139   : > { %1459 = vxpose.xlu0.c.b16.start.end [1/1] (short) (narrow) %v1373_v35, 16  ;;  %1427 = vxpose.xlu1.c.b16.start.end [1/1] (short) (narrow) %v1365_v36, 16  ;;  %v1377_v47 = vpack.i.b16 %v1376_v38, %v1375_v43  ;;  %v1400_v16 = vshrl.u32 %v1359_v60, 16  ;;  %v1186_v24 = vrot.slane %v1172_v5, %v4057_v30  ;;  %v1361_v25 = vcombine.low %v1322_v52, %v1354_v7 }
 0x13a   : > { %v1385_v59 = vpack.i.b16 %v1384_v49, %v1383_v54  ;;  %v1393_v12 = vpack.i.b16 %v1392_v61, %v1391_v1  ;;  %v1405_v27 = vpack.i.b16 %v1360_v13, %v1224_v21  ;;  %v1408_v26 = vshrl.u32 %v1360_v13, 16 }
 0x13b   : > { %v1401_v17 = vpack.i.b16 %v1400_v16, %v1399_v20  ;;  %v1225_v31 = vcombine.low %v1186_v24, %v1218_v18  ;;  %v1407_v32 = vshrl.u32 %v1224_v21, 16  ;;  %v1368_v35 = vshrl.u32 %v4127_v29, 16 }
 0x13c   : > { %v1416_v36 = vshrl.u32 %v1361_v25, 16  ;;  %v1362_v37 = vcombine.high %v1322_v52, %v1354_v7  ;;  %v1367_v38 = vshrl.u32 %v4125_v28, 16  ;;  %v1226_v40 = vcombine.high %v1186_v24, %v1218_v18  ;;  %v342_v28 = vpop.permute.xlu1 %341 }
 0x13d   : > { %1491 = vxpose.xlu0.c.b16.start.end [1/1] (short) (narrow) %v1381_v46, 16  ;;  %1475 = vxpose.xlu1.c.b16.start.end [1/1] (short) (narrow) %v1377_v47, 16  ;;  %v1413_v33 = vpack.i.b16 %v1361_v25, %v1225_v31  ;;  %v1409_v34 = vpack.i.b16 %v1408_v26, %v1407_v32  ;;  %v1415_v39 = vshrl.u32 %v1225_v31, 16  ;;  %v353_v49 = vshrl.u32 %v342_v28, 16 }
 0x13e   : > { %v1369_v41 = vpack.i.b16 %v1368_v35, %v1367_v38  ;;  %v1424_v43 = vshrl.u32 %v1362_v37, 16  ;;  %v1423_v44 = vshrl.u32 %v1226_v40, 16  ;;  %v1421_v45 = vpack.i.b16 %v1362_v37, %v1226_v40 }
 0x13f   : > { %v1417_v42 = vpack.i.b16 %v1416_v36, %v1415_v39 }
 0x140   : > { %v1425_v46 = vpack.i.b16 %v1424_v43, %v1423_v44 }
 0x141   : > { %1523 = vxpose.xlu0.c.b16.start.end [1/1] (short) (narrow) %v1389_v58, 16  ;;  %1507 = vxpose.xlu1.c.b16.start.end [1/1] (short) (narrow) %v1385_v59, 16  ;;  %v340_v29 = vpop.permute.xlu0 %339 }
 0x142   : > { %v351_v55 = vpack.i.b16 %v342_v28, %v340_v29 }
 0x144   : > { %v370_v59 = vrot.slane %v351_v55, %v4040_v19 }
 0x145   : > { %1555 = vxpose.xlu0.c.b16.start.end [1/1] (short) (narrow) %v1397_v6, 16  ;;  %1539 = vxpose.xlu1.c.b16.start.end [1/1] (short) (narrow) %v1393_v12, 16 }
 0x149   : > { %1587 = vxpose.xlu0.c.b16.start.end [1/1] (short) (narrow) %v1405_v27, 16  ;;  %1571 = vxpose.xlu1.c.b16.start.end [1/1] (short) (narrow) %v1401_v17, 16 }
 0x14d   : > { %1619 = vxpose.xlu0.c.b16.start.end [1/1] (short) (narrow) %v1413_v33, 16  ;;  %1603 = vxpose.xlu1.c.b16.start.end [1/1] (short) (narrow) %v1409_v34, 16 }
 0x151   : > { %1443 = vxpose.xlu0.c.b16.start.end [1/1] (short) (narrow) %v1369_v41, 16  ;;  %1635 = vxpose.xlu1.c.b16.start.end [1/1] (short) (narrow) %v1417_v42, 16 }
 0x155   : > { %1651 = vxpose.xlu0.c.b16.start.end [1/1] (short) (narrow) %v1421_v45, 16  ;;  %1667 = vxpose.xlu1.c.b16.start.end [1/1] (short) (narrow) %v1425_v46, 16 }
 0x159   : > { %599 = vrot.lane.b32.xlu1 %v4008_v3, %s3902_s5  ;;  %v352_v3 = vshrl.u32 %v340_v29, 16 }
 0x15b   : > { %v354_v54 = vpack.i.b16 %v353_v49, %v352_v3 }
 0x15d   : > { %601 = vrot.lane.b32.xlu1 %v4031_v9, %s3902_s5 }
 0x15e   : > { %597 = vrot.lane.b32.xlu0 %v4002_v2, %s3902_s5  ;;  %v346_v2 = vshrl.u32 %v4026_v4, 16 }
 0x161   : > { %605 = vrot.lane.b32.xlu1 %v4029_v8, %s3902_s5  ;;  %v347_v8 = vshrl.u32 %v4089_v11, 16 }
 0x162   : > { %603 = vrot.lane.b32.xlu0 %v4035_v15, %s3902_s5 }
 0x165   : > { %609 = vrot.lane.b32.xlu1 %v4046_v23, %s3902_s5  ;;  %v348_v23 = vpack.i.b16 %v347_v8, %v346_v2 }
 0x166   : > { %607 = vrot.lane.b32.xlu0 %v4033_v14, %s3902_s5  ;;  %v345_v14 = vpack.i.b16 %v4089_v11, %v4026_v4 }
 0x167   : > { %v396_v58 = vrot.slane %v348_v23, %v4040_v19 }
 0x168   : > { %v362_v60 = vrot.slane %v345_v14, %v4040_v19 }
 0x16a   : > { %611 = vrot.lane.b32.xlu0 %v4044_v22, %s3902_s5  ;;  %v404_v22 = vrot.slane %v354_v54, %v4040_v19  ;;  %v371_v1 = vcombine.low %v362_v60, %v370_v59  ;;  %v372_v5 = vcombine.high %v362_v60, %v370_v59  ;;  %s3903_s5 = smov [#allocation3]  }
 0x16b   : > { %s3818_s6 = sshll.u32 %s3903_s5, 4  ;;  %s3819_s6 = int_to_ptr.vmem [resolvable:$false] %s3818_s6 }
 0x16c   : > { %v405_v61 = vcombine.low %v396_v58, %v404_v22  ;;  %v406_v62 = vcombine.high %v396_v58, %v404_v22  ;;  %v379_v12 = vrot.slane %v371_v1, %v4057_v30  ;;  %v386_v13 = vrot.slane %v372_v5, %v4057_v30  ;;  %s3820_s7 = scalar_lea.vmem %s3819_s6, 1024  ;;  %p3821_p4 = scmp.lt.s32.totalorder %s4400_s14, %s3819_s6 }
 0x16d   : > { %p3822_p6 = scmp.lt.s32.totalorder %s3820_s7, %s3814_s30 }
 0x16e   : > { %v413_v7 = vrot.slane %v405_v61, %v4057_v30  ;;  %v420_v4 = vrot.slane %v406_v62, %v4057_v30  ;;  %v773_v17 = vcombine.low %v379_v12, %v386_v13  ;;  %v3646_v26 = vcombine.high %v379_v12, %v386_v13 }
 0x16f   : > { %p3823_p7 = por %p3822_p6, %p3821_p4 }
 0x170   : > { %v798_v18 = vcombine.low %v413_v7, %v420_v4  ;;  %v3647_v52 = vcombine.high %v413_v7, %v420_v4  ;;  %v780_v43 = vrot.slane %v773_v17, %v4040_v19  ;;  %v788_v44 = vrot.slane %v3646_v26, %v4040_v19 }
 0x171   : > { %p3824_p8 = pnand %p3823_p7, %p3817_p3 }
 0x172   : > { %v805_v35 = vrot.slane %v798_v18, %v4040_v19  ;;  %v813_v36 = vrot.slane %v3647_v52, %v4040_v19 }
 0x174   : > { %v814_v49 = vcombine.low %v805_v35, %v813_v36 }
 0x19f   : > { %v1435_v47 = vpop.trf.xlu1  ;;  %v1467_v48 = vpop.trf.xlu0 }
 0x1a3   : > { %v1483_v53 = vpop.trf.xlu1  ;;  %v1499_v9 = vpop.trf.xlu0 }
 0x1a4   : > { %v1683_v21 = vcombine.low %v1435_v47, %v1499_v9  ;;  %v789_v9 = vcombine.low %v780_v43, %v788_v44 }
 0x1a6   : > { %v1690_v37 = vrot.slane %v1683_v21, %v4040_v19 }
 0x1a7   : > { %v1515_v15 = vpop.trf.xlu1  ;;  %v1531_v51 = vpop.trf.xlu0 }
 0x1a8   : > { %v1691_v16 = vcombine.low %v1467_v48, %v1531_v51  ;;  %v821_v51 = vrot.slane %v814_v49, %v4057_v30 }
 0x1aa   : > { %v1698_v31 = vrot.slane %v1691_v16, %v4040_v19  ;;  %v827_v60 = vshrl.u32 %v821_v51, 16 }
 0x1ab   : > { %v1547_v56 = vpop.trf.xlu1  ;;  %v1563_v57 = vpop.trf.xlu0 }
 0x1ac   : > { %v1741_v25 = vcombine.low %v1483_v53, %v1547_v56  ;;  %v1715_v45 = vcombine.low %v1690_v37, %v1698_v31  ;;  %v796_v56 = vrot.slane %v789_v9, %v4057_v30 }
 0x1ae   : > { %v1748_v40 = vrot.slane %v1741_v25, %v4040_v19  ;;  %v1722_v2 = vrot.slane %v1715_v45, %v4057_v30  ;;  %v826_v1 = vshrl.u32 %v796_v56, 16  ;;  %v797_v12 = vcombine.high %v796_v56, %v3899_v50 }
 0x1af   : > { %v1579_v63 = vpop.trf.xlu1  ;;  %v1595_v0 = vpop.trf.xlu0 }
 0x1b0   : > { %v828_v4 = vpack.i.b16 %v827_v60, %v826_v1  ;;  %v832_v21 = vshrl.u32 %v797_v12, 16 }
 0x1b3   : > { %v1611_v11 = vpop.trf.xlu1  ;;  %v1627_v6 = vpop.trf.xlu0 }
 0x1b4   : > { %v1699_v32 = vcombine.low %v1563_v57, %v1627_v6 }
 0x1b6   : > { %v1706_v46 = vrot.slane %v1699_v32, %v4040_v19 }
 0x1b7   : > { %v1643_v20 = vpop.trf.xlu1  ;;  %v1451_v24 = vpop.trf.xlu0 }
 0x1b8   : > { %v1733_v27 = vcombine.low %v1451_v24, %v1515_v15  ;;  %v1749_v33 = vcombine.low %v1579_v63, %v1643_v20 }
 0x1ba   : > { %v1740_v34 = vrot.slane %v1733_v27, %v4040_v19  ;;  %v1756_v28 = vrot.slane %v1749_v33, %v4040_v19 }
 0x1bb   : > { %v1675_v38 = vpop.trf.xlu1  ;;  %v1659_v39 = vpop.trf.xlu0 }
 0x1bc   : > { %v1757_v41 = vcombine.low %v1611_v11, %v1675_v38  ;;  %v1707_v42 = vcombine.low %v1595_v0, %v1659_v39  ;;  %v1765_v29 = vcombine.low %v1740_v34, %v1748_v40  ;;  %v825_v0 = vpack.i.b16 %v821_v51, %v796_v56 }
 0x1bd   : > { %v822_v11 = vcombine.high %v821_v51, %v3899_v50 }
 0x1be   : > { %v1764_v47 = vrot.slane %v1757_v41, %v4040_v19  ;;  %v1714_v48 = vrot.slane %v1707_v42, %v4040_v19  ;;  %v1772_v54 = vrot.slane %v1765_v29, %v4057_v30 }
 0x1bf   : > { %v833_v16 = vshrl.u32 %v822_v11, 16  ;;  %v831_v52 = vpack.i.b16 %v822_v11, %v797_v12 }
 0x1c0   : > { %v1773_v3 = vcombine.low %v1756_v28, %v1764_v47  ;;  %v1723_v53 = vcombine.low %v1706_v46, %v1714_v48 }
 0x1c1   : > { %v834_v24 = vpack.i.b16 %v833_v16, %v832_v21 }
 0x1c2   : > { %v1730_v8 = vrot.slane %v1723_v53, %v4057_v30  ;;  %v1780_v15 = vrot.slane %v1773_v3, %v4057_v30 }
 0x1c4   : > { %v1731_v23 = vcombine.low %v1722_v2, %v1730_v8  ;;  %v1732_v55 = vcombine.high %v1722_v2, %v1730_v8  ;;  %v1781_v14 = vcombine.low %v1772_v54, %v1780_v15  ;;  %v1782_v22 = vcombine.high %v1772_v54, %v1780_v15 }
 0x1c6   : > { %v1785_v57 = vpack.i.b16 %v1781_v14, %v1731_v23  ;;  %v1787_v58 = vshrl.u32 %v1731_v23, 16  ;;  %v1788_v59 = vshrl.u32 %v1781_v14, 16  ;;  %v1795_v62 = vshrl.u32 %v1732_v55, 16 }
 0x1c7   : > { %v1796_v63 = vshrl.u32 %v1782_v22, 16  ;;  %v1793_v5 = vpack.i.b16 %v1782_v22, %v1732_v55 }
 0x1c8   : > { %3682 = vmatpush3.bf16.msra.mxu0 %v1785_v57  ;;  %v1789_v61 = vpack.i.b16 %v1788_v59, %v1787_v58 }
 0x1c9   : > { %3693 = vmatprep.subr.bf16.mxu0 %v3900_v10  ;;  %v1797_v6 = vpack.i.b16 %v1796_v63, %v1795_v62 }
 0x1ca   : > { %3688 = vmatpush3.bf16.msra.mxu1 %v1789_v61 }
 0x1cb   : > { %v600_v7 = vpop.permute.xlu1 %599  ;;  %3684 = vmatmul.mubr.msk.bf16.vlgmr.msra.gmra.mrb[0].mxu0 %vm1799_vm1, %v825_v0  ;;  %3699 = vmatprep.subr.bf16.mxu1 %v3900_v10 }
 0x1cc   : > { %3694 = vmatpush3.bf16.msra.mxu0 %v1793_v5  ;;  %3695 = vmatprep.mubr.msk.bf16.mxu0 %vm3901_vm0, %v3900_v10  ;;  %v628_v37 = vshrl.u32 %v600_v7, 16 }
 0x1cd   : > { %3690 = vmatmul.mubr.msk.bf16.vlgmr.msra.gmra.mrb[0].mxu1 %vm1799_vm1, %v828_v4  ;;  %3705 = vmatprep.subr.bf16.mxu0 %v3900_v10 }
 0x1ce   : > { %3700 = vmatpush3.bf16.msra.mxu1 %v1797_v6  ;;  %3701 = vmatprep.mubr.msk.bf16.mxu1 %vm3901_vm0, %v3900_v10 }
 0x1cf   : > { %v602_v13 = vpop.permute.xlu1 %601  ;;  %3711 = vmatprep.subr.bf16.mxu1 %v3900_v10 }
 0x1d0   : > { %v598_v18 = vpop.permute.xlu0 %597  ;;  %v617_v25 = vshrl.u32 %v602_v13, 16 }
 0x1d1   : > { %v616_v27 = vshrl.u32 %v598_v18, 16  ;;  %v615_v26 = vpack.i.b16 %v602_v13, %v598_v18 }
 0x1d3   : > { %v606_v20 = vpop.permute.xlu1 %605  ;;  %3696 = vmatmul.mubr.msk.bf16.vlgmr.msra.gmra.mrb[4].mxu0 %vm1799_vm1, %v831_v52  ;;  %v618_v32 = vpack.i.b16 %v617_v25, %v616_v27  ;;  %v644_v39 = vrot.slane %v615_v26, %v4040_v19 }
 0x1d4   : > { %v604_v17 = vpop.permute.xlu0 %603  ;;  %3707 = vmatprep.mubr.msk.bf16.mxu0 %vm3901_vm0, %v3900_v10  ;;  %v622_v33 = vshrl.u32 %v606_v20, 16 }
 0x1d5   : > { %3702 = vmatmul.mubr.msk.bf16.vlgmr.msra.gmra.mrb[4].mxu1 %vm1799_vm1, %v834_v24  ;;  %v629_v38 = vshrl.u32 %v604_v17, 16  ;;  %v627_v42 = vpack.i.b16 %v604_v17, %v600_v7  ;;  %v678_v46 = vrot.slane %v618_v32, %v4040_v19 }
 0x1d6   : > { %3713 = vmatprep.mubr.msk.bf16.mxu1 %vm3901_vm0, %v3900_v10 }
 0x1d7   : > { %v610_v31 = vpop.permute.xlu1 %609  ;;  %v630_v29 = vpack.i.b16 %v629_v38, %v628_v37  ;;  %v712_v2 = vrot.slane %v627_v42, %v4040_v19 }
 0x1d8   : > { %v621_v34 = vpack.i.b16 %v610_v31, %v606_v20  ;;  %v623_v35 = vshrl.u32 %v610_v31, 16  ;;  %v608_v36 = vpop.permute.xlu0 %607 }
 0x1d9   : > { %v634_v47 = vshrl.u32 %v608_v36, 16  ;;  %v746_v51 = vrot.slane %v630_v29, %v4040_v19 }
 0x1da   : > { %v624_v40 = vpack.i.b16 %v623_v35, %v622_v33  ;;  %v652_v41 = vrot.slane %v621_v34, %v4040_v19 }
 0x1dc   : > { %v653_v43 = vcombine.low %v644_v39, %v652_v41  ;;  %v654_v44 = vcombine.high %v644_v39, %v652_v41  ;;  %v612_v45 = vpop.permute.xlu0 %611  ;;  %v686_v28 = vrot.slane %v624_v40, %v4040_v19 }
 0x1dd   : > { %v633_v48 = vpack.i.b16 %v612_v45, %v608_v36  ;;  %v635_v49 = vshrl.u32 %v612_v45, 16 }
 0x1de   : > { %v668_v3 = vrot.slane %v654_v44, %v4057_v30  ;;  %v661_v53 = vrot.slane %v653_v43, %v4057_v30  ;;  %v688_v9 = vcombine.high %v678_v46, %v686_v28  ;;  %v687_v59 = vcombine.low %v678_v46, %v686_v28 }
 0x1df   : > { %v636_v8 = vpack.i.b16 %v635_v49, %v634_v47  ;;  %v720_v54 = vrot.slane %v633_v48, %v4040_v19 }
 0x1e0   : > { %2093 = vxpose.xlu0.c.b16.start.end [1/1] (short) (narrow) %v668_v3, 16  ;;  %2029 = vxpose.xlu1.c.b16.start.end [1/1] (short) (narrow) %v661_v53, 16  ;;  %v702_v55 = vrot.slane %v688_v9, %v4057_v30  ;;  %v695_v62 = vrot.slane %v687_v59, %v4057_v30  ;;  %v669_v0 = vcombine.high %v661_v53, %v3899_v50 }
 0x1e1   : > { %v721_v15 = vcombine.low %v712_v2, %v720_v54  ;;  %v754_v23 = vrot.slane %v636_v8, %v4040_v19  ;;  %v722_v56 = vcombine.high %v712_v2, %v720_v54  ;;  %v670_v5 = vcombine.high %v668_v3, %v3899_v50 }
 0x1e2   : > { %v703_v63 = vcombine.high %v695_v62, %v3899_v50  ;;  %v704_v1 = vcombine.high %v702_v55, %v3899_v50 }
 0x1e3   : > { %v729_v14 = vrot.slane %v721_v15, %v4057_v30  ;;  %v755_v22 = vcombine.low %v746_v51, %v754_v23  ;;  %v756_v58 = vcombine.high %v746_v51, %v754_v23  ;;  %v736_v60 = vrot.slane %v722_v56, %v4057_v30 }
 0x1e4   : > { %2109 = vxpose.xlu1.c.b16.start.end [1/1] (short) (narrow) %v702_v55, 16 }
 0x1e5   : > { %2157 = vxpose.xlu0.c.b16.start.end [1/1] (short) (narrow) %v729_v14, 16  ;;  %v763_v57 = vrot.slane %v755_v22, %v4057_v30  ;;  %v770_v61 = vrot.slane %v756_v58, %v4057_v30  ;;  %v737_v4 = vcombine.high %v729_v14, %v3899_v50  ;;  %v738_v6 = vcombine.high %v736_v60, %v3899_v50 }
 0x1e7   : > { %v771_v7 = vcombine.high %v763_v57, %v3899_v50  ;;  %v772_v11 = vcombine.high %v770_v61, %v3899_v50 }
 0x1e8   : > { %2173 = vxpose.xlu1.c.b16.start.end [1/1] (short) (narrow) %v763_v57, 16 }
 0x1e9   : > { %2221 = vxpose.xlu0.c.b16.start.end [1/1] (short) (narrow) %v736_v60, 16 }
 0x1ec   : > { %2237 = vxpose.xlu1.c.b16.start.end [1/1] (short) (narrow) %v770_v61, 16 }
 0x1ed   : > { %2045 = vxpose.xlu0.c.b16.start.end [1/1] (short) (narrow) %v695_v62, 16 }
 0x1f0   : > { %2077 = vxpose.xlu1.c.b16.start.end [1/1] (short) (narrow) %v703_v63, 16 }
 0x1f1   : > { %2061 = vxpose.xlu0.c.b16.start.end [1/1] (short) (narrow) %v669_v0, 16 }
 0x1f4   : > { %2141 = vxpose.xlu1.c.b16.start.end [1/1] (short) (narrow) %v704_v1, 16 }
 0x1f5   : > { %2125 = vxpose.xlu0.c.b16.start.end [1/1] (short) (narrow) %v670_v5, 16 }
 0x1f8   : > { %2205 = vxpose.xlu1.c.b16.start.end [1/1] (short) (narrow) %v771_v7, 16 }
 0x1f9   : > { %2189 = vxpose.xlu0.c.b16.start.end [1/1] (short) (narrow) %v737_v4, 16 }
 0x1fc   : > { %2269 = vxpose.xlu1.c.b16.start.end [1/1] (short) (narrow) %v772_v11, 16 }
 0x1fd   : > { %2253 = vxpose.xlu0.c.b16.start.end [1/1] (short) (narrow) %v738_v6, 16 }
 0x246   : > { %v2037_v12 = vpop.trf.xlu1  ;;  %v2101_v13 = vpop.trf.xlu0 }
 0x247   : > { %v2286_v16 = vcombine.high %v2037_v12, %v2101_v13  ;;  %v2285_v34 = vcombine.low %v2037_v12, %v2101_v13 }
 0x249   : > { %v2293_v40 = vrot.slane %v2285_v34, %v4040_v19  ;;  %v2300_v41 = vrot.slane %v2286_v16, %v4040_v19 }
 0x24a   : > { %v2117_v18 = vpop.trf.xlu1 }
 0x24b   : > { %v2165_v52 = vpop.trf.xlu0 }
 0x24e   : > { %v2181_v21 = vpop.trf.xlu1 }
 0x24f   : > { %v2229_v20 = vpop.trf.xlu0 }
 0x250   : > { %v2318_v24 = vcombine.high %v2165_v52, %v2229_v20  ;;  %v2317_v46 = vcombine.low %v2165_v52, %v2229_v20 }
 0x252   : > { %v2245_v25 = vpop.trf.xlu1  ;;  %v2325_v23 = vrot.slane %v2317_v46, %v4040_v19  ;;  %v2332_v55 = vrot.slane %v2318_v24, %v4040_v19 }
 0x253   : > { %v2454_v27 = vcombine.high %v2181_v21, %v2245_v25  ;;  %v2053_v17 = vpop.trf.xlu0  ;;  %v2453_v28 = vcombine.low %v2181_v21, %v2245_v25 }
 0x254   : > { %v2422_v26 = vcombine.high %v2053_v17, %v2117_v18  ;;  %v2421_v32 = vcombine.low %v2053_v17, %v2117_v18 }
 0x255   : > { %v2461_v14 = vrot.slane %v2453_v28, %v4040_v19  ;;  %v2468_v22 = vrot.slane %v2454_v27, %v4040_v19 }
 0x256   : > { %v2085_v31 = vpop.trf.xlu1  ;;  %v2429_v50 = vrot.slane %v2421_v32, %v4040_v19  ;;  %v2436_v36 = vrot.slane %v2422_v26, %v4040_v19 }
 0x257   : > { %v2069_v33 = vpop.trf.xlu0 }
 0x25a   : > { %v2149_v35 = vpop.trf.xlu1 }
 0x25b   : > { %v2437_v37 = vcombine.low %v2085_v31, %v2149_v35  ;;  %v2438_v38 = vcombine.high %v2085_v31, %v2149_v35  ;;  %v2133_v39 = vpop.trf.xlu0 }
 0x25c   : > { %v2301_v42 = vcombine.low %v2069_v33, %v2133_v39  ;;  %v2302_v43 = vcombine.high %v2069_v33, %v2133_v39 }
 0x25d   : > { %v2445_v44 = vrot.slane %v2437_v37, %v4040_v19  ;;  %v2452_v45 = vrot.slane %v2438_v38, %v4040_v19 }
 0x25e   : > { %v2309_v29 = vrot.slane %v2301_v42, %v4040_v19  ;;  %v2316_v47 = vrot.slane %v2302_v43, %v4040_v19  ;;  %v2213_v48 = vpop.trf.xlu1 }
 0x25f   : > { %v2485_v49 = vcombine.low %v2429_v50, %v2445_v44  ;;  %v2486_v3 = vcombine.high %v2429_v50, %v2445_v44  ;;  %v2501_v53 = vcombine.low %v2436_v36, %v2452_v45  ;;  %v2502_v9 = vcombine.high %v2436_v36, %v2452_v45  ;;  %v2197_v2 = vpop.trf.xlu0 }
 0x260   : > { %v2350_v8 = vcombine.high %v2293_v40, %v2309_v29  ;;  %v2365_v54 = vcombine.low %v2300_v41, %v2316_v47  ;;  %v2366_v15 = vcombine.high %v2300_v41, %v2316_v47  ;;  %v2349_v51 = vcombine.low %v2293_v40, %v2309_v29 }
 0x261   : > { %v2500_v57 = vrot.slane %v2486_v3, %v4057_v30  ;;  %v2493_v61 = vrot.slane %v2485_v49, %v4057_v30  ;;  %v2509_v0 = vrot.slane %v2501_v53, %v4057_v30  ;;  %v4249_v1 = vrot.slane %v2502_v9, %v4057_v30 }
 0x262   : > { %v2277_v56 = vpop.trf.xlu1  ;;  %v2364_v5 = vrot.slane %v2350_v8, %v4057_v30  ;;  %v2357_v11 = vrot.slane %v2349_v51, %v4057_v30  ;;  %v2373_v13 = vrot.slane %v2365_v54, %v4057_v30  ;;  %v2380_v16 = vrot.slane %v2366_v15, %v4057_v30 }
 0x263   : > { %v2469_v58 = vcombine.low %v2213_v48, %v2277_v56  ;;  %v2470_v59 = vcombine.high %v2213_v48, %v2277_v56  ;;  %v2261_v60 = vpop.trf.xlu0 }
 0x264   : > { %v2333_v62 = vcombine.low %v2197_v2, %v2261_v60  ;;  %v2334_v63 = vcombine.high %v2197_v2, %v2261_v60 }
 0x265   : > { %v2477_v7 = vrot.slane %v2469_v58, %v4040_v19  ;;  %v2484_v4 = vrot.slane %v2470_v59, %v4040_v19 }
 0x266   : > { %v2341_v6 = vrot.slane %v2333_v62, %v4040_v19  ;;  %v2348_v12 = vrot.slane %v2334_v63, %v4040_v19 }
 0x267   : > { %v2517_v18 = vcombine.low %v2461_v14, %v2477_v7  ;;  %v2518_v52 = vcombine.high %v2461_v14, %v2477_v7  ;;  %v2533_v21 = vcombine.low %v2468_v22, %v2484_v4  ;;  %v2534_v20 = vcombine.high %v2468_v22, %v2484_v4 }
 0x268   : > { %v2381_v24 = vcombine.low %v2325_v23, %v2341_v6  ;;  %v2382_v25 = vcombine.high %v2325_v23, %v2341_v6  ;;  %v2397_v27 = vcombine.low %v2332_v55, %v2348_v12  ;;  %v2398_v17 = vcombine.high %v2332_v55, %v2348_v12 }
 0x269   : > { %v2532_v26 = vrot.slane %v2518_v52, %v4057_v30  ;;  %v2525_v31 = vrot.slane %v2517_v18, %v4057_v30  ;;  %v2541_v32 = vrot.slane %v2533_v21, %v4057_v30  ;;  %v2548_v33 = vrot.slane %v2534_v20, %v4057_v30 }
 0x26a   : > { %v2396_v34 = vrot.slane %v2382_v25, %v4057_v30  ;;  %v2389_v35 = vrot.slane %v2381_v24, %v4057_v30  ;;  %v2405_v50 = vrot.slane %v2397_v27, %v4057_v30  ;;  %v2412_v36 = vrot.slane %v2398_v17, %v4057_v30 }
 0x26b   : > { %v2549_v37 = vcombine.low %v2493_v61, %v2525_v31  ;;  %v4267_v38 = vcombine.high %v2493_v61, %v2525_v31  ;;  %v4269_v39 = vcombine.low %v2500_v57, %v2532_v26  ;;  %v4271_v40 = vcombine.high %v2500_v57, %v2532_v26 }
 0x26c   : > { %v2413_v41 = vcombine.low %v2357_v11, %v2389_v35  ;;  %v4273_v42 = vcombine.high %v2357_v11, %v2389_v35  ;;  %v4275_v43 = vcombine.low %v2364_v5, %v2396_v34  ;;  %v4277_v44 = vcombine.high %v2364_v5, %v2396_v34 }
 0x26d   : > { %v2562_v45 = vshrl.u32 %v2549_v37, 16  ;;  %v2570_v46 = vshrl.u32 %v4267_v38, 16  ;;  %v2578_v28 = vshrl.u32 %v4269_v39, 16  ;;  %v2586_v29 = vshrl.u32 %v4271_v40, 16 }
 0x26e   : > { %v2559_v47 = vpack.i.b16 %v2549_v37, %v2413_v41  ;;  %v2561_v48 = vshrl.u32 %v2413_v41, 16  ;;  %v2567_v49 = vpack.i.b16 %v4267_v38, %v4273_v42  ;;  %v2569_v3 = vshrl.u32 %v4273_v42, 16 }
 0x26f   : > { %v2575_v53 = vpack.i.b16 %v4269_v39, %v4275_v43  ;;  %v2577_v9 = vshrl.u32 %v4275_v43, 16  ;;  %v2583_v2 = vpack.i.b16 %v4271_v40, %v4277_v44  ;;  %v2585_v8 = vshrl.u32 %v4277_v44, 16 }
 0x270   : > { %2621 = vxpose.xlu0.c.b16.start.end [1/1] (short) (narrow) %v2559_v47, 16  ;;  %v2563_v54 = vpack.i.b16 %v2562_v45, %v2561_v48  ;;  %v2571_v15 = vpack.i.b16 %v2570_v46, %v2569_v3  ;;  %v4291_v51 = vcombine.low %v2373_v13, %v2405_v50  ;;  %v4293_v23 = vcombine.low %v2509_v0, %v2541_v32 }
 0x271   : > { %v2579_v55 = vpack.i.b16 %v2578_v28, %v2577_v9  ;;  %v4295_v14 = vpack.i.b16 %v2586_v29, %v2585_v8  ;;  %v4297_v22 = vcombine.high %v2373_v13, %v2405_v50  ;;  %v4299_v56 = vcombine.high %v2509_v0, %v2541_v32 }
 0x272   : > { %2637 = vxpose.xlu1.c.b16.start.end [1/1] (short) (narrow) %v2563_v54, 16  ;;  %v2591_v57 = vpack.i.b16 %v4293_v23, %v4291_v51  ;;  %v2593_v58 = vshrl.u32 %v4291_v51, 16  ;;  %v2594_v59 = vshrl.u32 %v4293_v23, 16  ;;  %v2419_v60 = vcombine.low %v2380_v16, %v2412_v36 }
 0x273   : > { %v2599_v61 = vpack.i.b16 %v4299_v56, %v4297_v22  ;;  %v2601_v62 = vshrl.u32 %v4297_v22, 16  ;;  %v2602_v63 = vshrl.u32 %v4299_v56, 16  ;;  %v2555_v0 = vcombine.low %v4249_v1, %v2548_v33 }
 0x274   : > { %v2595_v5 = vpack.i.b16 %v2594_v59, %v2593_v58  ;;  %v2609_v7 = vshrl.u32 %v2419_v60, 16  ;;  %v4310_v4 = vcombine.high %v2380_v16, %v2412_v36  ;;  %v4313_v11 = vcombine.high %v4249_v1, %v2548_v33  ;;  %v1976_v16 = vld [vmem:[%s324_s9] sm:$0xff] }
 0x275   : > { %v2603_v6 = vpack.i.b16 %v2602_v63, %v2601_v62  ;;  %v2607_v12 = vpack.i.b16 %v2555_v0, %v2419_v60  ;;  %v2610_v13 = vshrl.u32 %v2555_v0, 16 }
 0x276   : > { %v2615_v18 = vpack.i.b16 %v4313_v11, %v4310_v4  ;;  %v2617_v52 = vshrl.u32 %v4310_v4, 16  ;;  %v2618_v21 = vshrl.u32 %v4313_v11, 16 }
 0x277   : > { %v2611_v20 = vpack.i.b16 %v2610_v13, %v2609_v7 }
 0x278   : > { %v4319_v24 = vpack.i.b16 %v2618_v21, %v2617_v52 }
 0x29e   : > { %v1837_v1 = vpop.f32.mrb[0].mxu0 }
 0x29f   : > { %v1972_v25 = vmul.f32 0.25, %v1837_v1  ;;  %v3685_v27 = vpop.f32.mrb[1].mxu0 }
 0x2a0   : > { %v1840_v17 = vpop.f32.mrb[2].mxu0  ;;  %v1880_v26 = vpop.f32.mrb[0].mxu1 }
 0x2a1   : > { %v1973_v31 = vmul.f32 0.25, %v1880_v26  ;;  %v3686_v32 = vpop.f32.mrb[3].mxu0  ;;  %v3691_v33 = vpop.f32.mrb[1].mxu1  ;;  %v1977_v34 = vadd.f32 %v1976_v16, %v1972_v25 }
 0x2a2   : > { %v1883_v35 = vpop.f32.mrb[2].mxu1 }
 0x2a3   : > { %v3692_v50 = vpop.f32.mrb[3].mxu1  ;;  %v1981_v36 = vsel %vm1799_vm1, %v1977_v34, -inf  ;;  %v1978_v37 = vadd.f32 %v1976_v16, %v1973_v31 }
 0x2a4   : > { %1982 = vmax.xlane.f32.xlu0 %v1981_v36 }
 0x2a5   : > { %v1984_v38 = vsel %vm1799_vm1, %v1978_v37, -inf }
 0x2a6   : > { %v1923_v41 = vpop.f32.mrb[4].mxu0  ;;  %1985 = vmax.xlane.f32.xlu1 %v1984_v38 }
 0x2a7   : > { %v3697_v42 = vpop.f32.mrb[5].mxu0  ;;  %v1974_v3 = vmul.f32 0.25, %v1923_v41 }
 0x2a8   : > { %v1926_v45 = vpop.f32.mrb[6].mxu0  ;;  %v1966_v46 = vpop.f32.mrb[4].mxu1 }
 0x2a9   : > { %v3698_v28 = vpop.f32.mrb[7].mxu0  ;;  %v3703_v29 = vpop.f32.mrb[5].mxu1  ;;  %v1975_v9 = vmul.f32 0.25, %v1966_v46  ;;  %v1979_v8 = vadd.f32 %v1976_v16, %v1974_v3 }
 0x2aa   : > { %v1969_v47 = vpop.f32.mrb[6].mxu1 }
 0x2ab   : > { %v3704_v48 = vpop.f32.mrb[7].mxu1  ;;  %v1980_v54 = vadd.f32 %v1976_v16, %v1975_v9  ;;  %v1987_v51 = vsel %vm1799_vm1, %v1979_v8, -inf }
 0x2ad   : > { %v1990_v23 = vsel %vm1799_vm1, %v1980_v54, -inf }
 0x2d1   : > { %2653 = vxpose.xlu0.c.b16.start.end [1/1] (short) (narrow) %v2567_v49, 16 }
 0x2d3   : > { %2669 = vxpose.xlu1.c.b16.start.end [1/1] (short) (narrow) %v2571_v15, 16 }
 0x2d6   : > { %v2629_v49 = vpop.trf.xlu0 }
 0x2d8   : > { %v2645_v15 = vpop.trf.xlu1 }
 0x2de   : > { %1988 = vmax.xlane.f32.xlu0 %v1987_v51 }
 0x2e0   : > { %1991 = vmax.xlane.f32.xlu1 %v1990_v23 }
 0x30b   : > { %2685 = vxpose.xlu0.c.b16.start.end [1/1] (short) (narrow) %v2575_v53, 16 }
 0x30d   : > { %2701 = vxpose.xlu1.c.b16.start.end [1/1] (short) (narrow) %v2579_v55, 16 }
 0x30f   : > { %2717 = vxpose.xlu0.c.b16.start.end [1/1] (short) (narrow) %v2583_v2, 16 }
 0x311   : > { %2733 = vxpose.xlu1.c.b16.start.end [1/1] (short) (narrow) %v4295_v14, 16 }
 0x313   : > { %2749 = vxpose.xlu0.c.b16.start.end [1/1] (short) (narrow) %v2591_v57, 16 }
 0x315   : > { %2765 = vxpose.xlu1.c.b16.start.end [1/1] (short) (narrow) %v2595_v5, 16 }
 0x317   : > { %2781 = vxpose.xlu0.c.b16.start.end [1/1] (short) (narrow) %v2599_v61, 16 }
 0x319   : > { %2797 = vxpose.xlu1.c.b16.start.end [1/1] (short) (narrow) %v2603_v6, 16 }
 0x31b   : > { %2813 = vxpose.xlu0.c.b16.start.end [1/1] (short) (narrow) %v2607_v12, 16 }
 0x31d   : > { %2829 = vxpose.xlu1.c.b16.start.end [1/1] (short) (narrow) %v2611_v20, 16 }
 0x331   : > { %v1983_v22 = vpop.xlane.xlu0 %1982 }
 0x332   : > { %v1993_v56 = vsub.f32 %v1977_v34, %v1983_v22 }
 0x333   : > { %v1986_v58 = vpop.xlane.xlu1 %1985 }
 0x334   : > { %v1997_v39 = vmul.f32 1.442695, %v1993_v56  ;;  %v1994_v43 = vsub.f32 %v1978_v37, %v1986_v58 }
 0x336   : > { %3798 = vpow2.f32 %v1997_v39  ;;  %v1999_v53 = vmul.f32 1.442695, %v1994_v43 }
 0x337   : > { %v2661_v14 = vpop.trf.xlu0 }
 0x338   : > { %3800 = vpow2.f32 %v1999_v53 }
 0x339   : > { %v2677_v57 = vpop.trf.xlu1 }
 0x340   : > { %v3799_v40 = vpop.eup %3798 }
 0x341   : > { %v2005_v44 = vsel %vm1799_vm1, %v3799_v40, 0.0 }
 0x342   : > { %v3801_v2 = vpop.eup %3800  ;;  %2006 = vadd.xlane.f32.xlu0 %v2005_v44 }
 0x343   : > { %v2008_v55 = vsel %vm1799_vm1, %v3801_v2, 0.0 }
 0x344   : > { %2009 = vadd.xlane.f32.xlu1 %v2008_v55 }
 0x36b   : > { %v1989_v59 = vpop.xlane.xlu0 %1988 }
 0x36c   : > { %v1995_v60 = vsub.f32 %v1979_v8, %v1989_v59 }
 0x36d   : > { %v1992_v61 = vpop.xlane.xlu1 %1991 }
 0x36e   : > { %v2001_v62 = vmul.f32 1.442695, %v1995_v60  ;;  %v1996_v63 = vsub.f32 %v1980_v54, %v1992_v61 }
 0x370   : > { %3802 = vpow2.f32 %v2001_v62  ;;  %v2003_v0 = vmul.f32 1.442695, %v1996_v63 }
 0x371   : > { %v2693_v5 = vpop.trf.xlu0 }
 0x372   : > { %3804 = vpow2.f32 %v2003_v0  ;;  %v2877_v6 = vcombine.low %v2629_v49, %v2693_v5 }
 0x373   : > { %v2709_v7 = vpop.trf.xlu1 }
 0x374   : > { %v2927_v13 = vcombine.low %v2645_v15, %v2709_v7  ;;  %v2884_v20 = vrot.slane %v2877_v6, %v4040_v19 }
 0x375   : > { %v2725_v12 = vpop.trf.xlu0 }
 0x376   : > { %v2885_v52 = vcombine.low %v2661_v14, %v2725_v12  ;;  %v2934_v27 = vrot.slane %v2927_v13, %v4040_v19 }
 0x377   : > { %v2741_v21 = vpop.trf.xlu1 }
 0x378   : > { %v2892_v1 = vrot.slane %v2885_v52, %v4040_v19  ;;  %v2935_v16 = vcombine.low %v2677_v57, %v2741_v21 }
 0x379   : > { %v2757_v35 = vpop.trf.xlu0 }
 0x37a   : > { %v3803_v25 = vpop.eup %3802  ;;  %v2909_v17 = vcombine.low %v2884_v20, %v2892_v1  ;;  %v2942_v26 = vrot.slane %v2935_v16, %v4040_v19 }
 0x37b   : > { %v2011_v31 = vsel %vm1799_vm1, %v3803_v25, 0.0  ;;  %v2773_v50 = vpop.trf.xlu1 }
 0x37c   : > { %v3805_v32 = vpop.eup %3804  ;;  %v2959_v33 = vcombine.low %v2934_v27, %v2942_v26  ;;  %2012 = vadd.xlane.f32.xlu0 %v2011_v31  ;;  %v2916_v44 = vrot.slane %v2909_v17, %v4057_v30 }
 0x37d   : > { %v2014_v34 = vsel %vm1799_vm1, %v3805_v32, 0.0  ;;  %v2789_v36 = vpop.trf.xlu0 }
 0x37e   : > { %2015 = vadd.xlane.f32.xlu1 %v2014_v34  ;;  %v2966_v57 = vrot.slane %v2959_v33, %v4057_v30 }
 0x37f   : > { %v2805_v37 = vpop.trf.xlu1 }
 0x381   : > { %v2821_v38 = vpop.trf.xlu0 }
 0x382   : > { %v2893_v9 = vcombine.low %v2757_v35, %v2821_v38 }
 0x383   : > { %v2837_v41 = vpop.trf.xlu1 }
 0x384   : > { %v2943_v54 = vcombine.low %v2773_v50, %v2837_v41  ;;  %v2900_v49 = vrot.slane %v2893_v9, %v4040_v19 }
 0x386   : > { %v2950_v58 = vrot.slane %v2943_v54, %v4040_v19 }
 0x3a9   : > { %2845 = vxpose.xlu0.c.b16.start.end [1/1] (short) (narrow) %v2615_v18, 16 }
 0x3ab   : > { %2861 = vxpose.xlu1.c.b16.start.end [1/1] (short) (narrow) %v4319_v24, 16 }
 0x3cf   : > { %v2007_v42 = vpop.xlane.xlu0 %2006 }
 0x3d0   : > { %3806 = vrcp.f32 %v2007_v42 }
 0x3d1   : > { %v2010_v45 = vpop.xlane.xlu1 %2009 }
 0x3d2   : > { %3808 = vrcp.f32 %v2010_v45 }
 0x3da   : > { %v3807_v46 = vpop.eup %3806 }
 0x3db   : > { %v2018_v28 = vmul.f32 %v3807_v46, %v3799_v40 }
 0x3dc   : > { %v3809_v29 = vpop.eup %3808 }
 0x3dd   : > { %v2025_v47 = vpack.c.bf16 %v2018_v28, %v2018_v28  ;;  %3461 = vst.msk [vmem:[%s4349_s12] sm:$0xff] %vm1799_vm1, %v2018_v28  ;;  %v2020_v4 = vmul.f32 %v3809_v29, %v3801_v2 }
 0x3df   : > { %v2993_v11 = vsel %vm1799_vm1, %v2025_v47, 0  ;;  %v2026_v18 = vpack.c.bf16 %v2020_v4, %v2020_v4  ;;  %3462 = vst.msk [vmem:[%s4349_s12 + $0x8] sm:$0xff] %vm1799_vm1, %v2020_v4 }
 0x3e0   : > { %3706 = vmatpush3.bf16.xpose.msra.mxu0 %v2993_v11 }
 0x3e1   : > { %v3040_v24 = vsel %vm1799_vm1, %v2026_v18, 0  ;;  %3717 = vmatprep.subr.bf16.mxu0 %v3900_v10 }
 0x3e2   : > { %3712 = vmatpush3.bf16.xpose.msra.mxu1 %v3040_v24 }
 0x3e3   : > { %3723 = vmatprep.subr.bf16.mxu1 %v3900_v10 }
 0x409   : > { %v2013_v48 = vpop.xlane.xlu0 %2012 }
 0x40a   : > { %3810 = vrcp.f32 %v2013_v48 }
 0x40b   : > { %v2016_v3 = vpop.xlane.xlu1 %2015 }
 0x40c   : > { %3812 = vrcp.f32 %v2016_v3 }
 0x40f   : > { %v2853_v8 = vpop.trf.xlu0 }
 0x410   : > { %v2901_v51 = vcombine.low %v2789_v36, %v2853_v8 }
 0x411   : > { %v2869_v23 = vpop.trf.xlu1 }
 0x412   : > { %v2908_v15 = vrot.slane %v2901_v51, %v4040_v19  ;;  %v2951_v22 = vcombine.low %v2805_v37, %v2869_v23 }
 0x414   : > { %v3811_v56 = vpop.eup %3810  ;;  %v2917_v39 = vcombine.low %v2900_v49, %v2908_v15  ;;  %v2958_v43 = vrot.slane %v2951_v22, %v4040_v19 }
 0x415   : > { %v2022_v53 = vmul.f32 %v3811_v56, %v3803_v25 }
 0x416   : > { %v3813_v40 = vpop.eup %3812  ;;  %v2924_v2 = vrot.slane %v2917_v39, %v4057_v30  ;;  %v2967_v55 = vcombine.low %v2950_v58, %v2958_v43 }
 0x417   : > { %3463 = vst.msk [vmem:[%s4349_s12 + $0x10] sm:$0xff] %vm1799_vm1, %v2022_v53  ;;  %v2024_v14 = vmul.f32 %v3813_v40, %v3805_v32  ;;  %v2027_v0 = vpack.c.bf16 %v2022_v53, %v2022_v53 }
 0x418   : > { %v2925_v59 = vcombine.low %v2916_v44, %v2924_v2  ;;  %v2926_v60 = vcombine.high %v2916_v44, %v2924_v2  ;;  %v2974_v61 = vrot.slane %v2967_v55, %v4057_v30 }
 0x419   : > { %3464 = vst.msk [vmem:[%s4349_s12 + $0x18] sm:$0xff] %vm1799_vm1, %v2024_v14  ;;  %v2028_v6 = vpack.c.bf16 %v2024_v14, %v2024_v14  ;;  %v3087_v20 = vsel %vm1799_vm1, %v2027_v0, 0 }
 0x41a   : > { %v2975_v62 = vcombine.low %v2966_v57, %v2974_v61  ;;  %v2976_v63 = vcombine.high %v2966_v57, %v2974_v61  ;;  %v2980_v5 = vshrl.u32 %v2925_v59, 16  ;;  %v2986_v7 = vshrl.u32 %v2926_v60, 16 }
 0x41b   : > { %v3134_v25 = vsel %vm1799_vm1, %v2028_v6, 0 }
 0x41c   : > { %v2979_v12 = vpack.i.b16 %v2975_v62, %v2925_v59  ;;  %v2981_v13 = vshrl.u32 %v2975_v62, 16  ;;  %v2985_v52 = vpack.i.b16 %v2976_v63, %v2926_v60  ;;  %v2987_v21 = vshrl.u32 %v2976_v63, 16 }
 0x41e   : > { %3708 = vmatmul.mubr.msk.bf16.vlgmr.msra.gmra.mrb[8].mxu0 %vm1799_vm1, %v2979_v12  ;;  %v2982_v1 = vpack.i.b16 %v2981_v13, %v2980_v5  ;;  %v2988_v16 = vpack.i.b16 %v2987_v21, %v2986_v7 }
 0x41f   : > { %3718 = vmatpush3.bf16.xpose.msra.mxu0 %v3087_v20  ;;  %3719 = vmatprep.mubr.msk.bf16.mxu0 %vm3901_vm0, %v3900_v10 }
 0x420   : > { %3714 = vmatmul.mubr.msk.bf16.vlgmr.msra.gmra.mrb[8].mxu1 %vm1799_vm1, %v2982_v1 }
 0x421   : > { %3724 = vmatpush3.bf16.xpose.msra.mxu1 %v3134_v25  ;;  %3725 = vmatprep.mubr.msk.bf16.mxu1 %vm3901_vm0, %v3900_v10 }
 0x426   : > { %3720 = vmatmul.mubr.msk.bf16.vlgmr.msra.gmra.mrb[12].mxu0 %vm1799_vm1, %v2985_v52 }
 0x428   : > { %3726 = vmatmul.mubr.msk.bf16.vlgmr.msra.gmra.mrb[12].mxu1 %vm1799_vm1, %v2988_v16 }
 0x4f1   : > { %v3029_v27 = vpop.f32.mrb[8].mxu0 }
 0x4f2   : > { %3177 = vxpose.xlu0.b32.start [1/2] (short) (narrow) %v3029_v27, 8  ;;  %v3709_v17 = vpop.f32.mrb[9].mxu0 }
 0x4f3   : > { %v3032_v26 = vpop.f32.mrb[10].mxu0  ;;  %v3076_v31 = vpop.f32.mrb[8].mxu1 }
 0x4f4   : > { %3209 = vxpose.xlu1.b32.start [1/2] (short) (narrow) %v3076_v31, 8  ;;  %v3710_v32 = vpop.f32.mrb[11].mxu0  ;;  %v3715_v33 = vpop.f32.mrb[9].mxu1 }
 0x4f5   : > { %v3079_v34 = vpop.f32.mrb[10].mxu1 }
 0x4f6   : > { %v3716_v35 = vpop.f32.mrb[11].mxu1  ;;  %3178 = vxpose.xlu0.b32.end [2/2] (short) (narrow) %v3032_v26, 8 }
 0x4f8   : > { %3210 = vxpose.xlu1.b32.end [2/2] (short) (narrow) %v3079_v34, 8 }
 0x4f9   : > { %v3123_v50 = vpop.f32.mrb[12].mxu0 }
 0x4fa   : > { %3241 = vxpose.xlu0.b32.start [1/2] (short) (narrow) %v3123_v50, 8  ;;  %v3721_v36 = vpop.f32.mrb[13].mxu0 }
 0x4fb   : > { %v3126_v10 = vpop.f32.mrb[14].mxu0  ;;  %v3170_v37 = vpop.f32.mrb[12].mxu1 }
 0x4fc   : > { %3273 = vxpose.xlu1.b32.start [1/2] (short) (narrow) %v3170_v37, 8  ;;  %v3722_v38 = vpop.f32.mrb[15].mxu0  ;;  %v3727_v41 = vpop.f32.mrb[13].mxu1 }
 0x4fd   : > { %v3173_v42 = vpop.f32.mrb[14].mxu1 }
 0x4fe   : > { %v3728_v45 = vpop.f32.mrb[15].mxu1  ;;  %3242 = vxpose.xlu0.b32.end [2/2] (short) (narrow) %v3126_v10, 8 }
 0x500   : > { %3274 = vxpose.xlu1.b32.end [2/2] (short) (narrow) %v3173_v42, 8 }
 0x572   : > { %v3193_v46 = vpop.trf.xlu0 }
 0x574   : > { %v3225_v28 = vpop.trf.xlu1 }
 0x57a   : > { %v3257_v29 = vpop.trf.xlu0 }
 0x57b   : > { %v3305_v47 = vcombine.low %v3193_v46, %v3257_v29  ;;  %v3306_v4 = vcombine.high %v3193_v46, %v3257_v29 }
 0x57c   : > { %v3289_v11 = vpop.trf.xlu1 }
 0x57d   : > { %v3321_v18 = vcombine.low %v3225_v28, %v3289_v11  ;;  %v3322_v24 = vcombine.high %v3225_v28, %v3289_v11  ;;  %v3313_v48 = vrot.slane %v3305_v47, %v4040_v19  ;;  %v3320_v3 = vrot.slane %v3306_v4, %v4040_v19 }
 0x57f   : > { %v3329_v9 = vrot.slane %v3321_v18, %v4040_v19  ;;  %v3336_v8 = vrot.slane %v3322_v24, %v4040_v19 }
 0x581   : > { %v3337_v54 = vcombine.low %v3313_v48, %v3329_v9  ;;  %v3338_v51 = vcombine.high %v3313_v48, %v3329_v9  ;;  %v3353_v23 = vcombine.low %v3320_v3, %v3336_v8  ;;  %v3354_v49 = vcombine.high %v3320_v3, %v3336_v8 }
 0x583   : > { %v3345_v15 = vrot.slane %v3337_v54, %v4057_v30  ;;  %v3352_v22 = vrot.slane %v3338_v51, %v4057_v30  ;;  %v3361_v56 = vrot.slane %v3353_v23, %v4057_v30  ;;  %v3368_v58 = vrot.slane %v3354_v49, %v4057_v30 }
 0x585   : > { %v3373_v39 = vcombine.low %v3345_v15, %v3352_v22  ;;  %v3656_v43 = vcombine.high %v3345_v15, %v3352_v22  ;;  %v3389_v53 = vcombine.low %v3361_v56, %v3368_v58  ;;  %v3657_v40 = vcombine.high %v3361_v56, %v3368_v58 }
 0x587   : > { %v3380_v44 = vrot.slane %v3373_v39, %v4040_v19  ;;  %v3388_v2 = vrot.slane %v3656_v43, %v4040_v19  ;;  %v3396_v55 = vrot.slane %v3389_v53, %v4040_v19  ;;  %v3404_v14 = vrot.slane %v3657_v40, %v4040_v19 }
 0x589   : > { %v3406_v57 = vcombine.high %v3380_v44, %v3388_v2  ;;  %v3422_v59 = vcombine.high %v3396_v55, %v3404_v14  ;;  %v3405_v60 = vcombine.low %v3380_v44, %v3388_v2  ;;  %v3421_v61 = vcombine.low %v3396_v55, %v3404_v14 }
 0x58b   : > { %v3420_v62 = vrot.slane %v3406_v57, %v4057_v30  ;;  %v3436_v19 = vrot.slane %v3422_v59, %v4057_v30  ;;  %v3413_v63 = vrot.slane %v3405_v60, %v4057_v30  ;;  %v3429_v0 = vrot.slane %v3421_v61, %v4057_v30 }
 0x58c   : > { %3827 = shalt.err (!%p3824_p8)
}
 0x58d   : > { %s3828_s8 = scalar_lea.hbm %s4398_s29, 512  ;;  %s3832_s12 = scalar_lea.hbm %s4463_s4, 1024 }
 0x58e   : > { %p3829_p11 = scmp.ne.s32.totalorder %s4398_s29, %s3828_s8  ;;  %p3833_p0 = scmp.lt.u32.totalorder %s4398_s29, %s4463_s4 }
 0x58f   : > { %p3834_p1 = scmp.lt.u32.totalorder %s3832_s12, %s3828_s8  ;;  %p3836_p3 = scmp.lt.u32.totalorder %s3828_s8, %s4398_s29 }
 0x590   : > { %p3830_p12 = pnand %p3829_p11, %p3973_p5 }
 0x591   : > { %p3835_p2 = por %p3834_p1, %p3833_p0 }
 0x592   : > { %p3831_p13 = pneg %p3830_p12 }
 0x593   : > { %p3837_p4 = por %p3836_p3, %p3835_p2 }
 0x595   : > { %p3838_p6 = pnand %p3837_p4, %p3831_p13 }
 0x597   : > { %3841 = shalt.err (!%p3838_p6)
}
 0x598   : > { %s3904_s26 = smov 128   ;;  %s3905_s30 = smov 8   ;;  %v3439_v30 = vcombine.low %v3420_v62, %v3436_v19  ;;  %v3438_v5 = vcombine.high %v3413_v63, %v3429_v0  ;;  %v3437_v7 = vcombine.low %v3413_v63, %v3429_v0  ;;  %v3440_v6 = vcombine.high %v3420_v62, %v3436_v19 }
 0x599   : > { %3729 = dma.vmem_to_hbm [thread:$0]  (%p3973_p5), %s4400_s14, 512, %s4398_s29, %s3473_s18, %s3904_s26, %s3904_s26, %s3905_s30   ;;  %vm3454_vm2 = vcmask 261120   ;;  %vm3456_vm3 = vcmask 392192   ;;  %vm3459_vm4 = vcmask 519168  }
 0x59a   : > { %s3906_s5 = smov 32   ;;  %s3907_s6 = smov 16  }
 0x59b   : > { %3446 = vrot.lane.b32.xlu1 %v3439_v30, %s3906_s5  ;;  %3442 = vrot.lane.b32.xlu0 %v3438_v5, %s3907_s6  ;;  %s3908_s7 = smov 48   ;;  %s331_s14 = scalar_lea.vmem %s4462_s3, %s3643_s22 }
 0x59f   : > { %3450 = vrot.lane.b32.xlu1 %v3440_v6, %s3908_s7 }
 0x60d   : > { %v3447_v12 = vpop.permute.xlu1 %3446  ;;  %v3443_v13 = vpop.permute.xlu0 %3442 }
 0x60e   : > { %v3453_v52 = vsel %vm1799_vm1, %v3437_v7, %v3443_v13 }
 0x60f   : > { %v3455_v20 = vsel %vm3454_vm2, %v3453_v52, %v3447_v12 }
 0x611   : > { %v3451_v21 = vpop.permute.xlu1 %3450 }
 0x612   : > { %v3457_v1 = vsel %vm3456_vm3, %v3455_v20, %v3451_v21 }
 0x613   : > { %v3458_v16 = vpack.c.bf16 %v3457_v1, %v3457_v1 }
 0x615   : > { %3460 = vst.msk [vmem:[%s331_s14] sm:$0xf] %vm3459_vm4, %v3458_v16 }
 0x616 PF: > { %s3515_s29 = sand.u32 1, %s3872_s15   ;;  %p3732_p5 = pnand %p3634_p10, %p3984_p9 }
 0x617   : > { %s3516_s18 = scalar_lea.sflag [#allocation4], %s3515_s29 }
 0x618   : > { %3867 = dma.done.wait (!%p3732_p5), %s3516_s18, 512  }
 0x619   : > { %3869 = vsyncadd (!%p3732_p5), %s3516_s18, 4294966784  ;;  %s18_s20 = sadd.s32 1, %s3892_s20   ;;  %s4466_s15 = smov %s3876_s16 }
 0x61a   : > { %p15_p7 = scmp.ge.s32.totalorder %s18_s20, 4   ;;  %s4467_s16 = smov %s3880_s17 }
 0x61b   : > { %s4468_s17 = smov %s3982_s27  ;;  %s4469_s18 = smov %s3888_s19 }
 0x61c   : > { %s4470_s19 = smov %s4472_s23  ;;  %17 = sbr.rel (!%p15_p7) target bundleno = 4 (0x4), region = 131 }
 0x623   :  { %3521 = vsyncpa [#allocation4], 1 }
 0x624   :  { %3523 = vsyncpa [#allocation4 + $0x1], 1 }

</bundles_post_ra>
